<compile_context>
chip_gen: v7x
topology: tpu7x:2x2x1
jax: 0.10.0
libtpu: 0.0.40
codegen_flags: <defaults>
</compile_context>

<pallas_src>
import functools

import jax
import jax.numpy as jnp
from jax import lax
from jax.experimental import pallas as pl
from jax.experimental.pallas import tpu as pltpu


# ----------------------------------------------------------------------------
# Tile-size heuristic: largest power-of-two H tile that divides H and keeps
# the per-step working set small enough for every generation's scoped VMEM.
# ----------------------------------------------------------------------------
def _pick_th(h, w, cin, cout, budget_bytes=4 * 1024 * 1024):
    best = 1
    for th in (1, 2, 4, 8, 16, 32, 64, 128):
        if th > h or h % th:
            continue
        # window + shifted copies (f32, cin wide) + accumulator/output (cout)
        work = (th + 2) * w * cin * 4 * 4 + th * w * cout * 4 * 3
        if work <= budget_bytes:
            best = th
    return best


# ----------------------------------------------------------------------------
# Fused kernel: [optional BN+ReLU prologue] -> 3x3 conv + bias -> partial BN
# statistics (sum, sum of squares) for this layer's output.
# ----------------------------------------------------------------------------
def _conv_bn_stats_kernel(xt_ref, xm_ref, xb_ref, w_ref, b_ref, sc_ref, sh_ref,
                          z_ref, st_ref, *, th, w_dim, fuse_bn_relu):
    ht = pl.program_id(1)
    n_ht = pl.num_programs(1)
    cin = xm_ref.shape[-1]
    cout = z_ref.shape[-1]

    # Assemble the (TH+2, W, Cin) window: halo row above, TH rows, halo below.
    win = jnp.concatenate(
        [xt_ref[0], xm_ref[0], xb_ref[0]], axis=0).astype(jnp.float32)

    if fuse_bn_relu:
        # Previous layer's BatchNorm + ReLU, applied on the fly (hoisted
        # reshapes; pure VPU work hidden under the MXU).
        sc = sc_ref[...].reshape(1, 1, cin)
        sh = sh_ref[...].reshape(1, 1, cin)
        win = jnp.maximum(win * sc + sh, 0.0)

    # Zero the halo rows that fall outside the image (conv's zero padding).
    row = lax.broadcasted_iota(jnp.int32, (th + 2, 1, 1), 0)
    kill = ((row == 0) & (ht == 0)) | ((row == th + 1) & (ht == n_ht - 1))
    win = jnp.where(kill, 0.0, win)

    # Flatten once; keep the slab contiguous. The dx = -1/+1 taps are realized
    # as +/-1 sublane shifts of the whole slab plus a per-column mask (this is
    # the conv's zero padding along W) -- no strided im2col reshapes.
    m_all = (th + 2) * w_dim
    m_out = th * w_dim
    a0 = win.reshape(m_all, cin)
    zrow = jnp.zeros((1, cin), jnp.float32)
    col = lax.broadcasted_iota(jnp.int32, (m_all, 1), 0) % w_dim
    a_m = jnp.concatenate([zrow, a0[:m_all - 1, :]], axis=0)   # col c-1
    a_m = jnp.where(col == 0, 0.0, a_m)
    a_p = jnp.concatenate([a0[1:, :], zrow], axis=0)           # col c+1
    a_p = jnp.where(col == w_dim - 1, 0.0, a_p)
    shifted = (a_m, a0, a_p)

    acc = jnp.zeros((m_out, cout), jnp.float32)
    for dy in range(3):
        lo = dy * w_dim                      # aligned row-offset slice
        for dx in range(3):
            acc = acc + jnp.dot(shifted[dx][lo:lo + m_out, :],
                                w_ref[3 * dy + dx],
                                preferred_element_type=jnp.float32)
    acc = acc + b_ref[...]                   # (1, Cout) bias, hoisted broadcast

    z_ref[...] = acc.reshape(1, th, w_dim, cout).astype(z_ref.dtype)

    # Partial BatchNorm statistics for this tile (reduced outside in plain JAX).
    ssum = jnp.sum(acc, axis=0, keepdims=True)
    ssq = jnp.sum(acc * acc, axis=0, keepdims=True)
    st_ref[...] = jnp.concatenate([ssum, ssq], axis=0).reshape(1, 1, 2, cout)


def conv3x3_bn_stats(x, w9, b, scale_in, shift_in, *, fuse_bn_relu):
    """x: (N, H, W, Cin) NHWC f32. w9: (9, Cin, Cout). b/scale/shift: (1, C)."""
    n, h, w, cin = x.shape
    cout = w9.shape[-1]
    th = _pick_th(h, w, cin, cout)
    n_ht = h // th

    kernel = functools.partial(_conv_bn_stats_kernel, th=th, w_dim=w,
                               fuse_bn_relu=fuse_bn_relu)
    # Halo rows via clamped element indices (block height 1 => element index).
    top_map = lambda nn, tt: (nn, jnp.maximum(tt * th - 1, 0), 0, 0)
    mid_map = lambda nn, tt: (nn, tt, 0, 0)
    bot_map = lambda nn, tt: (nn, jnp.minimum((tt + 1) * th, h - 1), 0, 0)

    z, stats = pl.pallas_call(
        kernel,
        out_shape=(jax.ShapeDtypeStruct((n, h, w, cout), jnp.float32),
                   jax.ShapeDtypeStruct((n, n_ht, 2, cout), jnp.float32)),
        grid=(n, n_ht),
        in_specs=[
            pl.BlockSpec((1, 1, w, cin), top_map),
            pl.BlockSpec((1, th, w, cin), mid_map),
            pl.BlockSpec((1, 1, w, cin), bot_map),
            pl.BlockSpec((9, cin, cout), lambda nn, tt: (0, 0, 0)),
            pl.BlockSpec((1, cout), lambda nn, tt: (0, 0)),
            pl.BlockSpec((1, cin), lambda nn, tt: (0, 0)),
            pl.BlockSpec((1, cin), lambda nn, tt: (0, 0)),
        ],
        out_specs=(pl.BlockSpec((1, th, w, cout), lambda nn, tt: (nn, tt, 0, 0)),
                   pl.BlockSpec((1, 1, 2, cout), lambda nn, tt: (nn, tt, 0, 0))),
        compiler_params=pltpu.CompilerParams(
            dimension_semantics=("parallel", "parallel")),
    )(x, x, x, w9, b, scale_in, shift_in)
    return z, stats


# ----------------------------------------------------------------------------
# Small BN+ReLU epilogue kernel (only used for the final layer's output).
# ----------------------------------------------------------------------------
def _bn_relu_kernel(z_ref, sc_ref, sh_ref, o_ref):
    sc = sc_ref[...].reshape(1, 1, 1, -1)
    sh = sh_ref[...].reshape(1, 1, 1, -1)
    o_ref[...] = jnp.maximum(z_ref[...] * sc + sh, 0.0).astype(o_ref.dtype)


def bn_relu(z, scale, shift):
    n, h, w, c = z.shape
    th = _pick_th(h, w, c, c)
    n_ht = h // th
    return pl.pallas_call(
        _bn_relu_kernel,
        out_shape=jax.ShapeDtypeStruct(z.shape, jnp.float32),
        grid=(n, n_ht),
        in_specs=[pl.BlockSpec((1, th, w, c), lambda nn, tt: (nn, tt, 0, 0)),
                  pl.BlockSpec((1, c), lambda nn, tt: (0, 0)),
                  pl.BlockSpec((1, c), lambda nn, tt: (0, 0))],
        out_specs=pl.BlockSpec((1, th, w, c), lambda nn, tt: (nn, tt, 0, 0)),
        compiler_params=pltpu.CompilerParams(
            dimension_semantics=("parallel", "parallel")),
    )(z, scale, shift)


# ----------------------------------------------------------------------------
# BN finalize: tiny (N, HT, 2, C) partials -> per-channel scale/shift.
# ----------------------------------------------------------------------------
def _bn_affine(stats, gamma, beta, count, eps=1e-5):
    s = jnp.sum(stats, axis=(0, 1))                      # (2, C)
    mean = s[0] / count
    var = jnp.maximum(s[1] / count - mean * mean, 0.0)   # biased variance
    scale = gamma / jnp.sqrt(var + eps)
    shift = beta - mean * scale
    return (scale.reshape(1, -1).astype(jnp.float32),
            shift.reshape(1, -1).astype(jnp.float32))


# ----------------------------------------------------------------------------
# DoubleConv forward (NCHW in / NCHW out, like PyTorch)
# ----------------------------------------------------------------------------
def double_conv_forward(x_nchw, params):
    x = jnp.transpose(x_nchw, (0, 2, 3, 1)).astype(jnp.float32)  # NCHW -> NHWC
    n, h, w, cin = x.shape

    # Layer 1: conv + bias + fused BN-stat accumulation.
    ones = jnp.ones((1, cin), jnp.float32)
    zeros = jnp.zeros((1, cin), jnp.float32)
    z1, st1 = conv3x3_bn_stats(x, params["w1_9io"], params["b1"].reshape(1, -1),
                               ones, zeros, fuse_bn_relu=False)
    sc1, sh1 = _bn_affine(st1, params["gamma1"], params["beta1"], n * h * w)

    # Layer 2: layer-1's BN+ReLU is fused as the prologue, so z1 is read from
    # HBM exactly once and the post-activation tensor is never materialized.
    z2, st2 = conv3x3_bn_stats(z1, params["w2_9io"], params["b2"].reshape(1, -1),
                               sc1, sh1, fuse_bn_relu=True)
    sc2, sh2 = _bn_affine(st2, params["gamma2"], params["beta2"], n * h * w)

    # TODO(synk): for v6e/v7x, store inter-layer tensors in bf16 and pad C to
    # a multiple of 128 lanes; kept f32/unpadded here for bit-tight checking.
    a2 = bn_relu(z2, sc2, sh2)
    return jnp.transpose(a2, (0, 3, 1, 2))  # NHWC -> NCHW


# ----------------------------------------------------------------------------
# Parameters / reference
# ----------------------------------------------------------------------------
def _to_kernel_weight(w_oihw):
    # OIHW -> (ky*3 + kx, Cin, Cout)
    cout, cin = w_oihw.shape[0], w_oihw.shape[1]
    return jnp.transpose(w_oihw, (2, 3, 1, 0)).reshape(9, cin, cout)


def init_params(key, in_ch, out_ch):
    k = jax.random.split(key, 8)
    w1 = jax.random.normal(k[0], (out_ch, in_ch, 3, 3), jnp.float32) * 0.1
    b1 = jax.random.normal(k[1], (out_ch,), jnp.float32) * 0.1
    w2 = jax.random.normal(k[2], (out_ch, out_ch, 3, 3), jnp.float32) * 0.1
    b2 = jax.random.normal(k[3], (out_ch,), jnp.float32) * 0.1
    return {
        "w1_oihw": w1, "w1_9io": _to_kernel_weight(w1), "b1": b1,
        "gamma1": 1.0 + 0.1 * jax.random.normal(k[4], (out_ch,), jnp.float32),
        "beta1": 0.1 * jax.random.normal(k[5], (out_ch,), jnp.float32),
        "w2_oihw": w2, "w2_9io": _to_kernel_weight(w2), "b2": b2,
        "gamma2": 1.0 + 0.1 * jax.random.normal(k[6], (out_ch,), jnp.float32),
        "beta2": 0.1 * jax.random.normal(k[7], (out_ch,), jnp.float32),
    }


def _ref_forward(x_nchw, params, eps=1e-5):
    """Pure-JAX reference matching PyTorch semantics."""
    def conv(x, w, b):
        y = lax.conv_general_dilated(
            x, w, window_strides=(1, 1), padding=((1, 1), (1, 1)),
            dimension_numbers=("NCHW", "OIHW", "NCHW"))
        return y + b.reshape(1, -1, 1, 1)

    def bnr(y, g, bta):
        m = jnp.mean(y, axis=(0, 2, 3), keepdims=True)
        v = jnp.mean((y - m) ** 2, axis=(0, 2, 3), keepdims=True)
        yn = (y - m) / jnp.sqrt(v + eps)
        return jnp.maximum(yn * g.reshape(1, -1, 1, 1)
                           + bta.reshape(1, -1, 1, 1), 0.0)

    y = bnr(conv(x_nchw, params["w1_oihw"], params["b1"]),
            params["gamma1"], params["beta1"])
    y = bnr(conv(y, params["w2_oihw"], params["b2"]),
            params["gamma2"], params["beta2"])
    return y


if __name__ == "__main__":
    key = jax.random.PRNGKey(0)
    kx, kp = jax.random.split(key)

    N, in_ch, out_ch, H, W = 2, 4, 8, 16, 16
    x = jax.random.normal(kx, (N, in_ch, H, W), jnp.float32)
    params = init_params(kp, in_ch, out_ch)

    out = jax.block_until_ready(jax.jit(double_conv_forward)(x, params))
    ref = jax.block_until_ready(_ref_forward(x, params))

    assert out.shape == (N, out_ch, H, W)
    err = float(jnp.max(jnp.abs(out - ref)))
    assert jnp.allclose(out, ref, rtol=5e-4, atol=5e-4), err

    print("KERNEL_OK")
</pallas_src>

<mosaic_0001>
module attributes {stable_mosaic.version = 11 : i64} {
  func.func @_bn_relu_kernel(%arg0: i32, %arg1: i32, %arg2: memref<1x16x16x8xf32, #tpu.memory_space<vmem>>, %arg3: memref<1x8xf32, #tpu.memory_space<vmem>>, %arg4: memref<1x8xf32, #tpu.memory_space<vmem>>, %arg5: memref<1x16x16x8xf32, #tpu.memory_space<vmem>>) attributes {dimension_semantics = [#tpu.dimension_semantics<parallel>, #tpu.dimension_semantics<parallel>], iteration_bounds = array<i64: 2, 1>, scalar_prefetch = 0 : i64, scratch_operands = 0 : i64, tpu.core_type = #tpu.core_type<tc>, window_params = [{transform_indices = @transform_0, window_bounds = array<i64: 1, 16, 16, 8>}, {pipeline_mode = #tpu.pipeline_mode<synchronous>, transform_indices = @transform_1, window_bounds = array<i64: 1, 8>}, {pipeline_mode = #tpu.pipeline_mode<synchronous>, transform_indices = @transform_2, window_bounds = array<i64: 1, 8>}, {transform_indices = @transform_3, window_bounds = array<i64: 1, 16, 16, 8>}]} {
    %c0 = arith.constant 0 : index
    %c0_0 = arith.constant 0 : index
    %0 = vector.load %arg3[%c0, %c0_0] : memref<1x8xf32, #tpu.memory_space<vmem>>, vector<1x8xf32>
    %1 = vector.shape_cast %0 : vector<1x8xf32> to vector<1x1x1x8xf32>
    %c0_1 = arith.constant 0 : index
    %c0_2 = arith.constant 0 : index
    %2 = vector.load %arg4[%c0_1, %c0_2] : memref<1x8xf32, #tpu.memory_space<vmem>>, vector<1x8xf32>
    %3 = vector.shape_cast %2 : vector<1x8xf32> to vector<1x1x1x8xf32>
    %c0_3 = arith.constant 0 : index
    %c0_4 = arith.constant 0 : index
    %c0_5 = arith.constant 0 : index
    %c0_6 = arith.constant 0 : index
    %4 = vector.load %arg2[%c0_3, %c0_4, %c0_5, %c0_6] : memref<1x16x16x8xf32, #tpu.memory_space<vmem>>, vector<1x16x16x8xf32>
    %5 = vector.broadcast %1 : vector<1x1x1x8xf32> to vector<1x16x16x8xf32>
    %6 = arith.mulf %4, %5 : vector<1x16x16x8xf32>
    %7 = vector.broadcast %3 : vector<1x1x1x8xf32> to vector<1x16x16x8xf32>
    %8 = arith.addf %6, %7 : vector<1x16x16x8xf32>
    %cst = arith.constant 0.000000e+00 : f32
    %9 = vector.broadcast %cst : f32 to vector<1x16x16x8xf32>
    %10 = arith.maximumf %8, %9 : vector<1x16x16x8xf32>
    %c0_7 = arith.constant 0 : index
    %c0_8 = arith.constant 0 : index
    %c0_9 = arith.constant 0 : index
    %c0_10 = arith.constant 0 : index
    %11 = vector.load %arg5[%c0_7, %c0_8, %c0_9, %c0_10] : memref<1x16x16x8xf32, #tpu.memory_space<vmem>>, vector<1x16x16x8xf32>
    tpu.vector_store %arg5[%c0_7, %c0_8, %c0_9, %c0_10], %10 {strides = array<i32>} : memref<1x16x16x8xf32, #tpu.memory_space<vmem>>, vector<1x16x16x8xf32>,
    return
  }
  func.func @transform_0(%arg0: i32, %arg1: i32) -> (i32, i32, i32, i32) {
    %c0_i32 = arith.constant 0 : i32
    %c0_i32_0 = arith.constant 0 : i32
    %c0_i32_1 = arith.constant 0 : i32
    return %arg0, %arg1, %c0_i32, %c0_i32_0 : i32, i32, i32, i32
  }
  func.func @transform_1(%arg0: i32, %arg1: i32) -> (i32, i32) {
    %c0_i32 = arith.constant 0 : i32
    %c0_i32_0 = arith.constant 0 : i32
    %c0_i32_1 = arith.constant 0 : i32
    return %c0_i32, %c0_i32_0 : i32, i32
  }
  func.func @transform_2(%arg0: i32, %arg1: i32) -> (i32, i32) {
    %c0_i32 = arith.constant 0 : i32
    %c0_i32_0 = arith.constant 0 : i32
    %c0_i32_1 = arith.constant 0 : i32
    return %c0_i32, %c0_i32_0 : i32, i32
  }
  func.func @transform_3(%arg0: i32, %arg1: i32) -> (i32, i32, i32, i32) {
    %c0_i32 = arith.constant 0 : i32
    %c0_i32_0 = arith.constant 0 : i32
    %c0_i32_1 = arith.constant 0 : i32
    return %arg0, %arg1, %c0_i32, %c0_i32_0 : i32, i32, i32, i32
  }
}

module attributes {stable_mosaic.version = 11 : i64} {
  func.func @_conv_bn_stats_kernel(%arg0: i32, %arg1: i32, %arg2: memref<1x1x16x4xf32, #tpu.memory_space<vmem>>, %arg3: memref<1x16x16x4xf32, #tpu.memory_space<vmem>>, %arg4: memref<1x1x16x4xf32, #tpu.memory_space<vmem>>, %arg5: memref<9x4x8xf32, #tpu.memory_space<vmem>>, %arg6: memref<1x8xf32, #tpu.memory_space<vmem>>, %arg7: memref<1x4xf32, #tpu.memory_space<vmem>>, %arg8: memref<1x4xf32, #tpu.memory_space<vmem>>, %arg9: memref<1x16x16x8xf32, #tpu.memory_space<vmem>>, %arg10: memref<1x1x2x8xf32, #tpu.memory_space<vmem>>) attributes {dimension_semantics = [#tpu.dimension_semantics<parallel>, #tpu.dimension_semantics<parallel>], iteration_bounds = array<i64: 2, 1>, scalar_prefetch = 0 : i64, scratch_operands = 0 : i64, tpu.core_type = #tpu.core_type<tc>, window_params = [{transform_indices = @transform_0, window_bounds = array<i64: 1, 1, 16, 4>}, {transform_indices = @transform_1, window_bounds = array<i64: 1, 16, 16, 4>}, {transform_indices = @transform_2, window_bounds = array<i64: 1, 1, 16, 4>}, {pipeline_mode = #tpu.pipeline_mode<synchronous>, transform_indices = @transform_3, window_bounds = array<i64: 9, 4, 8>}, {pipeline_mode = #tpu.pipeline_mode<synchronous>, transform_indices = @transform_4, window_bounds = array<i64: 1, 8>}, {pipeline_mode = #tpu.pipeline_mode<synchronous>, transform_indices = @transform_5, window_bounds = array<i64: 1, 4>}, {pipeline_mode = #tpu.pipeline_mode<synchronous>, transform_indices = @transform_6, window_bounds = array<i64: 1, 4>}, {transform_indices = @transform_7, window_bounds = array<i64: 1, 16, 16, 8>}, {transform_indices = @transform_8, window_bounds = array<i64: 1, 1, 2, 8>}]} {
    %c0 = arith.constant 0 : index
    %c0_0 = arith.constant 0 : index
    %c0_1 = arith.constant 0 : index
    %c0_2 = arith.constant 0 : index
    %0 = vector.load %arg2[%c0, %c0_0, %c0_1, %c0_2] : memref<1x1x16x4xf32, #tpu.memory_space<vmem>>, vector<1x1x16x4xf32>
    %1 = vector.shape_cast %0 : vector<1x1x16x4xf32> to vector<1x16x4xf32>
    %c0_3 = arith.constant 0 : index
    %c0_4 = arith.constant 0 : index
    %c0_5 = arith.constant 0 : index
    %c0_6 = arith.constant 0 : index
    %2 = vector.load %arg3[%c0_3, %c0_4, %c0_5, %c0_6] : memref<1x16x16x4xf32, #tpu.memory_space<vmem>>, vector<1x16x16x4xf32>
    %3 = vector.shape_cast %2 : vector<1x16x16x4xf32> to vector<16x16x4xf32>
    %c0_7 = arith.constant 0 : index
    %c0_8 = arith.constant 0 : index
    %c0_9 = arith.constant 0 : index
    %c0_10 = arith.constant 0 : index
    %4 = vector.load %arg4[%c0_7, %c0_8, %c0_9, %c0_10] : memref<1x1x16x4xf32, #tpu.memory_space<vmem>>, vector<1x1x16x4xf32>
    %5 = vector.shape_cast %4 : vector<1x1x16x4xf32> to vector<1x16x4xf32>
    %6 = tpu.concatenate %1, %3, %5 in 0 : vector<1x16x4xf32>, vector<16x16x4xf32>, vector<1x16x4xf32> -> vector<18x16x4xf32>
    %7 = tpu.iota {dimensions = array<i32: 0>} : vector<18x1x1xi32>
    %c0_i32 = arith.constant 0 : i32
    %8 = vector.broadcast %c0_i32 : i32 to vector<18x1x1xi32>
    %9 = arith.cmpi eq, %7, %8 : vector<18x1x1xi32>
    %c0_i32_11 = arith.constant 0 : i32
    %10 = arith.cmpi eq, %arg1, %c0_i32_11 : i32
    %11 = vector.broadcast %10 : i1 to vector<18x1x1xi1>
    %12 = arith.andi %9, %11 : vector<18x1x1xi1>
    %c17_i32 = arith.constant 17 : i32
    %13 = vector.broadcast %c17_i32 : i32 to vector<18x1x1xi32>
    %14 = arith.cmpi eq, %7, %13 : vector<18x1x1xi32>
    %c0_i32_12 = arith.constant 0 : i32
    %15 = arith.cmpi eq, %arg1, %c0_i32_12 : i32
    %16 = vector.broadcast %15 : i1 to vector<18x1x1xi1>
    %17 = arith.andi %14, %16 : vector<18x1x1xi1>
    %18 = arith.ori %12, %17 : vector<18x1x1xi1>
    %cst = arith.constant 0.000000e+00 : f32
    %19 = vector.shape_cast %18 : vector<18x1x1xi1> to vector<18x1x1xi1>
    %20 = vector.broadcast %19 : vector<18x1x1xi1> to vector<18x16x4xi1>
    %21 = vector.broadcast %cst : f32 to vector<18x16x4xf32>
    %22 = arith.select %20, %21, %6 : vector<18x16x4xi1>, vector<18x16x4xf32>
    %23 = vector.shape_cast %22 : vector<18x16x4xf32> to vector<288x4xf32>
    %cst_13 = arith.constant 0.000000e+00 : f32
    %24 = vector.broadcast %cst_13 : f32 to vector<1x4xf32>
    %25 = tpu.iota {dimensions = array<i32: 0>} : vector<288x1xi32>
    %c16_i32 = arith.constant 16 : i32
    %c0_i32_14 = arith.constant 0 : i32
    %26 = arith.cmpi eq, %c16_i32, %c0_i32_14 : i32
    %c1_i32 = arith.constant 1 : i32
    %27 = arith.select %26, %c1_i32, %c16_i32 : i32
    %28 = vector.broadcast %27 : i32 to vector<288x1xi32>
    %29 = arith.remsi %25, %28 : vector<288x1xi32>
    %c0_i32_15 = arith.constant 0 : i32
    %30 = vector.broadcast %c0_i32_15 : i32 to vector<288x1xi32>
    %31 = arith.cmpi ne, %29, %30 : vector<288x1xi32>
    %c0_i32_16 = arith.constant 0 : i32
    %32 = vector.broadcast %c0_i32_16 : i32 to vector<288x1xi32>
    %33 = arith.cmpi slt, %29, %32 : vector<288x1xi32>
    %c0_i32_17 = arith.constant 0 : i32
    %34 = arith.cmpi slt, %27, %c0_i32_17 : i32
    %35 = vector.broadcast %34 : i1 to vector<288x1xi1>
    %36 = vector.broadcast %35 : vector<288x1xi1> to vector<288x1xi1>
    %37 = arith.xori %33, %36 : vector<288x1xi1>
    %38 = arith.andi %37, %31 : vector<288x1xi1>
    %39 = vector.broadcast %27 : i32 to vector<288x1xi32>
    %40 = arith.addi %29, %39 : vector<288x1xi32>
    %41 = arith.select %38, %40, %29 : vector<288x1xi1>, vector<288x1xi32>
    %42 = vector.extract_strided_slice %23 {offsets = [0, 0], sizes = [287, 4], strides = [1, 1]} : vector<288x4xf32> to vector<287x4xf32>
    %43 = tpu.concatenate %24, %42 in 0 : vector<1x4xf32>, vector<287x4xf32> -> vector<288x4xf32>
    %c0_i32_18 = arith.constant 0 : i32
    %44 = vector.broadcast %c0_i32_18 : i32 to vector<288x1xi32>
    %45 = arith.cmpi eq, %41, %44 : vector<288x1xi32>
    %cst_19 = arith.constant 0.000000e+00 : f32
    %46 = vector.shape_cast %45 : vector<288x1xi1> to vector<288x1xi1>
    %47 = vector.broadcast %46 : vector<288x1xi1> to vector<288x4xi1>
    %48 = vector.broadcast %cst_19 : f32 to vector<288x4xf32>
    %49 = arith.select %47, %48, %43 : vector<288x4xi1>, vector<288x4xf32>
    %50 = vector.extract_strided_slice %23 {offsets = [1, 0], sizes = [287, 4], strides = [1, 1]} : vector<288x4xf32> to vector<287x4xf32>
    %51 = tpu.concatenate %50, %24 in 0 : vector<287x4xf32>, vector<1x4xf32> -> vector<288x4xf32>
    %c15_i32 = arith.constant 15 : i32
    %52 = vector.broadcast %c15_i32 : i32 to vector<288x1xi32>
    %53 = arith.cmpi eq, %41, %52 : vector<288x1xi32>
    %cst_20 = arith.constant 0.000000e+00 : f32
    %54 = vector.shape_cast %53 : vector<288x1xi1> to vector<288x1xi1>
    %55 = vector.broadcast %54 : vector<288x1xi1> to vector<288x4xi1>
    %56 = vector.broadcast %cst_20 : f32 to vector<288x4xf32>
    %57 = arith.select %55, %56, %51 : vector<288x4xi1>, vector<288x4xf32>
    %cst_21 = arith.constant 0.000000e+00 : f32
    %58 = vector.broadcast %cst_21 : f32 to vector<256x8xf32>
    %59 = vector.extract_strided_slice %49 {offsets = [0, 0], sizes = [256, 4], strides = [1, 1]} : vector<288x4xf32> to vector<256x4xf32>
    %c0_22 = arith.constant 0 : index
    %c0_23 = arith.constant 0 : index
    %c0_24 = arith.constant 0 : index
    %60 = vector.load %arg5[%c0_22, %c0_23, %c0_24] : memref<9x4x8xf32, #tpu.memory_space<vmem>>, vector<1x4x8xf32>
    %61 = vector.shape_cast %60 : vector<1x4x8xf32> to vector<4x8xf32>
    %cst_25 = arith.constant dense<0.000000e+00> : vector<256x8xf32>
    %62 = tpu.matmul %59, %61, %cst_25 {dimension_numbers = #tpu.dot_dimension_numbers<[1], [0], [0], [1], [0, 0, 1, 1], [], []>} : vector<256x4xf32>, vector<4x8xf32>, vector<256x8xf32> -> vector<256x8xf32>
    %63 = arith.addf %58, %62 : vector<256x8xf32>
    %64 = vector.extract_strided_slice %23 {offsets = [0, 0], sizes = [256, 4], strides = [1, 1]} : vector<288x4xf32> to vector<256x4xf32>
    %c1 = arith.constant 1 : index
    %c0_26 = arith.constant 0 : index
    %c0_27 = arith.constant 0 : index
    %65 = vector.load %arg5[%c1, %c0_26, %c0_27] : memref<9x4x8xf32, #tpu.memory_space<vmem>>, vector<1x4x8xf32>
    %66 = vector.shape_cast %65 : vector<1x4x8xf32> to vector<4x8xf32>
    %cst_28 = arith.constant dense<0.000000e+00> : vector<256x8xf32>
    %67 = tpu.matmul %64, %66, %cst_28 {dimension_numbers = #tpu.dot_dimension_numbers<[1], [0], [0], [1], [0, 0, 1, 1], [], []>} : vector<256x4xf32>, vector<4x8xf32>, vector<256x8xf32> -> vector<256x8xf32>
    %68 = arith.addf %63, %67 : vector<256x8xf32>
    %69 = vector.extract_strided_slice %57 {offsets = [0, 0], sizes = [256, 4], strides = [1, 1]} : vector<288x4xf32> to vector<256x4xf32>
    %c2 = arith.constant 2 : index
    %c0_29 = arith.constant 0 : index
    %c0_30 = arith.constant 0 : index
    %70 = vector.load %arg5[%c2, %c0_29, %c0_30] : memref<9x4x8xf32, #tpu.memory_space<vmem>>, vector<1x4x8xf32>
    %71 = vector.shape_cast %70 : vector<1x4x8xf32> to vector<4x8xf32>
    %cst_31 = arith.constant dense<0.000000e+00> : vector<256x8xf32>
    %72 = tpu.matmul %69, %71, %cst_31 {dimension_numbers = #tpu.dot_dimension_numbers<[1], [0], [0], [1], [0, 0, 1, 1], [], []>} : vector<256x4xf32>, vector<4x8xf32>, vector<256x8xf32> -> vector<256x8xf32>
    %73 = arith.addf %68, %72 : vector<256x8xf32>
    %74 = vector.extract_strided_slice %49 {offsets = [16, 0], sizes = [256, 4], strides = [1, 1]} : vector<288x4xf32> to vector<256x4xf32>
    %c3 = arith.constant 3 : index
    %c0_32 = arith.constant 0 : index
    %c0_33 = arith.constant 0 : index
    %75 = vector.load %arg5[%c3, %c0_32, %c0_33] : memref<9x4x8xf32, #tpu.memory_space<vmem>>, vector<1x4x8xf32>
    %76 = vector.shape_cast %75 : vector<1x4x8xf32> to vector<4x8xf32>
    %cst_34 = arith.constant dense<0.000000e+00> : vector<256x8xf32>
    %77 = tpu.matmul %74, %76, %cst_34 {dimension_numbers = #tpu.dot_dimension_numbers<[1], [0], [0], [1], [0, 0, 1, 1], [], []>} : vector<256x4xf32>, vector<4x8xf32>, vector<256x8xf32> -> vector<256x8xf32>
    %78 = arith.addf %73, %77 : vector<256x8xf32>
    %79 = vector.extract_strided_slice %23 {offsets = [16, 0], sizes = [256, 4], strides = [1, 1]} : vector<288x4xf32> to vector<256x4xf32>
    %c4 = arith.constant 4 : index
    %c0_35 = arith.constant 0 : index
    %c0_36 = arith.constant 0 : index
    %80 = vector.load %arg5[%c4, %c0_35, %c0_36] : memref<9x4x8xf32, #tpu.memory_space<vmem>>, vector<1x4x8xf32>
    %81 = vector.shape_cast %80 : vector<1x4x8xf32> to vector<4x8xf32>
    %cst_37 = arith.constant dense<0.000000e+00> : vector<256x8xf32>
    %82 = tpu.matmul %79, %81, %cst_37 {dimension_numbers = #tpu.dot_dimension_numbers<[1], [0], [0], [1], [0, 0, 1, 1], [], []>} : vector<256x4xf32>, vector<4x8xf32>, vector<256x8xf32> -> vector<256x8xf32>
    %83 = arith.addf %78, %82 : vector<256x8xf32>
    %84 = vector.extract_strided_slice %57 {offsets = [16, 0], sizes = [256, 4], strides = [1, 1]} : vector<288x4xf32> to vector<256x4xf32>
    %c5 = arith.constant 5 : index
    %c0_38 = arith.constant 0 : index
    %c0_39 = arith.constant 0 : index
    %85 = vector.load %arg5[%c5, %c0_38, %c0_39] : memref<9x4x8xf32, #tpu.memory_space<vmem>>, vector<1x4x8xf32>
    %86 = vector.shape_cast %85 : vector<1x4x8xf32> to vector<4x8xf32>
    %cst_40 = arith.constant dense<0.000000e+00> : vector<256x8xf32>
    %87 = tpu.matmul %84, %86, %cst_40 {dimension_numbers = #tpu.dot_dimension_numbers<[1], [0], [0], [1], [0, 0, 1, 1], [], []>} : vector<256x4xf32>, vector<4x8xf32>, vector<256x8xf32> -> vector<256x8xf32>
    %88 = arith.addf %83, %87 : vector<256x8xf32>
    %89 = vector.extract_strided_slice %49 {offsets = [32, 0], sizes = [256, 4], strides = [1, 1]} : vector<288x4xf32> to vector<256x4xf32>
    %c6 = arith.constant 6 : index
    %c0_41 = arith.constant 0 : index
    %c0_42 = arith.constant 0 : index
    %90 = vector.load %arg5[%c6, %c0_41, %c0_42] : memref<9x4x8xf32, #tpu.memory_space<vmem>>, vector<1x4x8xf32>
    %91 = vector.shape_cast %90 : vector<1x4x8xf32> to vector<4x8xf32>
    %cst_43 = arith.constant dense<0.000000e+00> : vector<256x8xf32>
    %92 = tpu.matmul %89, %91, %cst_43 {dimension_numbers = #tpu.dot_dimension_numbers<[1], [0], [0], [1], [0, 0, 1, 1], [], []>} : vector<256x4xf32>, vector<4x8xf32>, vector<256x8xf32> -> vector<256x8xf32>
    %93 = arith.addf %88, %92 : vector<256x8xf32>
    %94 = vector.extract_strided_slice %23 {offsets = [32, 0], sizes = [256, 4], strides = [1, 1]} : vector<288x4xf32> to vector<256x4xf32>
    %c7 = arith.constant 7 : index
    %c0_44 = arith.constant 0 : index
    %c0_45 = arith.constant 0 : index
    %95 = vector.load %arg5[%c7, %c0_44, %c0_45] : memref<9x4x8xf32, #tpu.memory_space<vmem>>, vector<1x4x8xf32>
    %96 = vector.shape_cast %95 : vector<1x4x8xf32> to vector<4x8xf32>
    %cst_46 = arith.constant dense<0.000000e+00> : vector<256x8xf32>
    %97 = tpu.matmul %94, %96, %cst_46 {dimension_numbers = #tpu.dot_dimension_numbers<[1], [0], [0], [1], [0, 0, 1, 1], [], []>} : vector<256x4xf32>, vector<4x8xf32>, vector<256x8xf32> -> vector<256x8xf32>
    %98 = arith.addf %93, %97 : vector<256x8xf32>
    %99 = vector.extract_strided_slice %57 {offsets = [32, 0], sizes = [256, 4], strides = [1, 1]} : vector<288x4xf32> to vector<256x4xf32>
    %c8 = arith.constant 8 : index
    %c0_47 = arith.constant 0 : index
    %c0_48 = arith.constant 0 : index
    %100 = vector.load %arg5[%c8, %c0_47, %c0_48] : memref<9x4x8xf32, #tpu.memory_space<vmem>>, vector<1x4x8xf32>
    %101 = vector.shape_cast %100 : vector<1x4x8xf32> to vector<4x8xf32>
    %cst_49 = arith.constant dense<0.000000e+00> : vector<256x8xf32>
    %102 = tpu.matmul %99, %101, %cst_49 {dimension_numbers = #tpu.dot_dimension_numbers<[1], [0], [0], [1], [0, 0, 1, 1], [], []>} : vector<256x4xf32>, vector<4x8xf32>, vector<256x8xf32> -> vector<256x8xf32>
    %103 = arith.addf %98, %102 : vector<256x8xf32>
    %c0_50 = arith.constant 0 : index
    %c0_51 = arith.constant 0 : index
    %104 = vector.load %arg6[%c0_50, %c0_51] : memref<1x8xf32, #tpu.memory_space<vmem>>, vector<1x8xf32>
    %105 = vector.broadcast %104 : vector<1x8xf32> to vector<256x8xf32>
    %106 = arith.addf %103, %105 : vector<256x8xf32>
    %107 = vector.shape_cast %106 : vector<256x8xf32> to vector<1x16x16x8xf32>
    %c0_52 = arith.constant 0 : index
    %c0_53 = arith.constant 0 : index
    %c0_54 = arith.constant 0 : index
    %c0_55 = arith.constant 0 : index
    %108 = vector.load %arg9[%c0_52, %c0_53, %c0_54, %c0_55] : memref<1x16x16x8xf32, #tpu.memory_space<vmem>>, vector<1x16x16x8xf32>
    tpu.vector_store %arg9[%c0_52, %c0_53, %c0_54, %c0_55], %107 {strides = array<i32>} : memref<1x16x16x8xf32, #tpu.memory_space<vmem>>, vector<1x16x16x8xf32>,
    %cst_56 = arith.constant dense<0.000000e+00> : vector<8xf32>
    %109 = vector.multi_reduction <add>, %106, %cst_56 [0] : vector<256x8xf32> to vector<8xf32>
    %110 = vector.shape_cast %109 : vector<8xf32> to vector<1x8xf32>
    %111 = arith.mulf %106, %106 : vector<256x8xf32>
    %cst_57 = arith.constant dense<0.000000e+00> : vector<8xf32>
    %112 = vector.multi_reduction <add>, %111, %cst_57 [0] : vector<256x8xf32> to vector<8xf32>
    %113 = vector.shape_cast %112 : vector<8xf32> to vector<1x8xf32>
    %114 = tpu.concatenate %110, %113 in 0 : vector<1x8xf32>, vector<1x8xf32> -> vector<2x8xf32>
    %115 = vector.shape_cast %114 : vector<2x8xf32> to vector<1x1x2x8xf32>
    %c0_58 = arith.constant 0 : index
    %c0_59 = arith.constant 0 : index
    %c0_60 = arith.constant 0 : index
    %c0_61 = arith.constant 0 : index
    %116 = vector.load %arg10[%c0_58, %c0_59, %c0_60, %c0_61] : memref<1x1x2x8xf32, #tpu.memory_space<vmem>>, vector<1x1x2x8xf32>
    tpu.vector_store %arg10[%c0_58, %c0_59, %c0_60, %c0_61], %115 {strides = array<i32>} : memref<1x1x2x8xf32, #tpu.memory_space<vmem>>, vector<1x1x2x8xf32>,
    return
  }
  func.func @transform_0(%arg0: i32, %arg1: i32) -> (i32, i32, i32, i32) {
    %c16_i32 = arith.constant 16 : i32
    %0 = arith.muli %arg1, %c16_i32 : i32
    %c1_i32 = arith.constant 1 : i32
    %1 = arith.subi %0, %c1_i32 : i32
    %c0_i32 = arith.constant 0 : i32
    %2 = arith.maxsi %1, %c0_i32 : i32
    %c0_i32_0 = arith.constant 0 : i32
    %c0_i32_1 = arith.constant 0 : i32
    %c0_i32_2 = arith.constant 0 : i32
    return %arg0, %2, %c0_i32_0, %c0_i32_1 : i32, i32, i32, i32
  }
  func.func @transform_1(%arg0: i32, %arg1: i32) -> (i32, i32, i32, i32) {
    %c0_i32 = arith.constant 0 : i32
    %c0_i32_0 = arith.constant 0 : i32
    %c0_i32_1 = arith.constant 0 : i32
    return %arg0, %arg1, %c0_i32, %c0_i32_0 : i32, i32, i32, i32
  }
  func.func @transform_2(%arg0: i32, %arg1: i32) -> (i32, i32, i32, i32) {
    %c1_i32 = arith.constant 1 : i32
    %0 = arith.addi %arg1, %c1_i32 : i32
    %c16_i32 = arith.constant 16 : i32
    %1 = arith.muli %0, %c16_i32 : i32
    %c15_i32 = arith.constant 15 : i32
    %2 = arith.minsi %1, %c15_i32 : i32
    %c0_i32 = arith.constant 0 : i32
    %c0_i32_0 = arith.constant 0 : i32
    %c0_i32_1 = arith.constant 0 : i32
    return %arg0, %2, %c0_i32, %c0_i32_0 : i32, i32, i32, i32
  }
  func.func @transform_3(%arg0: i32, %arg1: i32) -> (i32, i32, i32) {
    %c0_i32 = arith.constant 0 : i32
    %c0_i32_0 = arith.constant 0 : i32
    %c0_i32_1 = arith.constant 0 : i32
    %c0_i32_2 = arith.constant 0 : i32
    return %c0_i32, %c0_i32_0, %c0_i32_1 : i32, i32, i32
  }
  func.func @transform_4(%arg0: i32, %arg1: i32) -> (i32, i32) {
    %c0_i32 = arith.constant 0 : i32
    %c0_i32_0 = arith.constant 0 : i32
    %c0_i32_1 = arith.constant 0 : i32
    return %c0_i32, %c0_i32_0 : i32, i32
  }
  func.func @transform_5(%arg0: i32, %arg1: i32) -> (i32, i32) {
    %c0_i32 = arith.constant 0 : i32
    %c0_i32_0 = arith.constant 0 : i32
    %c0_i32_1 = arith.constant 0 : i32
    return %c0_i32, %c0_i32_0 : i32, i32
  }
  func.func @transform_6(%arg0: i32, %arg1: i32) -> (i32, i32) {
    %c0_i32 = arith.constant 0 : i32
    %c0_i32_0 = arith.constant 0 : i32
    %c0_i32_1 = arith.constant 0 : i32
    return %c0_i32, %c0_i32_0 : i32, i32
  }
  func.func @transform_7(%arg0: i32, %arg1: i32) -> (i32, i32, i32, i32) {
    %c0_i32 = arith.constant 0 : i32
    %c0_i32_0 = arith.constant 0 : i32
    %c0_i32_1 = arith.constant 0 : i32
    return %arg0, %arg1, %c0_i32, %c0_i32_0 : i32, i32, i32, i32
  }
  func.func @transform_8(%arg0: i32, %arg1: i32) -> (i32, i32, i32, i32) {
    %c0_i32 = arith.constant 0 : i32
    %c0_i32_0 = arith.constant 0 : i32
    %c0_i32_1 = arith.constant 0 : i32
    return %arg0, %arg1, %c0_i32, %c0_i32_0 : i32, i32, i32, i32
  }
}

module attributes {stable_mosaic.version = 11 : i64} {
  func.func @_conv_bn_stats_kernel(%arg0: i32, %arg1: i32, %arg2: memref<1x1x16x8xf32, #tpu.memory_space<vmem>>, %arg3: memref<1x16x16x8xf32, #tpu.memory_space<vmem>>, %arg4: memref<1x1x16x8xf32, #tpu.memory_space<vmem>>, %arg5: memref<9x8x8xf32, #tpu.memory_space<vmem>>, %arg6: memref<1x8xf32, #tpu.memory_space<vmem>>, %arg7: memref<1x8xf32, #tpu.memory_space<vmem>>, %arg8: memref<1x8xf32, #tpu.memory_space<vmem>>, %arg9: memref<1x16x16x8xf32, #tpu.memory_space<vmem>>, %arg10: memref<1x1x2x8xf32, #tpu.memory_space<vmem>>) attributes {dimension_semantics = [#tpu.dimension_semantics<parallel>, #tpu.dimension_semantics<parallel>], iteration_bounds = array<i64: 2, 1>, scalar_prefetch = 0 : i64, scratch_operands = 0 : i64, tpu.core_type = #tpu.core_type<tc>, window_params = [{transform_indices = @transform_0, window_bounds = array<i64: 1, 1, 16, 8>}, {transform_indices = @transform_1, window_bounds = array<i64: 1, 16, 16, 8>}, {transform_indices = @transform_2, window_bounds = array<i64: 1, 1, 16, 8>}, {pipeline_mode = #tpu.pipeline_mode<synchronous>, transform_indices = @transform_3, window_bounds = array<i64: 9, 8, 8>}, {pipeline_mode = #tpu.pipeline_mode<synchronous>, transform_indices = @transform_4, window_bounds = array<i64: 1, 8>}, {pipeline_mode = #tpu.pipeline_mode<synchronous>, transform_indices = @transform_5, window_bounds = array<i64: 1, 8>}, {pipeline_mode = #tpu.pipeline_mode<synchronous>, transform_indices = @transform_6, window_bounds = array<i64: 1, 8>}, {transform_indices = @transform_7, window_bounds = array<i64: 1, 16, 16, 8>}, {transform_indices = @transform_8, window_bounds = array<i64: 1, 1, 2, 8>}]} {
    %c0 = arith.constant 0 : index
    %c0_0 = arith.constant 0 : index
    %c0_1 = arith.constant 0 : index
    %c0_2 = arith.constant 0 : index
    %0 = vector.load %arg2[%c0, %c0_0, %c0_1, %c0_2] : memref<1x1x16x8xf32, #tpu.memory_space<vmem>>, vector<1x1x16x8xf32>
    %1 = vector.shape_cast %0 : vector<1x1x16x8xf32> to vector<1x16x8xf32>
    %c0_3 = arith.constant 0 : index
    %c0_4 = arith.constant 0 : index
    %c0_5 = arith.constant 0 : index
    %c0_6 = arith.constant 0 : index
    %2 = vector.load %arg3[%c0_3, %c0_4, %c0_5, %c0_6] : memref<1x16x16x8xf32, #tpu.memory_space<vmem>>, vector<1x16x16x8xf32>
    %3 = vector.shape_cast %2 : vector<1x16x16x8xf32> to vector<16x16x8xf32>
    %c0_7 = arith.constant 0 : index
    %c0_8 = arith.constant 0 : index
    %c0_9 = arith.constant 0 : index
    %c0_10 = arith.constant 0 : index
    %4 = vector.load %arg4[%c0_7, %c0_8, %c0_9, %c0_10] : memref<1x1x16x8xf32, #tpu.memory_space<vmem>>, vector<1x1x16x8xf32>
    %5 = vector.shape_cast %4 : vector<1x1x16x8xf32> to vector<1x16x8xf32>
    %6 = tpu.concatenate %1, %3, %5 in 0 : vector<1x16x8xf32>, vector<16x16x8xf32>, vector<1x16x8xf32> -> vector<18x16x8xf32>
    %c0_11 = arith.constant 0 : index
    %c0_12 = arith.constant 0 : index
    %7 = vector.load %arg7[%c0_11, %c0_12] : memref<1x8xf32, #tpu.memory_space<vmem>>, vector<1x8xf32>
    %8 = vector.shape_cast %7 : vector<1x8xf32> to vector<1x1x8xf32>
    %c0_13 = arith.constant 0 : index
    %c0_14 = arith.constant 0 : index
    %9 = vector.load %arg8[%c0_13, %c0_14] : memref<1x8xf32, #tpu.memory_space<vmem>>, vector<1x8xf32>
    %10 = vector.shape_cast %9 : vector<1x8xf32> to vector<1x1x8xf32>
    %11 = vector.broadcast %8 : vector<1x1x8xf32> to vector<18x16x8xf32>
    %12 = arith.mulf %6, %11 : vector<18x16x8xf32>
    %13 = vector.broadcast %10 : vector<1x1x8xf32> to vector<18x16x8xf32>
    %14 = arith.addf %12, %13 : vector<18x16x8xf32>
    %cst = arith.constant 0.000000e+00 : f32
    %15 = vector.broadcast %cst : f32 to vector<18x16x8xf32>
    %16 = arith.maximumf %14, %15 : vector<18x16x8xf32>
    %17 = tpu.iota {dimensions = array<i32: 0>} : vector<18x1x1xi32>
    %c0_i32 = arith.constant 0 : i32
    %18 = vector.broadcast %c0_i32 : i32 to vector<18x1x1xi32>
    %19 = arith.cmpi eq, %17, %18 : vector<18x1x1xi32>
    %c0_i32_15 = arith.constant 0 : i32
    %20 = arith.cmpi eq, %arg1, %c0_i32_15 : i32
    %21 = vector.broadcast %20 : i1 to vector<18x1x1xi1>
    %22 = arith.andi %19, %21 : vector<18x1x1xi1>
    %c17_i32 = arith.constant 17 : i32
    %23 = vector.broadcast %c17_i32 : i32 to vector<18x1x1xi32>
    %24 = arith.cmpi eq, %17, %23 : vector<18x1x1xi32>
    %c0_i32_16 = arith.constant 0 : i32
    %25 = arith.cmpi eq, %arg1, %c0_i32_16 : i32
    %26 = vector.broadcast %25 : i1 to vector<18x1x1xi1>
    %27 = arith.andi %24, %26 : vector<18x1x1xi1>
    %28 = arith.ori %22, %27 : vector<18x1x1xi1>
    %cst_17 = arith.constant 0.000000e+00 : f32
    %29 = vector.shape_cast %28 : vector<18x1x1xi1> to vector<18x1x1xi1>
    %30 = vector.broadcast %29 : vector<18x1x1xi1> to vector<18x16x8xi1>
    %31 = vector.broadcast %cst_17 : f32 to vector<18x16x8xf32>
    %32 = arith.select %30, %31, %16 : vector<18x16x8xi1>, vector<18x16x8xf32>
    %33 = vector.shape_cast %32 : vector<18x16x8xf32> to vector<288x8xf32>
    %cst_18 = arith.constant 0.000000e+00 : f32
    %34 = vector.broadcast %cst_18 : f32 to vector<1x8xf32>
    %35 = tpu.iota {dimensions = array<i32: 0>} : vector<288x1xi32>
    %c16_i32 = arith.constant 16 : i32
    %c0_i32_19 = arith.constant 0 : i32
    %36 = arith.cmpi eq, %c16_i32, %c0_i32_19 : i32
    %c1_i32 = arith.constant 1 : i32
    %37 = arith.select %36, %c1_i32, %c16_i32 : i32
    %38 = vector.broadcast %37 : i32 to vector<288x1xi32>
    %39 = arith.remsi %35, %38 : vector<288x1xi32>
    %c0_i32_20 = arith.constant 0 : i32
    %40 = vector.broadcast %c0_i32_20 : i32 to vector<288x1xi32>
    %41 = arith.cmpi ne, %39, %40 : vector<288x1xi32>
    %c0_i32_21 = arith.constant 0 : i32
    %42 = vector.broadcast %c0_i32_21 : i32 to vector<288x1xi32>
    %43 = arith.cmpi slt, %39, %42 : vector<288x1xi32>
    %c0_i32_22 = arith.constant 0 : i32
    %44 = arith.cmpi slt, %37, %c0_i32_22 : i32
    %45 = vector.broadcast %44 : i1 to vector<288x1xi1>
    %46 = vector.broadcast %45 : vector<288x1xi1> to vector<288x1xi1>
    %47 = arith.xori %43, %46 : vector<288x1xi1>
    %48 = arith.andi %47, %41 : vector<288x1xi1>
    %49 = vector.broadcast %37 : i32 to vector<288x1xi32>
    %50 = arith.addi %39, %49 : vector<288x1xi32>
    %51 = arith.select %48, %50, %39 : vector<288x1xi1>, vector<288x1xi32>
    %52 = vector.extract_strided_slice %33 {offsets = [0, 0], sizes = [287, 8], strides = [1, 1]} : vector<288x8xf32> to vector<287x8xf32>
    %53 = tpu.concatenate %34, %52 in 0 : vector<1x8xf32>, vector<287x8xf32> -> vector<288x8xf32>
    %c0_i32_23 = arith.constant 0 : i32
    %54 = vector.broadcast %c0_i32_23 : i32 to vector<288x1xi32>
    %55 = arith.cmpi eq, %51, %54 : vector<288x1xi32>
    %cst_24 = arith.constant 0.000000e+00 : f32
    %56 = vector.shape_cast %55 : vector<288x1xi1> to vector<288x1xi1>
    %57 = vector.broadcast %56 : vector<288x1xi1> to vector<288x8xi1>
    %58 = vector.broadcast %cst_24 : f32 to vector<288x8xf32>
    %59 = arith.select %57, %58, %53 : vector<288x8xi1>, vector<288x8xf32>
    %60 = vector.extract_strided_slice %33 {offsets = [1, 0], sizes = [287, 8], strides = [1, 1]} : vector<288x8xf32> to vector<287x8xf32>
    %61 = tpu.concatenate %60, %34 in 0 : vector<287x8xf32>, vector<1x8xf32> -> vector<288x8xf32>
    %c15_i32 = arith.constant 15 : i32
    %62 = vector.broadcast %c15_i32 : i32 to vector<288x1xi32>
    %63 = arith.cmpi eq, %51, %62 : vector<288x1xi32>
    %cst_25 = arith.constant 0.000000e+00 : f32
    %64 = vector.shape_cast %63 : vector<288x1xi1> to vector<288x1xi1>
    %65 = vector.broadcast %64 : vector<288x1xi1> to vector<288x8xi1>
    %66 = vector.broadcast %cst_25 : f32 to vector<288x8xf32>
    %67 = arith.select %65, %66, %61 : vector<288x8xi1>, vector<288x8xf32>
    %cst_26 = arith.constant 0.000000e+00 : f32
    %68 = vector.broadcast %cst_26 : f32 to vector<256x8xf32>
    %69 = vector.extract_strided_slice %59 {offsets = [0, 0], sizes = [256, 8], strides = [1, 1]} : vector<288x8xf32> to vector<256x8xf32>
    %c0_27 = arith.constant 0 : index
    %c0_28 = arith.constant 0 : index
    %c0_29 = arith.constant 0 : index
    %70 = vector.load %arg5[%c0_27, %c0_28, %c0_29] : memref<9x8x8xf32, #tpu.memory_space<vmem>>, vector<1x8x8xf32>
    %71 = vector.shape_cast %70 : vector<1x8x8xf32> to vector<8x8xf32>
    %cst_30 = arith.constant dense<0.000000e+00> : vector<256x8xf32>
    %72 = tpu.matmul %69, %71, %cst_30 {dimension_numbers = #tpu.dot_dimension_numbers<[1], [0], [0], [1], [0, 0, 1, 1], [], []>} : vector<256x8xf32>, vector<8x8xf32>, vector<256x8xf32> -> vector<256x8xf32>
    %73 = arith.addf %68, %72 : vector<256x8xf32>
    %74 = vector.extract_strided_slice %33 {offsets = [0, 0], sizes = [256, 8], strides = [1, 1]} : vector<288x8xf32> to vector<256x8xf32>
    %c1 = arith.constant 1 : index
    %c0_31 = arith.constant 0 : index
    %c0_32 = arith.constant 0 : index
    %75 = vector.load %arg5[%c1, %c0_31, %c0_32] : memref<9x8x8xf32, #tpu.memory_space<vmem>>, vector<1x8x8xf32>
    %76 = vector.shape_cast %75 : vector<1x8x8xf32> to vector<8x8xf32>
    %cst_33 = arith.constant dense<0.000000e+00> : vector<256x8xf32>
    %77 = tpu.matmul %74, %76, %cst_33 {dimension_numbers = #tpu.dot_dimension_numbers<[1], [0], [0], [1], [0, 0, 1, 1], [], []>} : vector<256x8xf32>, vector<8x8xf32>, vector<256x8xf32> -> vector<256x8xf32>
    %78 = arith.addf %73, %77 : vector<256x8xf32>
    %79 = vector.extract_strided_slice %67 {offsets = [0, 0], sizes = [256, 8], strides = [1, 1]} : vector<288x8xf32> to vector<256x8xf32>
    %c2 = arith.constant 2 : index
    %c0_34 = arith.constant 0 : index
    %c0_35 = arith.constant 0 : index
    %80 = vector.load %arg5[%c2, %c0_34, %c0_35] : memref<9x8x8xf32, #tpu.memory_space<vmem>>, vector<1x8x8xf32>
    %81 = vector.shape_cast %80 : vector<1x8x8xf32> to vector<8x8xf32>
    %cst_36 = arith.constant dense<0.000000e+00> : vector<256x8xf32>
    %82 = tpu.matmul %79, %81, %cst_36 {dimension_numbers = #tpu.dot_dimension_numbers<[1], [0], [0], [1], [0, 0, 1, 1], [], []>} : vector<256x8xf32>, vector<8x8xf32>, vector<256x8xf32> -> vector<256x8xf32>
    %83 = arith.addf %78, %82 : vector<256x8xf32>
    %84 = vector.extract_strided_slice %59 {offsets = [16, 0], sizes = [256, 8], strides = [1, 1]} : vector<288x8xf32> to vector<256x8xf32>
    %c3 = arith.constant 3 : index
    %c0_37 = arith.constant 0 : index
    %c0_38 = arith.constant 0 : index
    %85 = vector.load %arg5[%c3, %c0_37, %c0_38] : memref<9x8x8xf32, #tpu.memory_space<vmem>>, vector<1x8x8xf32>
    %86 = vector.shape_cast %85 : vector<1x8x8xf32> to vector<8x8xf32>
    %cst_39 = arith.constant dense<0.000000e+00> : vector<256x8xf32>
    %87 = tpu.matmul %84, %86, %cst_39 {dimension_numbers = #tpu.dot_dimension_numbers<[1], [0], [0], [1], [0, 0, 1, 1], [], []>} : vector<256x8xf32>, vector<8x8xf32>, vector<256x8xf32> -> vector<256x8xf32>
    %88 = arith.addf %83, %87 : vector<256x8xf32>
    %89 = vector.extract_strided_slice %33 {offsets = [16, 0], sizes = [256, 8], strides = [1, 1]} : vector<288x8xf32> to vector<256x8xf32>
    %c4 = arith.constant 4 : index
    %c0_40 = arith.constant 0 : index
    %c0_41 = arith.constant 0 : index
    %90 = vector.load %arg5[%c4, %c0_40, %c0_41] : memref<9x8x8xf32, #tpu.memory_space<vmem>>, vector<1x8x8xf32>
    %91 = vector.shape_cast %90 : vector<1x8x8xf32> to vector<8x8xf32>
    %cst_42 = arith.constant dense<0.000000e+00> : vector<256x8xf32>
    %92 = tpu.matmul %89, %91, %cst_42 {dimension_numbers = #tpu.dot_dimension_numbers<[1], [0], [0], [1], [0, 0, 1, 1], [], []>} : vector<256x8xf32>, vector<8x8xf32>, vector<256x8xf32> -> vector<256x8xf32>
    %93 = arith.addf %88, %92 : vector<256x8xf32>
    %94 = vector.extract_strided_slice %67 {offsets = [16, 0], sizes = [256, 8], strides = [1, 1]} : vector<288x8xf32> to vector<256x8xf32>
    %c5 = arith.constant 5 : index
    %c0_43 = arith.constant 0 : index
    %c0_44 = arith.constant 0 : index
    %95 = vector.load %arg5[%c5, %c0_43, %c0_44] : memref<9x8x8xf32, #tpu.memory_space<vmem>>, vector<1x8x8xf32>
    %96 = vector.shape_cast %95 : vector<1x8x8xf32> to vector<8x8xf32>
    %cst_45 = arith.constant dense<0.000000e+00> : vector<256x8xf32>
    %97 = tpu.matmul %94, %96, %cst_45 {dimension_numbers = #tpu.dot_dimension_numbers<[1], [0], [0], [1], [0, 0, 1, 1], [], []>} : vector<256x8xf32>, vector<8x8xf32>, vector<256x8xf32> -> vector<256x8xf32>
    %98 = arith.addf %93, %97 : vector<256x8xf32>
    %99 = vector.extract_strided_slice %59 {offsets = [32, 0], sizes = [256, 8], strides = [1, 1]} : vector<288x8xf32> to vector<256x8xf32>
    %c6 = arith.constant 6 : index
    %c0_46 = arith.constant 0 : index
    %c0_47 = arith.constant 0 : index
    %100 = vector.load %arg5[%c6, %c0_46, %c0_47] : memref<9x8x8xf32, #tpu.memory_space<vmem>>, vector<1x8x8xf32>
    %101 = vector.shape_cast %100 : vector<1x8x8xf32> to vector<8x8xf32>
    %cst_48 = arith.constant dense<0.000000e+00> : vector<256x8xf32>
    %102 = tpu.matmul %99, %101, %cst_48 {dimension_numbers = #tpu.dot_dimension_numbers<[1], [0], [0], [1], [0, 0, 1, 1], [], []>} : vector<256x8xf32>, vector<8x8xf32>, vector<256x8xf32> -> vector<256x8xf32>
    %103 = arith.addf %98, %102 : vector<256x8xf32>
    %104 = vector.extract_strided_slice %33 {offsets = [32, 0], sizes = [256, 8], strides = [1, 1]} : vector<288x8xf32> to vector<256x8xf32>
    %c7 = arith.constant 7 : index
    %c0_49 = arith.constant 0 : index
    %c0_50 = arith.constant 0 : index
    %105 = vector.load %arg5[%c7, %c0_49, %c0_50] : memref<9x8x8xf32, #tpu.memory_space<vmem>>, vector<1x8x8xf32>
    %106 = vector.shape_cast %105 : vector<1x8x8xf32> to vector<8x8xf32>
    %cst_51 = arith.constant dense<0.000000e+00> : vector<256x8xf32>
    %107 = tpu.matmul %104, %106, %cst_51 {dimension_numbers = #tpu.dot_dimension_numbers<[1], [0], [0], [1], [0, 0, 1, 1], [], []>} : vector<256x8xf32>, vector<8x8xf32>, vector<256x8xf32> -> vector<256x8xf32>
    %108 = arith.addf %103, %107 : vector<256x8xf32>
    %109 = vector.extract_strided_slice %67 {offsets = [32, 0], sizes = [256, 8], strides = [1, 1]} : vector<288x8xf32> to vector<256x8xf32>
    %c8 = arith.constant 8 : index
    %c0_52 = arith.constant 0 : index
    %c0_53 = arith.constant 0 : index
    %110 = vector.load %arg5[%c8, %c0_52, %c0_53] : memref<9x8x8xf32, #tpu.memory_space<vmem>>, vector<1x8x8xf32>
    %111 = vector.shape_cast %110 : vector<1x8x8xf32> to vector<8x8xf32>
    %cst_54 = arith.constant dense<0.000000e+00> : vector<256x8xf32>
    %112 = tpu.matmul %109, %111, %cst_54 {dimension_numbers = #tpu.dot_dimension_numbers<[1], [0], [0], [1], [0, 0, 1, 1], [], []>} : vector<256x8xf32>, vector<8x8xf32>, vector<256x8xf32> -> vector<256x8xf32>
    %113 = arith.addf %108, %112 : vector<256x8xf32>
    %c0_55 = arith.constant 0 : index
    %c0_56 = arith.constant 0 : index
    %114 = vector.load %arg6[%c0_55, %c0_56] : memref<1x8xf32, #tpu.memory_space<vmem>>, vector<1x8xf32>
    %115 = vector.broadcast %114 : vector<1x8xf32> to vector<256x8xf32>
    %116 = arith.addf %113, %115 : vector<256x8xf32>
    %117 = vector.shape_cast %116 : vector<256x8xf32> to vector<1x16x16x8xf32>
    %c0_57 = arith.constant 0 : index
    %c0_58 = arith.constant 0 : index
    %c0_59 = arith.constant 0 : index
    %c0_60 = arith.constant 0 : index
    %118 = vector.load %arg9[%c0_57, %c0_58, %c0_59, %c0_60] : memref<1x16x16x8xf32, #tpu.memory_space<vmem>>, vector<1x16x16x8xf32>
    tpu.vector_store %arg9[%c0_57, %c0_58, %c0_59, %c0_60], %117 {strides = array<i32>} : memref<1x16x16x8xf32, #tpu.memory_space<vmem>>, vector<1x16x16x8xf32>,
    %cst_61 = arith.constant dense<0.000000e+00> : vector<8xf32>
    %119 = vector.multi_reduction <add>, %116, %cst_61 [0] : vector<256x8xf32> to vector<8xf32>
    %120 = vector.shape_cast %119 : vector<8xf32> to vector<1x8xf32>
    %121 = arith.mulf %116, %116 : vector<256x8xf32>
    %cst_62 = arith.constant dense<0.000000e+00> : vector<8xf32>
    %122 = vector.multi_reduction <add>, %121, %cst_62 [0] : vector<256x8xf32> to vector<8xf32>
    %123 = vector.shape_cast %122 : vector<8xf32> to vector<1x8xf32>
    %124 = tpu.concatenate %120, %123 in 0 : vector<1x8xf32>, vector<1x8xf32> -> vector<2x8xf32>
    %125 = vector.shape_cast %124 : vector<2x8xf32> to vector<1x1x2x8xf32>
    %c0_63 = arith.constant 0 : index
    %c0_64 = arith.constant 0 : index
    %c0_65 = arith.constant 0 : index
    %c0_66 = arith.constant 0 : index
    %126 = vector.load %arg10[%c0_63, %c0_64, %c0_65, %c0_66] : memref<1x1x2x8xf32, #tpu.memory_space<vmem>>, vector<1x1x2x8xf32>
    tpu.vector_store %arg10[%c0_63, %c0_64, %c0_65, %c0_66], %125 {strides = array<i32>} : memref<1x1x2x8xf32, #tpu.memory_space<vmem>>, vector<1x1x2x8xf32>,
    return
  }
  func.func @transform_0(%arg0: i32, %arg1: i32) -> (i32, i32, i32, i32) {
    %c16_i32 = arith.constant 16 : i32
    %0 = arith.muli %arg1, %c16_i32 : i32
    %c1_i32 = arith.constant 1 : i32
    %1 = arith.subi %0, %c1_i32 : i32
    %c0_i32 = arith.constant 0 : i32
    %2 = arith.maxsi %1, %c0_i32 : i32
    %c0_i32_0 = arith.constant 0 : i32
    %c0_i32_1 = arith.constant 0 : i32
    %c0_i32_2 = arith.constant 0 : i32
    return %arg0, %2, %c0_i32_0, %c0_i32_1 : i32, i32, i32, i32
  }
  func.func @transform_1(%arg0: i32, %arg1: i32) -> (i32, i32, i32, i32) {
    %c0_i32 = arith.constant 0 : i32
    %c0_i32_0 = arith.constant 0 : i32
    %c0_i32_1 = arith.constant 0 : i32
    return %arg0, %arg1, %c0_i32, %c0_i32_0 : i32, i32, i32, i32
  }
  func.func @transform_2(%arg0: i32, %arg1: i32) -> (i32, i32, i32, i32) {
    %c1_i32 = arith.constant 1 : i32
    %0 = arith.addi %arg1, %c1_i32 : i32
    %c16_i32 = arith.constant 16 : i32
    %1 = arith.muli %0, %c16_i32 : i32
    %c15_i32 = arith.constant 15 : i32
    %2 = arith.minsi %1, %c15_i32 : i32
    %c0_i32 = arith.constant 0 : i32
    %c0_i32_0 = arith.constant 0 : i32
    %c0_i32_1 = arith.constant 0 : i32
    return %arg0, %2, %c0_i32, %c0_i32_0 : i32, i32, i32, i32
  }
  func.func @transform_3(%arg0: i32, %arg1: i32) -> (i32, i32, i32) {
    %c0_i32 = arith.constant 0 : i32
    %c0_i32_0 = arith.constant 0 : i32
    %c0_i32_1 = arith.constant 0 : i32
    %c0_i32_2 = arith.constant 0 : i32
    return %c0_i32, %c0_i32_0, %c0_i32_1 : i32, i32, i32
  }
  func.func @transform_4(%arg0: i32, %arg1: i32) -> (i32, i32) {
    %c0_i32 = arith.constant 0 : i32
    %c0_i32_0 = arith.constant 0 : i32
    %c0_i32_1 = arith.constant 0 : i32
    return %c0_i32, %c0_i32_0 : i32, i32
  }
  func.func @transform_5(%arg0: i32, %arg1: i32) -> (i32, i32) {
    %c0_i32 = arith.constant 0 : i32
    %c0_i32_0 = arith.constant 0 : i32
    %c0_i32_1 = arith.constant 0 : i32
    return %c0_i32, %c0_i32_0 : i32, i32
  }
  func.func @transform_6(%arg0: i32, %arg1: i32) -> (i32, i32) {
    %c0_i32 = arith.constant 0 : i32
    %c0_i32_0 = arith.constant 0 : i32
    %c0_i32_1 = arith.constant 0 : i32
    return %c0_i32, %c0_i32_0 : i32, i32
  }
  func.func @transform_7(%arg0: i32, %arg1: i32) -> (i32, i32, i32, i32) {
    %c0_i32 = arith.constant 0 : i32
    %c0_i32_0 = arith.constant 0 : i32
    %c0_i32_1 = arith.constant 0 : i32
    return %arg0, %arg1, %c0_i32, %c0_i32_0 : i32, i32, i32, i32
  }
  func.func @transform_8(%arg0: i32, %arg1: i32) -> (i32, i32, i32, i32) {
    %c0_i32 = arith.constant 0 : i32
    %c0_i32_0 = arith.constant 0 : i32
    %c0_i32_1 = arith.constant 0 : i32
    return %arg0, %arg1, %c0_i32, %c0_i32_0 : i32, i32, i32, i32
  }
}

</mosaic_0001>

<bundles_post_ra>
// kernel: double_conv_forward.5
= control target key start
LH: loop header
LB: loop body
LE: loop exit
PB: predicated region body
PF: predicated region fallthrough
CT: control target
= control target key end

     0   :  { %s569_s12 = smov 0   ;;  %s571_s13 = smov 0   ;;  %s776_s0 = inlined_call_operand.vmem [shape: f32[2,16,16,8], index: 0, kind: input, shape index: {}]   ;;  %s777_s1 = inlined_call_operand.vmem [shape: f32[1,8], index: 1, kind: input, shape index: {}]   ;;  %s778_s2 = inlined_call_operand.vmem [shape: f32[1,8], index: 2, kind: input, shape index: {}]   ;;  %s779_s3 = inlined_call_operand.vmem [shape: f32[2,16,16,8], index: 3, kind: output, shape index: {}]  }
   0x1   :  { %s573_s14 = smov 0  }
   0x2 LB: > { %s25_s15 = sadd.s32 1, %s543_s13  ;;  %p490_p0 = scmp.ge.s32.totalorder %s547_s14, 1  ;;  %s547_s14 = sphi %s573_s14, %s13_s14   ;;  %s543_s13 = sphi %s571_s13, %s781_s13   ;;  %s539_s12 = sphi %s569_s12, %s780_s12  }
   0x3   : > { %p27_p1 = scmp.ge.s32.totalorder %s25_s15, 2  ;;  %p159_p2 = scmp.lt.s32.totalorder %s547_s14, 3 }
   0x5   : > { %s783_s15 = smov (%p27_p1, %s25_s15), 0  ;;  %p160_p3 = pnand %p490_p0, %p159_p2 }
   0x6   : > { %p194_p4 = scmp.lt.s32.totalorder (!%p160_p3), %s539_s12, 1  ;;  %v590_v0 = vld [vmem:[%s777_s1] ss:$0 sm:$0xff] (!%p160_p3)  ;;  %vm357_vm0 = vcmask (!%p160_p3), 64512  }
   0x7   : > { %163 = sbr.rel (%p160_p3) target bundleno = 47 (0x2f), region = 32  ;;  %v600_v1 = vld [vmem:[%s778_s2] ss:$0 sm:$0xff] (!%p160_p3) }
   0xe   : > { %s785_s12 = smov (!%p194_p4, %s539_s12), 1 }
   0xf   : > { %s499_s16 = sshll.u32 %s785_s12, 8 }
  0x10   : > { %s595_s21 = scalar_lea.vmem %s776_s0, %s499_s16  ;;  %s623_s26 = scalar_lea.vmem %s779_s3, %s499_s16 }
  0x11   : > { %v217_v2 = vld [vmem:[%s595_s21] sm:$0xff]  ;;  %v218_v3 = vld [vmem:[%s595_s21 + $0x8] sm:$0xff]  ;;  %v219_v4 = vld [vmem:[%s595_s21 + $0x10] sm:$0xff] }
  0x12   : > { %v255_v5 = vmul.f32 %v590_v0, %v217_v2  ;;  %v256_v6 = vmul.f32 %v590_v0, %v218_v3  ;;  %v257_v7 = vmul.f32 %v590_v0, %v219_v4  ;;  %v220_v8 = vld [vmem:[%s595_s21 + $0x18] sm:$0xff]  ;;  %v221_v9 = vld [vmem:[%s595_s21 + $0x20] sm:$0xff]  ;;  %v222_v10 = vld [vmem:[%s595_s21 + $0x28] sm:$0xff] }
  0x13   : > { %v258_v11 = vmul.f32 %v590_v0, %v220_v8  ;;  %v259_v12 = vmul.f32 %v590_v0, %v221_v9  ;;  %v260_v13 = vmul.f32 %v590_v0, %v222_v10  ;;  %v223_v14 = vld [vmem:[%s595_s21 + $0x30] sm:$0xff]  ;;  %v224_v15 = vld [vmem:[%s595_s21 + $0x38] sm:$0xff]  ;;  %v225_v24 = vld [vmem:[%s595_s21 + $0x40] sm:$0xff] }
  0x14   : > { %v293_v16 = vadd.f32 %v600_v1, %v255_v5  ;;  %v294_v17 = vadd.f32 %v600_v1, %v256_v6  ;;  %v295_v18 = vadd.f32 %v600_v1, %v257_v7  ;;  %v261_v19 = vmul.f32 %v590_v0, %v223_v14  ;;  %v226_v25 = vld [vmem:[%s595_s21 + $0x48] sm:$0xff]  ;;  %v227_v26 = vld [vmem:[%s595_s21 + $0x50] sm:$0xff]  ;;  %v228_v31 = vld [vmem:[%s595_s21 + $0x58] sm:$0xff] }
  0x15   : > { %v296_v20 = vadd.f32 %v600_v1, %v258_v11  ;;  %v297_v21 = vadd.f32 %v600_v1, %v259_v12  ;;  %v298_v22 = vadd.f32 %v600_v1, %v260_v13  ;;  %v262_v23 = vmul.f32 %v590_v0, %v224_v15  ;;  %v229_v32 = vld [vmem:[%s595_s21 + $0x60] sm:$0xff]  ;;  %v230_v33 = vld [vmem:[%s595_s21 + $0x68] sm:$0xff]  ;;  %v231_v38 = vld [vmem:[%s595_s21 + $0x70] sm:$0xff] }
  0x16   : > { %v325_v27 = vmax.f32 %v293_v16, 0.0  ;;  %v326_v28 = vmax.f32 %v294_v17, 0.0  ;;  %v327_v29 = vmax.f32 %v295_v18, 0.0  ;;  %v299_v30 = vadd.f32 %v600_v1, %v261_v19  ;;  %v232_v43 = vld [vmem:[%s595_s21 + $0x78] sm:$0xff]  ;;  %v233_v56 = vld [vmem:[%s595_s21 + $0x80] sm:$0xff]  ;;  %v234_v57 = vld [vmem:[%s595_s21 + $0x88] sm:$0xff] }
  0x17   : > { %v328_v34 = vmax.f32 %v296_v20, 0.0  ;;  %v329_v35 = vmax.f32 %v297_v21, 0.0  ;;  %v330_v36 = vmax.f32 %v298_v22, 0.0  ;;  %v300_v37 = vadd.f32 %v600_v1, %v262_v23  ;;  %v235_v58 = vld [vmem:[%s595_s21 + $0x90] sm:$0xff]  ;;  %v236_v63 = vld [vmem:[%s595_s21 + $0x98] sm:$0xff]  ;;  %v237_v2 = vld [vmem:[%s595_s21 + $0xa0] sm:$0xff] }
  0x18   : > { %358 = vst.msk [vmem:[%s623_s26] sm:$0xff] %vm357_vm0, %v325_v27  ;;  %359 = vst.msk [vmem:[%s623_s26 + $0x8] sm:$0xff] %vm357_vm0, %v326_v28  ;;  %v331_v39 = vmax.f32 %v299_v30, 0.0  ;;  %v263_v40 = vmul.f32 %v590_v0, %v225_v24  ;;  %v264_v41 = vmul.f32 %v590_v0, %v226_v25  ;;  %v265_v42 = vmul.f32 %v590_v0, %v227_v26  ;;  %v238_v3 = vld [vmem:[%s595_s21 + $0xa8] sm:$0xff]  ;;  %v239_v8 = vld [vmem:[%s595_s21 + $0xb0] sm:$0xff] }
  0x19   : > { %360 = vst.msk [vmem:[%s623_s26 + $0x10] sm:$0xff] %vm357_vm0, %v327_v29  ;;  %361 = vst.msk [vmem:[%s623_s26 + $0x18] sm:$0xff] %vm357_vm0, %v328_v34  ;;  %v332_v44 = vmax.f32 %v300_v37, 0.0  ;;  %v266_v45 = vmul.f32 %v590_v0, %v228_v31  ;;  %v267_v46 = vmul.f32 %v590_v0, %v229_v32  ;;  %v268_v47 = vmul.f32 %v590_v0, %v230_v33  ;;  %v240_v13 = vld [vmem:[%s595_s21 + $0xb8] sm:$0xff]  ;;  %v241_v26 = vld [vmem:[%s595_s21 + $0xc0] sm:$0xff] }
  0x1a   : > { %362 = vst.msk [vmem:[%s623_s26 + $0x20] sm:$0xff] %vm357_vm0, %v329_v35  ;;  %363 = vst.msk [vmem:[%s623_s26 + $0x28] sm:$0xff] %vm357_vm0, %v330_v36  ;;  %v301_v48 = vadd.f32 %v600_v1, %v263_v40  ;;  %v302_v49 = vadd.f32 %v600_v1, %v264_v41  ;;  %v303_v50 = vadd.f32 %v600_v1, %v265_v42  ;;  %v242_v27 = vld [vmem:[%s595_s21 + $0xc8] sm:$0xff]  ;;  %v243_v28 = vld [vmem:[%s595_s21 + $0xd0] sm:$0xff] }
  0x1b   : > { %364 = vst.msk [vmem:[%s623_s26 + $0x30] sm:$0xff] %vm357_vm0, %v331_v39  ;;  %v269_v51 = vmul.f32 %v590_v0, %v231_v38  ;;  %365 = vst.msk [vmem:[%s623_s26 + $0x38] sm:$0xff] %vm357_vm0, %v332_v44  ;;  %v304_v52 = vadd.f32 %v600_v1, %v266_v45  ;;  %v305_v53 = vadd.f32 %v600_v1, %v267_v46  ;;  %v244_v33 = vld [vmem:[%s595_s21 + $0xd8] sm:$0xff]  ;;  %v245_v34 = vld [vmem:[%s595_s21 + $0xe0] sm:$0xff] }
  0x1c   : > { %v306_v54 = vadd.f32 %v600_v1, %v268_v47  ;;  %v270_v55 = vmul.f32 %v590_v0, %v232_v43  ;;  %v333_v59 = vmax.f32 %v301_v48, 0.0  ;;  %v334_v60 = vmax.f32 %v302_v49, 0.0  ;;  %v246_v35 = vld [vmem:[%s595_s21 + $0xe8] sm:$0xff]  ;;  %v247_v40 = vld [vmem:[%s595_s21 + $0xf0] sm:$0xff]  ;;  %v248_v45 = vld [vmem:[%s595_s21 + $0xf8] sm:$0xff] }
  0x1d   : > { %v335_v61 = vmax.f32 %v303_v50, 0.0  ;;  %v307_v62 = vadd.f32 %v600_v1, %v269_v51  ;;  %v336_v4 = vmax.f32 %v304_v52, 0.0  ;;  %v337_v5 = vmax.f32 %v305_v53, 0.0 }
  0x1e   : > { %v338_v6 = vmax.f32 %v306_v54, 0.0  ;;  %v308_v7 = vadd.f32 %v600_v1, %v270_v55  ;;  %366 = vst.msk [vmem:[%s623_s26 + $0x40] sm:$0xff] %vm357_vm0, %v333_v59  ;;  %367 = vst.msk [vmem:[%s623_s26 + $0x48] sm:$0xff] %vm357_vm0, %v334_v60  ;;  %v271_v10 = vmul.f32 %v590_v0, %v233_v56  ;;  %v272_v11 = vmul.f32 %v590_v0, %v234_v57 }
  0x1f   : > { %368 = vst.msk [vmem:[%s623_s26 + $0x50] sm:$0xff] %vm357_vm0, %v335_v61  ;;  %v339_v9 = vmax.f32 %v307_v62, 0.0  ;;  %v273_v12 = vmul.f32 %v590_v0, %v235_v58  ;;  %369 = vst.msk [vmem:[%s623_s26 + $0x58] sm:$0xff] %vm357_vm0, %v336_v4  ;;  %v274_v15 = vmul.f32 %v590_v0, %v236_v63  ;;  %v275_v16 = vmul.f32 %v590_v0, %v237_v2 }
  0x20   : > { %370 = vst.msk [vmem:[%s623_s26 + $0x60] sm:$0xff] %vm357_vm0, %v337_v5  ;;  %371 = vst.msk [vmem:[%s623_s26 + $0x68] sm:$0xff] %vm357_vm0, %v338_v6  ;;  %v340_v14 = vmax.f32 %v308_v7, 0.0  ;;  %v276_v17 = vmul.f32 %v590_v0, %v238_v3  ;;  %v309_v18 = vadd.f32 %v600_v1, %v271_v10  ;;  %v310_v19 = vadd.f32 %v600_v1, %v272_v11 }
  0x21   : > { %372 = vst.msk [vmem:[%s623_s26 + $0x70] sm:$0xff] %vm357_vm0, %v339_v9  ;;  %v311_v20 = vadd.f32 %v600_v1, %v273_v12  ;;  %v277_v21 = vmul.f32 %v590_v0, %v239_v8  ;;  %v312_v22 = vadd.f32 %v600_v1, %v274_v15  ;;  %v313_v23 = vadd.f32 %v600_v1, %v275_v16 }
  0x22   : > { %373 = vst.msk [vmem:[%s623_s26 + $0x78] sm:$0xff] %vm357_vm0, %v340_v14  ;;  %v314_v24 = vadd.f32 %v600_v1, %v276_v17  ;;  %v278_v25 = vmul.f32 %v590_v0, %v240_v13  ;;  %v341_v29 = vmax.f32 %v309_v18, 0.0  ;;  %v342_v30 = vmax.f32 %v310_v19, 0.0 }
  0x23   : > { %v343_v31 = vmax.f32 %v311_v20, 0.0  ;;  %v315_v32 = vadd.f32 %v600_v1, %v277_v21  ;;  %v344_v36 = vmax.f32 %v312_v22, 0.0  ;;  %v345_v37 = vmax.f32 %v313_v23, 0.0 }
  0x24   : > { %v346_v38 = vmax.f32 %v314_v24, 0.0  ;;  %v316_v39 = vadd.f32 %v600_v1, %v278_v25  ;;  %374 = vst.msk [vmem:[%s623_s26 + $0x80] sm:$0xff] %vm357_vm0, %v341_v29  ;;  %375 = vst.msk [vmem:[%s623_s26 + $0x88] sm:$0xff] %vm357_vm0, %v342_v30  ;;  %v279_v42 = vmul.f32 %v590_v0, %v241_v26  ;;  %v280_v43 = vmul.f32 %v590_v0, %v242_v27 }
  0x25   : > { %376 = vst.msk [vmem:[%s623_s26 + $0x90] sm:$0xff] %vm357_vm0, %v343_v31  ;;  %v347_v41 = vmax.f32 %v315_v32, 0.0  ;;  %v281_v44 = vmul.f32 %v590_v0, %v243_v28  ;;  %377 = vst.msk [vmem:[%s623_s26 + $0x98] sm:$0xff] %vm357_vm0, %v344_v36  ;;  %v282_v47 = vmul.f32 %v590_v0, %v244_v33  ;;  %v283_v48 = vmul.f32 %v590_v0, %v245_v34 }
  0x26   : > { %378 = vst.msk [vmem:[%s623_s26 + $0xa0] sm:$0xff] %vm357_vm0, %v345_v37  ;;  %379 = vst.msk [vmem:[%s623_s26 + $0xa8] sm:$0xff] %vm357_vm0, %v346_v38  ;;  %v348_v46 = vmax.f32 %v316_v39, 0.0  ;;  %v284_v49 = vmul.f32 %v590_v0, %v246_v35  ;;  %v317_v50 = vadd.f32 %v600_v1, %v279_v42  ;;  %v318_v51 = vadd.f32 %v600_v1, %v280_v43 }
  0x27   : > { %380 = vst.msk [vmem:[%s623_s26 + $0xb0] sm:$0xff] %vm357_vm0, %v347_v41  ;;  %v319_v52 = vadd.f32 %v600_v1, %v281_v44  ;;  %v285_v53 = vmul.f32 %v590_v0, %v247_v40  ;;  %v320_v54 = vadd.f32 %v600_v1, %v282_v47  ;;  %v321_v55 = vadd.f32 %v600_v1, %v283_v48 }
  0x28   : > { %381 = vst.msk [vmem:[%s623_s26 + $0xb8] sm:$0xff] %vm357_vm0, %v348_v46  ;;  %v322_v56 = vadd.f32 %v600_v1, %v284_v49  ;;  %v286_v57 = vmul.f32 %v590_v0, %v248_v45  ;;  %v349_v58 = vmax.f32 %v317_v50, 0.0  ;;  %v350_v59 = vmax.f32 %v318_v51, 0.0 }
  0x29   : > { %v351_v60 = vmax.f32 %v319_v52, 0.0  ;;  %v323_v61 = vadd.f32 %v600_v1, %v285_v53  ;;  %v352_v62 = vmax.f32 %v320_v54, 0.0  ;;  %v353_v63 = vmax.f32 %v321_v55, 0.0 }
  0x2a   : > { %v354_v2 = vmax.f32 %v322_v56, 0.0  ;;  %v324_v3 = vadd.f32 %v600_v1, %v286_v57  ;;  %382 = vst.msk [vmem:[%s623_s26 + $0xc0] sm:$0xff] %vm357_vm0, %v349_v58  ;;  %383 = vst.msk [vmem:[%s623_s26 + $0xc8] sm:$0xff] %vm357_vm0, %v350_v59 }
  0x2b   : > { %384 = vst.msk [vmem:[%s623_s26 + $0xd0] sm:$0xff] %vm357_vm0, %v351_v60  ;;  %v355_v4 = vmax.f32 %v323_v61, 0.0  ;;  %385 = vst.msk [vmem:[%s623_s26 + $0xd8] sm:$0xff] %vm357_vm0, %v352_v62 }
  0x2c   : > { %386 = vst.msk [vmem:[%s623_s26 + $0xe0] sm:$0xff] %vm357_vm0, %v353_v63  ;;  %387 = vst.msk [vmem:[%s623_s26 + $0xe8] sm:$0xff] %vm357_vm0, %v354_v2  ;;  %v356_v0 = vmax.f32 %v324_v3, 0.0 }
  0x2d   : > { %388 = vst.msk [vmem:[%s623_s26 + $0xf0] sm:$0xff] %vm357_vm0, %v355_v4 }
  0x2e   : > { %389 = vst.msk [vmem:[%s623_s26 + $0xf8] sm:$0xff] %vm357_vm0, %v356_v0 }
  0x2f PF: > { %s13_s14 = sadd.s32 1, %s547_s14   ;;  %s780_s12 = smov %s543_s13 }
  0x30   : > { %p10_p5 = scmp.ge.s32.totalorder %s13_s14, 4   ;;  %s781_s13 = smov %s783_s15 }
  0x32   :  { %12 = sbr.rel (!%p10_p5) target bundleno = 2 (0x2), region = 62 }

// kernel: double_conv_forward.4
= control target key start
LH: loop header
LB: loop body
LE: loop exit
PB: predicated region body
PF: predicated region fallthrough
CT: control target
= control target key end

     0   :  { %s6099_s26 = smov 0   ;;  %s6101_s2 = smov 0   ;;  %s7551_s0 = inlined_call_operand.vmem [shape: f32[2,16,16,8], index: 0, kind: input, shape index: {}, may-alias: {0,1,2}]   ;;  %s7552_s1 = inlined_call_operand.vmem [shape: f32[2,16,16,8], index: 1, kind: input, shape index: {}, may-alias: {0,1,2}]   ;;  %s7553_s2 = inlined_call_operand.vmem [shape: f32[2,16,16,8], index: 2, kind: input, shape index: {}, may-alias: {0,1,2}]   ;;  %s7554_s3 = inlined_call_operand.vmem [shape: f32[9,8,8], index: 3, kind: input, shape index: {}]   ;;  %s7555_s4 = inlined_call_operand.vmem [shape: f32[1,8], index: 4, kind: input, shape index: {}]   ;;  %s7556_s5 = inlined_call_operand.vmem [shape: f32[1,8], index: 5, kind: input, shape index: {}]   ;;  %s7557_s6 = inlined_call_operand.vmem [shape: f32[1,8], index: 6, kind: input, shape index: {}]   ;;  %s7558_s7 = inlined_call_operand.vmem [shape: f32[2,16,16,8], index: 7, kind: output, shape index: {0}]   ;;  %s7559_s8 = inlined_call_operand.vmem [shape: f32[2,1,2,8], index: 8, kind: output, shape index: {1}]  }
   0x1   :  { %s6103_s27 = smov 0  }
   0x2 LB: > { %s31_s28 = sadd.s32 1, %s6047_s2  ;;  %p4686_p0 = scmp.ge.s32.totalorder %s6051_s27, 1  ;;  %s6051_s27 = sphi %s6103_s27, %s19_s27   ;;  %s6047_s2 = sphi %s6101_s2, %s7784_s2   ;;  %s6043_s26 = sphi %s6099_s26, %s7783_s26  }
   0x3   : > { %p33_p1 = scmp.ge.s32.totalorder %s31_s28, 2  ;;  %p353_p2 = scmp.lt.s32.totalorder %s6051_s27, 3 }
   0x5   : > { %s7786_s28 = smov (%p33_p1, %s31_s28), 0  ;;  %p354_p3 = pnand %p4686_p0, %p353_p2 }
   0x7   : > { %357 = sbr.rel (%p354_p3) target bundleno = 549 (0x225), region = 48 }
   0xe   : > { %v4698_v0 = vld [vmem:[%s7554_s3 + $0x8] sm:$0xff]  ;;  %v4827_v1 = vld [vmem:[%s7554_s3 + $0x20] sm:$0xff]  ;;  %p448_p4 = scmp.lt.s32.totalorder %s6043_s26, 1  ;;  %v7561_v2 = vmov 0.0   ;;  %v6136_v5 = vld [vmem:[%s7554_s3 + $0x10] sm:$0xff]  ;;  %vm1707_vm0 = vcmask 64512   ;;  %v693_v49 = vlaneseq }
   0xf   : > { %5295 = vmatprep.subr.mxu1 %v4698_v0  ;;  %5297 = vmatprep.mubr.f32.mxu1 %v7561_v2  ;;  %v1704_v3 = vld [vmem:[%s7554_s3] sm:$0xff]  ;;  %v4860_v4 = vld [vmem:[%s7554_s3 + $0x28] sm:$0xff]  ;;  %v6199_v35 = vld [vmem:[%s7554_s3 + $0x30] sm:$0xff]  ;;  %vm1451_vm1 = vcmask 1046528   ;;  %vm1198_vm6 = vcmask 1040384  }
  0x10   : > { %5296 = vmatpush3.msra.mxu1 %v4698_v0  ;;  %5495 = vmatprep.subr.mxu0 %v4827_v1  ;;  %s7788_s26 = smov (!%p448_p4, %s6043_s26), 1  ;;  %v6142_v6 = vld [vmem:[%s7556_s5] ss:$0 sm:$0xff]  ;;  %v6248_v58 = vshrl.u32 %v693_v49, 7 }
  0x11   : > { %5298 = vmatmul.mubr.f32.vlgmr.msra.gmra.mrb[0].mxu1 %v7561_v2  ;;  %5496 = vmatpush3.msra.mxu0 %v4827_v1  ;;  %s4994_s17 = sshll.u32 %s7788_s26, 8  ;;  %v6154_v7 = vld [vmem:[%s7557_s6] ss:$0 sm:$0xff] }
  0x12   : > { %5345 = vmatprep.subr.mxu1 %v1704_v3  ;;  %5545 = vmatprep.subr.mxu0 %v4860_v4  ;;  %s6149_s22 = scalar_lea.vmem %s7552_s1, %s4994_s17  ;;  %7645 = vst [vmem:[#allocation9_spill] sm:$0xff] %v6248_v58  ;;  %s7367_s20 = scalar_lea.vmem %s7558_s7, %s4994_s17 }
  0x13   : > { %5346 = vmatpush3.msra.mxu1 %v1704_v3  ;;  %v495_v8 = vld [vmem:[%s6149_s22] sm:$0xff]  ;;  %v496_v9 = vld [vmem:[%s6149_s22 + $0x8] sm:$0xff]  ;;  %v497_v10 = vld [vmem:[%s6149_s22 + $0x10] sm:$0xff]  ;;  %s4695_s17 = sshll.u32 %s7788_s26, 1 }
  0x14   : > { %5395 = vmatprep.subr.mxu1 %v6136_v5  ;;  %v539_v11 = vmul.f32 %v6142_v6, %v495_v8  ;;  %v540_v12 = vmul.f32 %v6142_v6, %v496_v9  ;;  %v541_v13 = vmul.f32 %v6142_v6, %v497_v10  ;;  %v498_v14 = vld [vmem:[%s6149_s22 + $0x18] sm:$0xff]  ;;  %v499_v15 = vld [vmem:[%s6149_s22 + $0x20] sm:$0xff]  ;;  %v500_v16 = vld [vmem:[%s6149_s22 + $0x28] sm:$0xff]  ;;  %s492_s23 = scalar_lea.vmem %s7559_s8, %s4695_s17 }
  0x15   : > { %v542_v17 = vmul.f32 %v6142_v6, %v498_v14  ;;  %v543_v18 = vmul.f32 %v6142_v6, %v499_v15  ;;  %v501_v19 = vld [vmem:[%s6149_s22 + $0x30] sm:$0xff]  ;;  %v544_v24 = vmul.f32 %v6142_v6, %v500_v16  ;;  %v502_v30 = vld [vmem:[%s6149_s22 + $0x38] sm:$0xff]  ;;  %v503_v31 = vld [vmem:[%s6149_s22 + $0x40] sm:$0xff]  ;;  %v699_v16 = vadd.s32 40, %v6248_v58 }
  0x16   : > { %v581_v20 = vadd.f32 %v6154_v7, %v539_v11  ;;  %v582_v21 = vadd.f32 %v6154_v7, %v540_v12  ;;  %v583_v22 = vadd.f32 %v6154_v7, %v541_v13  ;;  %v545_v25 = vmul.f32 %v6142_v6, %v501_v19  ;;  %v504_v39 = vld [vmem:[%s6149_s22 + $0x48] sm:$0xff]  ;;  %v505_v40 = vld [vmem:[%s6149_s22 + $0x50] sm:$0xff]  ;;  %v506_v47 = vld [vmem:[%s6149_s22 + $0x58] sm:$0xff] }
  0x17   : > { %v584_v23 = vadd.f32 %v6154_v7, %v542_v17  ;;  %v585_v29 = vadd.f32 %v6154_v7, %v543_v18  ;;  %v586_v33 = vadd.f32 %v6154_v7, %v544_v24  ;;  %v546_v34 = vmul.f32 %v6142_v6, %v502_v30  ;;  %v507_v48 = vld [vmem:[%s6149_s22 + $0x60] sm:$0xff]  ;;  %v508_v56 = vld [vmem:[%s6149_s22 + $0x68] sm:$0xff]  ;;  %v509_v57 = vld [vmem:[%s6149_s22 + $0x70] sm:$0xff] }
  0x18   : > { %v6175_v26 = vmax.f32 %v581_v20, 0.0  ;;  %v6177_v27 = vmax.f32 %v582_v21, 0.0  ;;  %v6179_v28 = vmax.f32 %v583_v22, 0.0  ;;  %v587_v37 = vadd.f32 %v6154_v7, %v545_v25  ;;  %v510_v1 = vld [vmem:[%s6149_s22 + $0x78] sm:$0xff]  ;;  %v511_v3 = vld [vmem:[%s6149_s22 + $0x80] sm:$0xff]  ;;  %v512_v11 = vld [vmem:[%s6149_s22 + $0x88] sm:$0xff] }
  0x19   : > { %v6192_v32 = vmax.f32 %v584_v23, 0.0  ;;  %v6203_v36 = vmax.f32 %v585_v29, 0.0  ;;  %v547_v38 = vmul.f32 %v6142_v6, %v503_v31  ;;  %v6216_v41 = vmax.f32 %v586_v33, 0.0  ;;  %v513_v12 = vld [vmem:[%s6149_s22 + $0x90] sm:$0xff]  ;;  %v514_v29 = vld [vmem:[%s6149_s22 + $0x98] sm:$0xff]  ;;  %v515_v33 = vld [vmem:[%s6149_s22 + $0xa0] sm:$0xff] }
  0x1a   : > { %7638 = vst [vmem:[#allocation2_spill] sm:$0xff] %v6179_v28  ;;  %5300 = vmatprep.mubr.msk.f32.mxu1 %vm1707_vm0, %v6175_v26  ;;  %5497 = vmatprep.mubr.msk.f32.mxu0 %vm1707_vm0, %v6175_v26  ;;  %v588_v42 = vadd.f32 %v6154_v7, %v546_v34  ;;  %v548_v43 = vmul.f32 %v6142_v6, %v504_v39  ;;  %v6224_v44 = vmax.f32 %v587_v37, 0.0  ;;  %v1457_v22 = vrot.slane %v6177_v27, 1  ;;  %v516_v49 = vld [vmem:[%s6149_s22 + $0xa8] sm:$0xff] }
  0x1b   : > { %5301 = vmatmul.mubr.msk.f32.gmra.mrb[2].mxu1 %vm1707_vm0, %v6177_v27  ;;  %5498 = vmatmul.mubr.msk.f32.vlgmr.msra.gmra.mrb[0].mxu0 %vm1707_vm0, %v6177_v27  ;;  %7639 = vst [vmem:[#allocation3_spill] sm:$0xff] %v6192_v32  ;;  %7640 = vst [vmem:[#allocation4_spill] sm:$0xff] %v6203_v36  ;;  %v589_v45 = vadd.f32 %v6154_v7, %v547_v38  ;;  %v549_v46 = vmul.f32 %v6142_v6, %v505_v40  ;;  %v1459_v23 = vrot.slane %v6179_v28, 1  ;;  %v521_v38 = vld [vmem:[%s6149_s22 + $0xd0] sm:$0xff] }
  0x1c   : > { %5546 = vmatpush3.msra.mxu0 %v4860_v4  ;;  %5303 = vmatprep.mubr.msk.f32.mxu1 %vm1707_vm0, %v6179_v28  ;;  %7641 = vst [vmem:[#allocation5_spill] sm:$0xff] %v6216_v41  ;;  %7642 = vst [vmem:[#allocation6_spill] sm:$0xff] %v6224_v44  ;;  %v6234_v50 = vmax.f32 %v588_v42, 0.0  ;;  %v590_v51 = vadd.f32 %v6154_v7, %v548_v43  ;;  %v550_v52 = vmul.f32 %v6142_v6, %v506_v47 }
  0x1d   : > { %5500 = vmatprep.mubr.msk.f32.mxu0 %vm1707_vm0, %v6179_v28  ;;  %5595 = vmatprep.subr.mxu0 %v6199_v35  ;;  %v6242_v53 = vmax.f32 %v589_v45, 0.0  ;;  %v591_v54 = vadd.f32 %v6154_v7, %v549_v46  ;;  %v551_v55 = vmul.f32 %v6142_v6, %v507_v48  ;;  %v552_v61 = vmul.f32 %v6142_v6, %v508_v56 }
  0x1e   : > { %7643 = vst [vmem:[#allocation7_spill] sm:$0xff] %v6234_v50  ;;  %v6254_v59 = vmax.f32 %v590_v51, 0.0  ;;  %v592_v60 = vadd.f32 %v6154_v7, %v550_v52  ;;  %v553_v0 = vmul.f32 %v6142_v6, %v509_v57  ;;  %v697_v4 = vadd.s32 24, %v6248_v58  ;;  %v517_v52 = vld [vmem:[%s6149_s22 + $0xb0] sm:$0xff] }
  0x1f   : > { %5304 = vmatmul.mubr.msk.f32.gmra.mrb[4].mxu1 %vm1707_vm0, %v6192_v32  ;;  %5501 = vmatmul.mubr.msk.f32.gmra.mrb[2].mxu0 %vm1707_vm0, %v6192_v32  ;;  %7644 = vst [vmem:[#allocation8_spill] sm:$0xff] %v6242_v53  ;;  %v6262_v62 = vmax.f32 %v591_v54, 0.0  ;;  %v593_v63 = vadd.f32 %v6154_v7, %v551_v55  ;;  %v594_v9 = vadd.f32 %v6154_v7, %v552_v61  ;;  %v7560_v30 = vrot.slane %v6175_v26, 1 }
  0x20   : > { %5306 = vmatprep.mubr.msk.f32.mxu1 %vm1707_vm0, %v6203_v36  ;;  %5503 = vmatprep.mubr.msk.f32.mxu0 %vm1707_vm0, %v6203_v36  ;;  %7646 = vst [vmem:[#allocation10_spill] sm:$0xff] %v6254_v59  ;;  %v6273_v8 = vmax.f32 %v592_v60, 0.0  ;;  %v554_v10 = vmul.f32 %v6142_v6, %v510_v1  ;;  %v595_v14 = vadd.f32 %v6154_v7, %v553_v0  ;;  %v755_v18 = vand.u32 15, %v697_v4 }
  0x21   : > { %7647 = vst [vmem:[#allocation11_spill] sm:$0xff] %v6262_v62  ;;  %v6283_v13 = vmax.f32 %v593_v63, 0.0  ;;  %v555_v15 = vmul.f32 %v6142_v6, %v511_v3  ;;  %v556_v17 = vmul.f32 %v6142_v6, %v512_v11  ;;  %v557_v19 = vmul.f32 %v6142_v6, %v513_v12  ;;  %v519_v11 = vld [vmem:[%s6149_s22 + $0xc0] sm:$0xff] }
  0x22   : > { %7648 = vst [vmem:[#allocation12_spill] sm:$0xff] %v6273_v8  ;;  %v6294_v20 = vmax.f32 %v594_v9, 0.0  ;;  %v596_v21 = vadd.f32 %v6154_v7, %v554_v10  ;;  %v6303_v24 = vmax.f32 %v595_v14, 0.0  ;;  %v769_v31 = vand.u32 15, %v699_v16  ;;  %v518_v10 = vld [vmem:[%s6149_s22 + $0xb8] sm:$0xff] }
  0x23   : > { %5307 = vmatmul.mubr.msk.f32.gmra.mrb[6].mxu1 %vm1707_vm0, %v6216_v41  ;;  %5504 = vmatmul.mubr.msk.f32.gmra.mrb[4].mxu0 %vm1707_vm0, %v6216_v41  ;;  %7649 = vst [vmem:[#allocation13_spill] sm:$0xff] %v6283_v13  ;;  %v597_v25 = vadd.f32 %v6154_v7, %v555_v15  ;;  %v701_v34 = vadd.s32 56, %v6248_v58  ;;  %v598_v37 = vadd.f32 %v6154_v7, %v556_v17  ;;  %vm6311_vm2 = vcmp.eq.s32.totalorder %v755_v18, 15  ;;  %v6378_v17 = vld [vmem:[%s7554_s3 + $0x38] sm:$0xff] }
  0x24   : > { %5309 = vmatprep.mubr.msk.f32.mxu1 %vm1707_vm0, %v6224_v44  ;;  %5506 = vmatprep.mubr.msk.f32.mxu0 %vm1707_vm0, %v6224_v44  ;;  %7650 = vst [vmem:[#allocation14_spill] sm:$0xff] %v6294_v20  ;;  %7651 = vst [vmem:[#allocation15_spill] sm:$0xff] %v6303_v24  ;;  %v599_v39 = vadd.f32 %v6154_v7, %v557_v19  ;;  %v1461_v40 = vrot.slane %v6192_v32, 1  ;;  %v6321_v42 = vmax.f32 %v596_v21, 0.0  ;;  %v1463_v46 = vrot.slane %v6203_v36, 1 }
  0x25   : > { %v1460_v43 = vsel %vm1451_vm1, %v1457_v22, %v1459_v23  ;;  %v558_v45 = vmul.f32 %v6142_v6, %v514_v29  ;;  %v6330_v47 = vmax.f32 %v597_v25, 0.0  ;;  %v559_v48 = vmul.f32 %v6142_v6, %v515_v33 }
  0x26   : > { %7654 = vst [vmem:[#allocation16_spill] sm:$0xff] %v6321_v42  ;;  %v6337_v51 = vsel %vm1451_vm1, %v7560_v30, %v1457_v22  ;;  %v703_v54 = vadd.s32 72, %v6248_v58  ;;  %v6341_v55 = vmax.f32 %v598_v37, 0.0  ;;  %v6345_v56 = vsel %vm6311_vm2, 0.0, %v1460_v43 }
  0x27   : > { %5310 = vmatmul.mubr.msk.f32.gmra.mrb[8].mxu1 %vm1707_vm0, %v6234_v50  ;;  %5507 = vmatmul.mubr.msk.f32.gmra.mrb[6].mxu0 %vm1707_vm0, %v6234_v50  ;;  %7655 = vst [vmem:[#allocation17_spill] sm:$0xff] %v6330_v47  ;;  %v6347_v57 = vmax.f32 %v599_v39, 0.0  ;;  %v783_v60 = vand.u32 15, %v701_v34  ;;  %v600_v61 = vadd.f32 %v6154_v7, %v558_v45  ;;  %v1464_v63 = vsel %vm1451_vm1, %v1461_v40, %v1463_v46 }
  0x28   : > { %5312 = vmatprep.mubr.msk.f32.mxu1 %vm1707_vm0, %v6242_v53  ;;  %5509 = vmatprep.mubr.msk.f32.mxu0 %vm1707_vm0, %v6242_v53  ;;  %vm1565_vm3 = vcmp.eq.s32.totalorder %v769_v31, 15  ;;  %v560_v0 = vmul.f32 %v6142_v6, %v516_v49  ;;  %v601_v1 = vadd.f32 %v6154_v7, %v559_v48  ;;  %v1465_v3 = vrot.slane %v6216_v41, 1 }
  0x29   : > { %v1467_v4 = vrot.slane %v6224_v44, 1  ;;  %v561_v9 = vmul.f32 %v6142_v6, %v517_v52  ;;  %v6367_v12 = vsel %vm1451_vm1, %v1459_v23, %v1461_v40  ;;  %v6369_v14 = vsel %vm1565_vm3, 0.0, %v1464_v63  ;;  %v520_v23 = vld [vmem:[%s6149_s22 + $0xc8] sm:$0xff]  ;;  %v522_v52 = vld [vmem:[%s6149_s22 + $0xd8] sm:$0xff] }
  0x2a   : > { %7656 = vst [vmem:[#allocation18_spill] sm:$0xff] %v6369_v14  ;;  %vm6371_vm4 = vcmp.eq.s32.totalorder %v783_v60, 15  ;;  %v797_v16 = vand.u32 15, %v703_v54  ;;  %v6384_v18 = vmax.f32 %v600_v61, 0.0  ;;  %v602_v19 = vadd.f32 %v6154_v7, %v560_v0  ;;  %v523_v0 = vld [vmem:[%s6149_s22 + $0xe0] sm:$0xff] }
  0x2b   : > { %5313 = vmatmul.mubr.msk.f32.gmra.mrb[10].mxu1 %vm1707_vm0, %v6254_v59  ;;  %5510 = vmatmul.mubr.msk.f32.gmra.mrb[8].mxu0 %vm1707_vm0, %v6254_v59  ;;  %v1469_v21 = vrot.slane %v6234_v50, 1  ;;  %v562_v22 = vmul.f32 %v6142_v6, %v518_v10  ;;  %v6393_v25 = vmax.f32 %v601_v1, 0.0  ;;  %v1468_v29 = vsel %vm1451_vm1, %v1465_v3, %v1467_v4 }
  0x2c   : > { %5315 = vmatprep.mubr.msk.f32.mxu1 %vm1707_vm0, %v6262_v62  ;;  %5512 = vmatprep.mubr.msk.f32.mxu0 %vm1707_vm0, %v6262_v62  ;;  %v603_v31 = vadd.f32 %v6154_v7, %v561_v9  ;;  %v563_v33 = vmul.f32 %v6142_v6, %v519_v11  ;;  %v6401_v34 = vsel %vm1451_vm1, %v1463_v46, %v1465_v3  ;;  %v705_v37 = vadd.s32 88, %v6248_v58 }
  0x2d   : > { %7659 = vst [vmem:[#allocation19_spill] sm:$0xff] %v6401_v34  ;;  %v564_v39 = vmul.f32 %v6142_v6, %v520_v23  ;;  %v707_v40 = vadd.s32 104, %v6248_v58  ;;  %v6410_v43 = vrot.slane %v7561_v2, 7  ;;  %v6416_v45 = vmax.f32 %v602_v19, 0.0 }
  0x2e   : > { %v6420_v46 = vsel %vm6371_vm4, 0.0, %v1468_v29  ;;  %v6423_v48 = vsel %vm1451_vm1, %v1467_v4, %v1469_v21  ;;  %v604_v49 = vadd.f32 %v6154_v7, %v562_v22  ;;  %v6431_v54 = vmax.f32 %v603_v31, 0.0 }
  0x2f   : > { %5316 = vmatmul.mubr.msk.f32.gmra.mrb[12].mxu1 %vm1707_vm0, %v6273_v8  ;;  %5513 = vmatmul.mubr.msk.f32.gmra.mrb[10].mxu0 %vm1707_vm0, %v6273_v8  ;;  %7660 = vst [vmem:[#allocation20_spill] sm:$0xff] %v6416_v45  ;;  %7661 = vst [vmem:[#allocation21_spill] sm:$0xff] %v6420_v46  ;;  %vm6433_vm5 = vcmp.eq.s32.totalorder %v797_v16, 15  ;;  %v605_v61 = vadd.f32 %v6154_v7, %v563_v33  ;;  %v565_v63 = vmul.f32 %v6142_v6, %v521_v38  ;;  %v524_v16 = vld [vmem:[%s6149_s22 + $0xe8] sm:$0xff] }
  0x30   : > { %5318 = vmatprep.mubr.msk.f32.mxu1 %vm1707_vm0, %v6283_v13  ;;  %5515 = vmatprep.mubr.msk.f32.mxu0 %vm1707_vm0, %v6283_v13  ;;  %7662 = vst [vmem:[#allocation22_spill] sm:$0xff] %v6423_v48  ;;  %7663 = vst [vmem:[#allocation23_spill] sm:$0xff] %v6431_v54  ;;  %v1473_v3 = vrot.slane %v6254_v59, 1  ;;  %v811_v4 = vand.u32 15, %v705_v37  ;;  %v1475_v9 = vrot.slane %v6262_v62, 1  ;;  %v606_v10 = vadd.f32 %v6154_v7, %v564_v39 }
  0x31   : > { %v566_v11 = vmul.f32 %v6142_v6, %v522_v52  ;;  %v825_v15 = vand.u32 15, %v707_v40  ;;  %v709_v19 = vadd.s32 120, %v6248_v58  ;;  %v1477_v22 = vrot.slane %v6273_v8, 1 }
  0x32   : > { %v1479_v23 = vrot.slane %v6283_v13, 1  ;;  %v567_v29 = vmul.f32 %v6142_v6, %v523_v0  ;;  %v6464_v33 = vmax.f32 %v605_v61, 0.0  ;;  %v607_v37 = vadd.f32 %v6154_v7, %v565_v63 }
  0x33   : > { %5319 = vmatmul.mubr.msk.f32.gmra.mrb[14].mxu1 %vm1707_vm0, %v6294_v20  ;;  %5516 = vmatmul.mubr.msk.f32.gmra.mrb[12].mxu0 %vm1707_vm0, %v6294_v20  ;;  %v734_v38 = vand.u32 15, %v6248_v58  ;;  %v1476_v40 = vsel %vm1451_vm1, %v1473_v3, %v1475_v9  ;;  %vm1571_vm7 = vcmp.eq.s32.totalorder %v811_v4, 15  ;;  %v6473_v52 = vmax.f32 %v606_v10, 0.0 }
  0x34   : > { %5321 = vmatprep.mubr.msk.f32.mxu1 %vm1707_vm0, %v6303_v24  ;;  %5518 = vmatprep.mubr.msk.f32.mxu0 %vm1707_vm0, %v6303_v24  ;;  %7667 = vst [vmem:[#allocation25_spill] sm:$0xff] %v6464_v33  ;;  %v608_v60 = vadd.f32 %v6154_v7, %v566_v11  ;;  %vm6476_vm8 = vcmp.eq.s32.totalorder %v825_v15, 15  ;;  %v711_v61 = vadd.s32 136, %v6248_v58  ;;  %v609_v63 = vadd.f32 %v6154_v7, %v567_v29 }
  0x35   : > { %v6492_v4 = vsel %vm1571_vm7, 0.0, %v1476_v40  ;;  %v6494_v10 = vmax.f32 %v607_v37, 0.0  ;;  %v6497_v11 = vsel %vm1451_vm1, %v1475_v9, %v1477_v22  ;;  %v1483_v15 = vrot.slane %v6303_v24, 1 }
  0x36   : > { %7671 = vst [vmem:[#allocation27_spill] sm:$0xff] %v6492_v4  ;;  %7673 = vst [vmem:[#allocation29_spill] sm:$0xff] %v6497_v11  ;;  %v1485_v29 = vrot.slane %v6321_v42, 1  ;;  %v696_v30 = vadd.s32 16, %v6248_v58  ;;  %v6504_v2 = vmax.f32 %v608_v60, 0.0  ;;  %v853_v37 = vand.u32 15, %v711_v61 }
  0x37   : > { %5322 = vmatmul.mubr.msk.f32.gmra.mrb[16].mxu1 %vm1707_vm0, %v6321_v42  ;;  %5519 = vmatmul.mubr.msk.f32.gmra.mrb[14].mxu0 %vm1707_vm0, %v6321_v42  ;;  %7672 = vst [vmem:[#allocation28_spill] sm:$0xff] %v6494_v10  ;;  %v713_v9 = vadd.s32 152, %v6248_v58  ;;  %v698_v0 = vadd.s32 32, %v6248_v58  ;;  %vm6532_vm10 = vcmp.eq.s32.totalorder %v734_v38, 0  ;;  %v1206_v38 = vrot.slane %v6179_v28, 7 }
  0x38   : > { %5324 = vmatprep.mubr.msk.f32.mxu1 %vm1707_vm0, %v6330_v47  ;;  %5547 = vmatprep.mubr.msk.f32.mxu0 %vm1707_vm0, %v6337_v51  ;;  %vm6541_vm11 = vcmp.eq.s32.totalorder %v853_v37, 15  ;;  %v6563_v28 = vsel %vm1451_vm1, %v1483_v15, %v1485_v29 }
  0x39   : > { %v762_v37 = vand.u32 15, %v698_v0  ;;  %7683 = vst [vmem:[#allocation33_spill] sm:$0xff] %v6563_v28 }
  0x3b   : > { %5325 = vmatmul.mubr.msk.f32.gmra.mrb[18].mxu1 %vm1707_vm0, %v6341_v55  ;;  %5548 = vmatmul.mubr.msk.f32.vlgmr.msra.gmra.mrb[0].mxu0 %vm1707_vm0, %v6345_v56  ;;  %vm1311_vm14 = vcmp.eq.s32.totalorder %v762_v37, 0 }
  0x3c   : > { %5596 = vmatpush3.msra.mxu0 %v6199_v35  ;;  %5327 = vmatprep.mubr.msk.f32.mxu1 %vm1707_vm0, %v6347_v57  ;;  %v1471_v35 = vrot.slane %v6242_v53, 1 }
  0x3d   : > { %5550 = vmatprep.mubr.msk.f32.mxu0 %vm1707_vm0, %v6367_v12  ;;  %5645 = vmatprep.subr.mxu0 %v6378_v17 }
  0x3e   : > { %v1472_v1 = vsel %vm1451_vm1, %v1469_v21, %v1471_v35  ;;  %v6451_v21 = vmax.f32 %v604_v49, 0.0  ;;  %v6469_v39 = vsel %vm1451_vm1, %v1471_v35, %v1473_v3  ;;  %v568_v49 = vmul.f32 %v6142_v6, %v524_v16 }
  0x3f   : > { %5328 = vmatmul.mubr.msk.f32.gmra.mrb[20].mxu1 %vm1707_vm0, %v6384_v18  ;;  %5551 = vmatmul.mubr.msk.f32.gmra.mrb[2].mxu0 %vm1707_vm0, %v6369_v14  ;;  %v6462_v31 = vsel %vm6433_vm5, 0.0, %v1472_v1  ;;  %7668 = vst [vmem:[#allocation26_spill] sm:$0xff] %v6469_v39  ;;  %v1480_v35 = vsel %vm1451_vm1, %v1477_v22, %v1479_v23  ;;  %v1481_v1 = vrot.slane %v6294_v20, 1  ;;  %v839_v3 = vand.u32 15, %v709_v19 }
  0x40   : > { %5330 = vmatprep.mubr.msk.f32.mxu1 %vm1707_vm0, %v6393_v25  ;;  %5553 = vmatprep.mubr.msk.f32.mxu0 %vm1707_vm0, %v6401_v34  ;;  %7666 = vst [vmem:[#allocation24_spill] sm:$0xff] %v6462_v31  ;;  %v610_v16 = vadd.f32 %v6154_v7, %v568_v49  ;;  %v1487_v19 = vrot.slane %v6330_v47, 1  ;;  %v6508_v40 = vsel %vm6476_vm8, 0.0, %v1480_v35  ;;  %v6515_v22 = vmax.f32 %v609_v63, 0.0 }
  0x41   : > { %7674 = vst [vmem:[#allocation30_spill] sm:$0xff] %v6508_v40  ;;  %v6518_v49 = vsel %vm1451_vm1, %v1479_v23, %v1481_v1  ;;  %vm6520_vm9 = vcmp.eq.s32.totalorder %v839_v3, 15  ;;  %v1484_v61 = vsel %vm1451_vm1, %v1481_v1, %v1483_v15  ;;  %v1306_v35 = vsel %vm1198_vm6, 0.0, %v6410_v43 }
  0x42   : > { %7675 = vst [vmem:[#allocation31_spill] sm:$0xff] %v6518_v49  ;;  %v1202_v63 = vrot.slane %v6175_v26, 7  ;;  %v6537_v3 = vmax.f32 %v610_v16, 0.0  ;;  %v867_v1 = vand.u32 15, %v713_v9  ;;  %v1415_v16 = vsel %vm6532_vm10, 0.0, %v1306_v35 }
  0x43   : > { %5331 = vmatmul.mubr.msk.f32.gmra.mrb[22].mxu1 %vm1707_vm0, %v6416_v45  ;;  %5554 = vmatmul.mubr.msk.f32.gmra.mrb[4].mxu0 %vm1707_vm0, %v6420_v46  ;;  %v715_v9 = vadd.s32 168, %v6248_v58  ;;  %v700_v23 = vadd.s32 48, %v6248_v58  ;;  %v717_v15 = vadd.s32 184, %v6248_v58  ;;  %v1499_v46 = vrot.slane %v6431_v54, 1 }
  0x44   : > { %5333 = vmatprep.mubr.msk.f32.mxu1 %vm1707_vm0, %v6431_v54  ;;  %5556 = vmatprep.mubr.msk.f32.mxu0 %vm1707_vm0, %v6423_v48  ;;  %v1491_v48 = vrot.slane %v6347_v57, 1  ;;  %v1203_v60 = vsel %vm1198_vm6, %v6410_v43, %v1202_v63  ;;  %vm6582_vm13 = vcmp.eq.s32.totalorder %v867_v1, 15  ;;  %v1497_v1 = vrot.slane %v6416_v45, 1 }
  0x45   : > { %v702_v34 = vadd.s32 64, %v6248_v58  ;;  %v719_v14 = vadd.s32 200, %v6248_v58 }
  0x47   : > { %5334 = vmatmul.mubr.msk.f32.gmra.mrb[24].mxu1 %vm1707_vm0, %v6451_v21  ;;  %5557 = vmatmul.mubr.msk.f32.gmra.mrb[6].mxu0 %vm1707_vm0, %v6462_v31  ;;  %v1489_v31 = vrot.slane %v6341_v55, 1 }
  0x48   : > { %5336 = vmatprep.mubr.msk.f32.mxu1 %vm1707_vm0, %v6464_v33  ;;  %5559 = vmatprep.mubr.msk.f32.mxu0 %vm1707_vm0, %v6469_v39  ;;  %v748_v39 = vand.u32 15, %v696_v30  ;;  %v6553_v30 = vsel %vm6520_vm9, 0.0, %v1484_v61  ;;  %v1204_v61 = vrot.slane %v6177_v27, 7 }
  0x49   : > { %7682 = vst [vmem:[#allocation32_spill] sm:$0xff] %v6553_v30 }
  0x4a   : > { %vm6573_vm12 = vcmp.eq.s32.totalorder %v748_v39, 0  ;;  %v1207_v27 = vsel %vm1198_vm6, %v1204_v61, %v1206_v38  ;;  %v881_v39 = vand.u32 15, %v715_v9  ;;  %v6605_v9 = vsel %vm1198_vm6, %v1202_v63, %v1204_v61 }
  0x4b   : > { %5337 = vmatmul.mubr.msk.f32.gmra.mrb[26].mxu1 %vm1707_vm0, %v6473_v52  ;;  %5560 = vmatmul.mubr.msk.f32.gmra.mrb[8].mxu0 %vm1707_vm0, %v6492_v4  ;;  %v1488_v4 = vsel %vm1451_vm1, %v1485_v29, %v1487_v19  ;;  %v1492_v29 = vsel %vm1451_vm1, %v1489_v31, %v1491_v48  ;;  %v6602_v37 = vsel %vm6573_vm12, 0.0, %v1203_v60  ;;  %7690 = vst [vmem:[#allocation36_spill] sm:$0xff] %v6605_v9  ;;  %v1212_v61 = vrot.slane %v6216_v41, 7 }
  0x4c   : > { %5339 = vmatprep.mubr.msk.f32.mxu1 %vm1707_vm0, %v6494_v10  ;;  %5562 = vmatprep.mubr.msk.f32.mxu0 %vm1707_vm0, %v6497_v11  ;;  %v6571_v0 = vsel %vm6541_vm11, 0.0, %v1488_v4  ;;  %v1493_v4 = vrot.slane %v6384_v18, 1  ;;  %v1495_v11 = vrot.slane %v6393_v25, 1  ;;  %7689 = vst [vmem:[#allocation35_spill] sm:$0xff] %v6602_v37  ;;  %vm6623_vm15 = vcmp.eq.s32.totalorder %v881_v39, 15 }
  0x4d   : > { %v1501_v39 = vrot.slane %v6451_v21, 1 }
  0x4e   : > { %v1496_v63 = vsel %vm1451_vm1, %v1493_v4, %v1495_v11 }
  0x4f   : > { %5340 = vmatmul.mubr.msk.f32.gmra.mrb[28].mxu1 %vm1707_vm0, %v6504_v2  ;;  %5563 = vmatmul.mubr.msk.f32.gmra.mrb[10].mxu0 %vm1707_vm0, %v6508_v40 }
  0x50   : > { %5342 = vmatprep.mubr.msk.f32.mxu1 %vm1707_vm0, %v6515_v22  ;;  %5565 = vmatprep.mubr.msk.f32.mxu0 %vm1707_vm0, %v6518_v49  ;;  %v6578_v49 = vsel %vm1451_vm1, %v1487_v19, %v1489_v31  ;;  %v1210_v31 = vrot.slane %v6203_v36, 7  ;;  %v776_v19 = vand.u32 15, %v700_v23  ;;  %v1208_v36 = vrot.slane %v6192_v32, 7 }
  0x51   : > { %7686 = vst [vmem:[#allocation34_spill] sm:$0xff] %v6578_v49  ;;  %v6612_v23 = vsel %vm1311_vm14, 0.0, %v1207_v27  ;;  %v1214_v27 = vrot.slane %v6224_v44, 7  ;;  %v6660_v44 = vsel %vm1451_vm1, %v1495_v11, %v1497_v1  ;;  %v706_v11 = vadd.s32 96, %v6248_v58 }
  0x52   : > { %v1211_v40 = vsel %vm1198_vm6, %v1208_v36, %v1210_v31  ;;  %vm6638_vm2 = vcmp.eq.s32.totalorder %v776_v19, 0  ;;  %v704_v19 = vadd.s32 80, %v6248_v58  ;;  %v6653_v41 = vsel %vm1198_vm6, %v1206_v38, %v1208_v36  ;;  %7700 = vst [vmem:[#allocation40_spill] sm:$0xff] %v6660_v44 }
  0x53   : > { %5343 = vmatmul.mubr.msk.f32.gmra.mrb[30].mxu1 %vm1707_vm0, %v6537_v3  ;;  %5566 = vmatmul.mubr.msk.f32.gmra.mrb[12].mxu0 %vm1707_vm0, %v6553_v30  ;;  %v6615_v30 = vsel %vm1451_vm1, %v1491_v48, %v1493_v4  ;;  %v6632_v48 = vld [vmem:[%s7554_s3 + $0x18] sm:$0xff]  ;;  %v6669_v36 = vsel %vm1198_vm6, %v1210_v31, %v1212_v61  ;;  %v1216_v38 = vrot.slane %v6234_v50, 7  ;;  %v1509_v32 = vrot.slane %v6504_v2, 1 }
  0x54   : > { %5347 = vmatprep.mubr.msk.f32.mxu1 %vm1707_vm0, %v1415_v16  ;;  %5568 = vmatprep.mubr.msk.f32.mxu0 %vm1707_vm0, %v6563_v28  ;;  %v895_v16 = vand.u32 15, %v717_v15  ;;  %v6610_v28 = vsel %vm6582_vm13, 0.0, %v1492_v29  ;;  %7692 = vst [vmem:[#allocation38_spill] sm:$0xff] %v6615_v30  ;;  %v1500_v15 = vsel %vm1451_vm1, %v1497_v1, %v1499_v46  ;;  %v790_v29 = vand.u32 15, %v702_v34  ;;  %v526_v4 = vld [vmem:[%s6149_s22 + $0xf8] sm:$0xff] }
  0x55   : > { %7691 = vst [vmem:[#allocation37_spill] sm:$0xff] %v6610_v28  ;;  %v6657_v34 = vsel %vm6623_vm15, 0.0, %v1496_v63  ;;  %v721_v63 = vadd.s32 216, %v6248_v58  ;;  %v1215_v1 = vsel %vm1198_vm6, %v1212_v61, %v1214_v27  ;;  %v1505_v61 = vrot.slane %v6473_v52, 1 }
  0x56   : > { %vm6645_vm3 = vcmp.eq.s32.totalorder %v895_v16, 15  ;;  %7699 = vst [vmem:[#allocation39_spill] sm:$0xff] %v6657_v34  ;;  %v525_v16 = vld [vmem:[%s6149_s22 + $0xf0] sm:$0xff]  ;;  %vm6687_vm4 = vcmp.eq.s32.totalorder %v790_v29, 0  ;;  %v1507_v29 = vrot.slane %v6494_v10, 1  ;;  %v570_v60 = vmul.f32 %v6142_v6, %v526_v4 }
  0x57   : > { %5348 = vmatmul.mubr.msk.f32.vlgmr.msra.gmra.mrb[0].mxu1 %vm1707_vm0, %v6410_v43  ;;  %5569 = vmatmul.mubr.msk.f32.gmra.mrb[14].mxu0 %vm1707_vm0, %v6571_v0  ;;  %v6684_v31 = vsel %vm6645_vm3, 0.0, %v1500_v15  ;;  %v569_v35 = vmul.f32 %v6142_v6, %v525_v16  ;;  %v1218_v15 = vrot.slane %v6242_v53, 7  ;;  %v6718_v16 = vsel %vm6687_vm4, 0.0, %v1215_v1 }
  0x58   : > { %5350 = vmatprep.mubr.msk.f32.mxu1 %vm1707_vm0, %v6602_v37  ;;  %5571 = vmatprep.mubr.msk.f32.mxu0 %vm1707_vm0, %v6578_v49  ;;  %v1503_v37 = vrot.slane %v6464_v33, 1  ;;  %7701 = vst [vmem:[#allocation41_spill] sm:$0xff] %v6684_v31  ;;  %v1220_v53 = vrot.slane %v6254_v59, 7  ;;  %v1226_v4 = vrot.slane %v6283_v13, 7  ;;  %v712_v13 = vadd.s32 144, %v6248_v58 }
  0x59   : > { %5396 = vmatpush3.msra.mxu1 %v6136_v5  ;;  %v909_v5 = vand.u32 15, %v719_v14  ;;  %v6680_v14 = vsel %vm6638_vm2, 0.0, %v1211_v40  ;;  %v1219_v1 = vsel %vm1198_vm6, %v1216_v38, %v1218_v15  ;;  %v710_v40 = vadd.s32 128, %v6248_v58 }
  0x5a   : > { %5445 = vmatprep.subr.mxu1 %v6632_v48  ;;  %v1504_v50 = vsel %vm1451_vm1, %v1501_v39, %v1503_v37  ;;  %v6735_v59 = vsel %vm1451_vm1, %v1503_v37, %v1505_v61 }
  0x5b   : > { %5351 = vmatmul.mubr.msk.f32.gmra.mrb[2].mxu1 %vm1707_vm0, %v6605_v9  ;;  %5572 = vmatmul.mubr.msk.f32.gmra.mrb[16].mxu0 %vm1707_vm0, %v6610_v28  ;;  %v6692_v9 = vsel %vm1451_vm1, %v1499_v46, %v1501_v39  ;;  %vm6696_vm5 = vcmp.eq.s32.totalorder %v909_v5, 15  ;;  %v6709_v46 = vsel %vm1198_vm6, %v1214_v27, %v1216_v38  ;;  %v923_v39 = vand.u32 15, %v721_v63 }
  0x5c   : > { %5353 = vmatprep.mubr.msk.f32.mxu1 %vm1707_vm0, %v6612_v23  ;;  %5574 = vmatprep.mubr.msk.f32.mxu0 %vm1707_vm0, %v6615_v30  ;;  %7704 = vst [vmem:[#allocation42_spill] sm:$0xff] %v6692_v9  ;;  %v804_v30 = vand.u32 15, %v704_v19  ;;  %v818_v19 = vand.u32 15, %v706_v11  ;;  %v723_v5 = vadd.s32 232, %v6248_v58  ;;  %v708_v27 = vadd.s32 112, %v6248_v58 }
  0x5d   : > { %v6725_v63 = vsel %vm6696_vm5, 0.0, %v1504_v50  ;;  %vm1587_vm8 = vcmp.eq.s32.totalorder %v923_v39, 15  ;;  %v846_v11 = vand.u32 15, %v710_v40 }
  0x5e   : > { %vm6727_vm7 = vcmp.eq.s32.totalorder %v804_v30, 0  ;;  %vm6743_vm9 = vcmp.eq.s32.totalorder %v818_v19, 0  ;;  %v937_v6 = vand.u32 15, %v723_v5  ;;  %v1511_v30 = vrot.slane %v6515_v22, 1 }
  0x5f   : > { %5354 = vmatmul.mubr.msk.f32.gmra.mrb[4].mxu1 %vm1707_vm0, %v6653_v41  ;;  %5575 = vmatmul.mubr.msk.f32.gmra.mrb[18].mxu0 %vm1707_vm0, %v6657_v34  ;;  %v1222_v34 = vrot.slane %v6262_v62, 7  ;;  %v1508_v62 = vsel %vm1451_vm1, %v1505_v61, %v1507_v29  ;;  %v832_v38 = vand.u32 15, %v708_v27  ;;  %v6757_v61 = vsel %vm6727_vm7, 0.0, %v1219_v1 }
  0x60   : > { %5356 = vmatprep.mubr.msk.f32.mxu1 %vm1707_vm0, %v6680_v14  ;;  %5577 = vmatprep.mubr.msk.f32.mxu0 %vm1707_vm0, %v6660_v44  ;;  %v611_v44 = vadd.f32 %v6154_v7, %v569_v35  ;;  %v725_v35 = vadd.s32 248, %v6248_v58  ;;  %v612_v19 = vadd.f32 %v6154_v7, %v570_v60  ;;  %v6764_v5 = vsel %vm1198_vm6, %v1218_v15, %v1220_v53 }
  0x61   : > { %v1223_v37 = vsel %vm1198_vm6, %v1220_v53, %v1222_v34  ;;  %v6769_v27 = vsel %vm1451_vm1, %v1507_v29, %v1509_v32  ;;  %v1512_v7 = vsel %vm1451_vm1, %v1509_v32, %v1511_v30  ;;  %vm6781_vm10 = vcmp.eq.s32.totalorder %v937_v6, 15 }
  0x62   : > { %v6760_v39 = vmax.f32 %v611_v44, 0.0  ;;  %7711 = vst [vmem:[#allocation43_spill] sm:$0xff] %v6769_v27  ;;  %v6778_v44 = vsel %vm6743_vm9, 0.0, %v1223_v37  ;;  %vm6790_vm11 = vcmp.eq.s32.totalorder %v832_v38, 0  ;;  %v951_v29 = vand.u32 15, %v725_v35 }
  0x63   : > { %5357 = vmatmul.mubr.msk.f32.gmra.mrb[6].mxu1 %vm1707_vm0, %v6669_v36  ;;  %5578 = vmatmul.mubr.msk.f32.gmra.mrb[20].mxu0 %vm1707_vm0, %v6684_v31  ;;  %v1224_v31 = vrot.slane %v6273_v8, 7  ;;  %v1230_v32 = vrot.slane %v6303_v24, 7  ;;  %v6797_v50 = vmax.f32 %v612_v19, 0.0  ;;  %v727_v6 = vadd.s32 264, %v6248_v58 }
  0x64   : > { %5359 = vmatprep.mubr.msk.f32.mxu1 %vm1707_vm0, %v6718_v16  ;;  %5580 = vmatprep.mubr.msk.f32.mxu0 %vm1707_vm0, %v6692_v9  ;;  %v6766_v9 = vsel %vm1587_vm8, 0.0, %v1508_v62  ;;  %v1513_v62 = vrot.slane %v6537_v3, 1  ;;  %v1515_v1 = vrot.slane %v6760_v39, 1  ;;  %v1228_v37 = vrot.slane %v6294_v20, 7 }
  0x65   : > { %v1227_v60 = vsel %vm1198_vm6, %v1224_v31, %v1226_v4  ;;  %v6807_v38 = vsel %vm1198_vm6, %v1222_v34, %v1224_v31  ;;  %v6811_v35 = vsel %vm6781_vm10, 0.0, %v1512_v7  ;;  %v7717_v19 = vmov 0.0  }
  0x66   : > { %7716 = vst [vmem:[#allocation44_spill] sm:$0xff] %v6811_v35  ;;  %v6814_v40 = vsel %vm1451_vm1, %v1511_v30, %v1513_v62  ;;  %v6817_v24 = vrot.slane %v7717_v19, 1  ;;  %v6825_v34 = vsel %vm6790_vm11, 0.0, %v1227_v60  ;;  %vm1591_vm12 = vcmp.eq.s32.totalorder %v951_v29, 15 }
  0x67   : > { %5360 = vmatmul.mubr.msk.f32.gmra.mrb[8].mxu1 %vm1707_vm0, %v6709_v46  ;;  %5581 = vmatmul.mubr.msk.f32.gmra.mrb[22].mxu0 %vm1707_vm0, %v6725_v63  ;;  %v1231_v31 = vsel %vm1198_vm6, %v1228_v37, %v1230_v32  ;;  %vm1323_vm13 = vcmp.eq.s32.totalorder %v846_v11, 0  ;;  %v1516_v30 = vsel %vm1451_vm1, %v1513_v62, %v1515_v1  ;;  %v1517_v7 = vrot.slane %v6797_v50, 1 }
  0x68   : > { %5362 = vmatprep.mubr.msk.f32.mxu1 %vm1707_vm0, %v6757_v61  ;;  %5583 = vmatprep.mubr.msk.f32.mxu0 %vm1707_vm0, %v6735_v59  ;;  %7718 = vst [vmem:[#allocation45_spill] sm:$0xff] %v6817_v24  ;;  %v965_v53 = vand.u32 15, %v727_v6  ;;  %v1234_v19 = vrot.slane %v6330_v47, 7  ;;  %v860_v20 = vand.u32 15, %v712_v13  ;;  %v714_v8 = vadd.s32 160, %v6248_v58 }
  0x69   : > { %v1232_v15 = vrot.slane %v6321_v42, 7  ;;  %v6842_v62 = vsel %vm1198_vm6, %v1226_v4, %v1228_v37  ;;  %v6844_v13 = vsel %vm1591_vm12, 0.0, %v1516_v30  ;;  %v6846_v29 = vsel %vm1323_vm13, 0.0, %v1231_v31 }
  0x6a   : > { %v6849_v11 = vsel %vm1451_vm1, %v1515_v1, %v1517_v7  ;;  %v1520_v60 = vsel %vm1451_vm1, %v1517_v7, %v6817_v24  ;;  %vm1593_vm14 = vcmp.eq.s32.totalorder %v965_v53, 15  ;;  %vm1325_vm15 = vcmp.eq.s32.totalorder %v860_v20, 0 }
  0x6b   : > { %5363 = vmatmul.mubr.msk.f32.gmra.mrb[10].mxu1 %vm1707_vm0, %v6764_v5  ;;  %5584 = vmatmul.mubr.msk.f32.gmra.mrb[24].mxu0 %vm1707_vm0, %v6766_v9  ;;  %7719 = vst [vmem:[#allocation46_spill] sm:$0xff] %v6849_v11  ;;  %v1235_v6 = vsel %vm1198_vm6, %v1232_v15, %v1234_v19  ;;  %v874_v47 = vand.u32 15, %v714_v8  ;;  %v1238_v42 = vrot.slane %v6347_v57, 7  ;;  %v716_v4 = vadd.s32 176, %v6248_v58 }
  0x6c   : > { %5365 = vmatprep.mubr.msk.f32.mxu1 %vm1707_vm0, %v6778_v44  ;;  %5586 = vmatprep.mubr.msk.f32.mxu0 %vm1707_vm0, %v6769_v27  ;;  %v6865_v1 = vsel %vm1198_vm6, %v1230_v32, %v1232_v15  ;;  %v6867_v8 = vsel %vm1593_vm14, 0.0, %v1520_v60  ;;  %v1236_v20 = vrot.slane %v6341_v55, 7  ;;  %v6870_v37 = vsel %vm1325_vm15, 0.0, %v1235_v6 }
  0x6d   : > { %7720 = vst [vmem:[#allocation47_spill] sm:$0xff] %v6867_v8  ;;  %v1242_v31 = vrot.slane %v6393_v25, 7  ;;  %vm1327_vm2 = vcmp.eq.s32.totalorder %v874_v47, 0  ;;  %v888_v7 = vand.u32 15, %v716_v4  ;;  %v718_v53 = vadd.s32 192, %v6248_v58 }
  0x6e   : > { %v1239_v30 = vsel %vm1198_vm6, %v1236_v20, %v1238_v42  ;;  %v1240_v32 = vrot.slane %v6384_v18, 7  ;;  %v6885_v15 = vsel %vm1198_vm6, %v1234_v19, %v1236_v20  ;;  %v1246_v4 = vrot.slane %v6431_v54, 7 }
  0x6f   : > { %5366 = vmatmul.mubr.msk.f32.gmra.mrb[12].mxu1 %vm1707_vm0, %v6807_v38  ;;  %5587 = vmatmul.mubr.msk.f32.gmra.mrb[26].mxu0 %vm1707_vm0, %v6811_v35  ;;  %v6887_v47 = vsel %vm1327_vm2, 0.0, %v1239_v30  ;;  %vm1329_vm3 = vcmp.eq.s32.totalorder %v888_v7, 0  ;;  %v902_v6 = vand.u32 15, %v718_v53  ;;  %v1244_v20 = vrot.slane %v6416_v45, 7 }
  0x70   : > { %5368 = vmatprep.mubr.msk.f32.mxu1 %vm1707_vm0, %v6825_v34  ;;  %5589 = vmatprep.mubr.msk.f32.mxu0 %vm1707_vm0, %v6814_v40  ;;  %v1243_v60 = vsel %vm1198_vm6, %v1240_v32, %v1242_v31  ;;  %v6905_v19 = vsel %vm1198_vm6, %v1238_v42, %v1240_v32  ;;  %v1250_v7 = vrot.slane %v6464_v33, 7  ;;  %v722_v54 = vadd.s32 224, %v6248_v58 }
  0x71   : > { %v6910_v30 = vsel %vm1329_vm3, 0.0, %v1243_v60  ;;  %v1247_v53 = vsel %vm1198_vm6, %v1244_v20, %v1246_v4  ;;  %vm1331_vm4 = vcmp.eq.s32.totalorder %v902_v6, 0  ;;  %v1248_v42 = vrot.slane %v6451_v21, 7 }
  0x72   : > { %v6926_v32 = vsel %vm1198_vm6, %v1242_v31, %v1244_v20  ;;  %v930_v6 = vand.u32 15, %v722_v54  ;;  %v1254_v33 = vrot.slane %v6494_v10, 7  ;;  %v724_v45 = vadd.s32 240, %v6248_v58 }
  0x73   : > { %5369 = vmatmul.mubr.msk.f32.gmra.mrb[14].mxu1 %vm1707_vm0, %v6842_v62  ;;  %5590 = vmatmul.mubr.msk.f32.gmra.mrb[28].mxu0 %vm1707_vm0, %v6844_v13  ;;  %v1251_v60 = vsel %vm1198_vm6, %v1248_v42, %v1250_v7  ;;  %v6942_v31 = vsel %vm1198_vm6, %v1246_v4, %v1248_v42  ;;  %v1252_v54 = vrot.slane %v6473_v52, 7  ;;  %v1258_v10 = vrot.slane %v6515_v22, 7 }
  0x74   : > { %5371 = vmatprep.mubr.msk.f32.mxu1 %vm1707_vm0, %v6846_v29  ;;  %5592 = vmatprep.mubr.msk.f32.mxu0 %vm1707_vm0, %v6849_v11  ;;  %v6895_v11 = vld [vmem:[%s7554_s3 + $0x40] sm:$0xff]  ;;  %7722 = vst [vmem:[#allocation49_spill] sm:$0xff] %v6942_v31  ;;  %vm1335_vm7 = vcmp.eq.s32.totalorder %v930_v6, 0  ;;  %v1256_v42 = vrot.slane %v6504_v2, 7 }
  0x75   : > { %v6958_v4 = vsel %vm1198_vm6, %v1250_v7, %v1252_v54 }
  0x76   : > { %7724 = vst [vmem:[#allocation51_spill] sm:$0xff] %v6958_v4  ;;  %v1259_v6 = vsel %vm1198_vm6, %v1256_v42, %v1258_v10  ;;  %v6974_v7 = vsel %vm1198_vm6, %v1254_v33, %v1256_v42  ;;  %v7727_v42 = vrot.slane %v6175_v26, 1  ;;  %v7013_v26 = vld [vmem:[%s7554_s3 + $0x20] sm:$0xff] }
  0x77   : > { %5372 = vmatmul.mubr.msk.f32.gmra.mrb[16].mxu1 %vm1707_vm0, %v6865_v1  ;;  %5593 = vmatmul.mubr.msk.f32.gmra.mrb[30].mxu0 %vm1707_vm0, %v6867_v8  ;;  %v720_v8 = vadd.s32 208, %v6248_v58  ;;  %7725 = vst [vmem:[#allocation52_spill] sm:$0xff] %v6974_v7 }
  0x78   : > { %5374 = vmatprep.mubr.msk.f32.mxu1 %vm1707_vm0, %v6870_v37  ;;  %5597 = vmatprep.mubr.msk.f32.mxu0 %vm1707_vm0, %v6612_v23 }
  0x7b   : > { %5375 = vmatmul.mubr.msk.f32.gmra.mrb[18].mxu1 %vm1707_vm0, %v6885_v15  ;;  %5598 = vmatmul.mubr.msk.f32.vlgmr.msra.gmra.mrb[0].mxu0 %vm1707_vm0, %v6653_v41 }
  0x7c   : > { %5646 = vmatpush3.msra.mxu0 %v6378_v17  ;;  %5377 = vmatprep.mubr.msk.f32.mxu1 %vm1707_vm0, %v6887_v47  ;;  %v916_v17 = vand.u32 15, %v720_v8  ;;  %v6928_v8 = vsel %vm1331_vm4, 0.0, %v1247_v53  ;;  %v1255_v53 = vsel %vm1198_vm6, %v1252_v54, %v1254_v33  ;;  %v1260_v54 = vrot.slane %v6537_v3, 7 }
  0x7d   : > { %5600 = vmatprep.mubr.msk.f32.mxu0 %vm1707_vm0, %v6680_v14  ;;  %5695 = vmatprep.subr.mxu0 %v6895_v11  ;;  %7721 = vst [vmem:[#allocation48_spill] sm:$0xff] %v6928_v8 }
  0x7e   : > { %vm1333_vm5 = vcmp.eq.s32.totalorder %v916_v17, 0  ;;  %v944_v17 = vand.u32 15, %v724_v45  ;;  %v6961_v45 = vsel %vm1335_vm7, 0.0, %v1255_v53  ;;  %v6988_v33 = vsel %vm1198_vm6, %v1258_v10, %v1260_v54 }
  0x7f   : > { %5378 = vmatmul.mubr.msk.f32.gmra.mrb[20].mxu1 %vm1707_vm0, %v6905_v19  ;;  %5601 = vmatmul.mubr.msk.f32.gmra.mrb[2].mxu0 %vm1707_vm0, %v6669_v36  ;;  %v6945_v20 = vsel %vm1333_vm5, 0.0, %v1251_v60  ;;  %v695_v60 = vadd.s32 8, %v6248_v58 }
  0x80   : > { %5380 = vmatprep.mubr.msk.f32.mxu1 %vm1707_vm0, %v6910_v30  ;;  %5603 = vmatprep.mubr.msk.f32.mxu0 %vm1707_vm0, %v6718_v16  ;;  %7723 = vst [vmem:[#allocation50_spill] sm:$0xff] %v6945_v20  ;;  %vm1337_vm8 = vcmp.eq.s32.totalorder %v944_v17, 0 }
  0x81   : > { %v6977_v53 = vsel %vm1337_vm8, 0.0, %v1259_v6  ;;  %v741_v17 = vand.u32 15, %v695_v60  ;;  %v1456_v60 = vsel %vm1451_vm1, %v6817_v24, %v7727_v42  ;;  %v7730_v6 = vld [vmem:[#allocation21_spill] sm:$0xff] }
  0x82   : > { %7726 = vst [vmem:[#allocation53_spill] sm:$0xff] %v6977_v53 }
  0x83   : > { %5381 = vmatmul.mubr.msk.f32.gmra.mrb[22].mxu1 %vm1707_vm0, %v6926_v32  ;;  %5604 = vmatmul.mubr.msk.f32.gmra.mrb[4].mxu0 %vm1707_vm0, %v6709_v46  ;;  %vm1561_vm9 = vcmp.eq.s32.totalorder %v741_v17, 15  ;;  %v7731_v17 = vld [vmem:[#allocation22_spill] sm:$0xff] }
  0x84   : > { %5383 = vmatprep.mubr.msk.f32.mxu1 %vm1707_vm0, %v6928_v8  ;;  %5606 = vmatprep.mubr.msk.f32.mxu0 %vm1707_vm0, %v6757_v61  ;;  %v1669_v10 = vsel %vm1561_vm9, 0.0, %v1456_v60  ;;  %v1262_v60 = vrot.slane %v6760_v39, 7 }
  0x87   : > { %5384 = vmatmul.mubr.msk.f32.gmra.mrb[24].mxu1 %vm1707_vm0, %v6942_v31  ;;  %5607 = vmatmul.mubr.msk.f32.gmra.mrb[6].mxu0 %vm1707_vm0, %v6764_v5 }
  0x88   : > { %5386 = vmatprep.mubr.msk.f32.mxu1 %vm1707_vm0, %v6945_v20  ;;  %5609 = vmatprep.mubr.msk.f32.mxu0 %vm1707_vm0, %v6778_v44 }
  0x8b   : > { %5387 = vmatmul.mubr.msk.f32.gmra.mrb[26].mxu1 %vm1707_vm0, %v6958_v4  ;;  %5610 = vmatmul.mubr.msk.f32.gmra.mrb[8].mxu0 %vm1707_vm0, %v6807_v38 }
  0x8c   : > { %5389 = vmatprep.mubr.msk.f32.mxu1 %vm1707_vm0, %v6961_v45  ;;  %5612 = vmatprep.mubr.msk.f32.mxu0 %vm1707_vm0, %v6825_v34 }
  0x8f   : > { %5390 = vmatmul.mubr.msk.f32.gmra.mrb[28].mxu1 %vm1707_vm0, %v6974_v7  ;;  %5613 = vmatmul.mubr.msk.f32.gmra.mrb[10].mxu0 %vm1707_vm0, %v6842_v62 }
  0x90   : > { %5392 = vmatprep.mubr.msk.f32.mxu1 %vm1707_vm0, %v6977_v53  ;;  %5615 = vmatprep.mubr.msk.f32.mxu0 %vm1707_vm0, %v6846_v29 }
  0x93   : > { %5393 = vmatmul.mubr.msk.f32.gmra.mrb[30].mxu1 %vm1707_vm0, %v6988_v33  ;;  %5616 = vmatmul.mubr.msk.f32.gmra.mrb[12].mxu0 %vm1707_vm0, %v6865_v1 }
  0x94   : > { %5397 = vmatprep.mubr.msk.f32.mxu1 %vm1707_vm0, %v6817_v24  ;;  %5618 = vmatprep.mubr.msk.f32.mxu0 %vm1707_vm0, %v6870_v37  ;;  %v7732_v24 = vld [vmem:[#allocation24_spill] sm:$0xff] }
  0x97   : > { %5398 = vmatmul.mubr.msk.f32.vlgmr.msra.gmra.mrb[0].mxu1 %vm1707_vm0, %v1669_v10  ;;  %5619 = vmatmul.mubr.msk.f32.gmra.mrb[14].mxu0 %vm1707_vm0, %v6885_v15  ;;  %v728_v10 = vadd.s32 272, %v6248_v58 }
  0x98   : > { %5400 = vmatprep.mubr.msk.f32.mxu1 %vm1707_vm0, %v6337_v51  ;;  %5621 = vmatprep.mubr.msk.f32.mxu0 %vm1707_vm0, %v6887_v47  ;;  %v7728_v51 = vld [vmem:[#allocation18_spill] sm:$0xff] }
  0x99   : > { %5446 = vmatpush3.msra.mxu1 %v6632_v48  ;;  %v7729_v48 = vld [vmem:[#allocation19_spill] sm:$0xff] }
  0x9a   : > { %5745 = vmatprep.subr.mxu1 %v7013_v26 }
  0x9b   : > { %5401 = vmatmul.mubr.msk.f32.gmra.mrb[2].mxu1 %vm1707_vm0, %v6345_v56  ;;  %5622 = vmatmul.mubr.msk.f32.gmra.mrb[16].mxu0 %vm1707_vm0, %v6905_v19  ;;  %v726_v56 = vadd.s32 256, %v6248_v58  ;;  %v7735_v58 = vld [vmem:[#allocation29_spill] sm:$0xff] }
  0x9c   : > { %5403 = vmatprep.mubr.msk.f32.mxu1 %vm1707_vm0, %v6367_v12  ;;  %5624 = vmatprep.mubr.msk.f32.mxu0 %vm1707_vm0, %v6910_v30 }
  0x9d   : > { %v958_v42 = vand.u32 15, %v726_v56  ;;  %v972_v56 = vand.u32 15, %v728_v10  ;;  %v7737_v10 = vld [vmem:[#allocation31_spill] sm:$0xff] }
  0x9f   : > { %5404 = vmatmul.mubr.msk.f32.gmra.mrb[4].mxu1 %vm1707_vm0, %v7728_v51  ;;  %5625 = vmatmul.mubr.msk.f32.gmra.mrb[18].mxu0 %vm1707_vm0, %v6926_v32  ;;  %vm1339_vm10 = vcmp.eq.s32.totalorder %v958_v42, 0  ;;  %vm1341_vm11 = vcmp.eq.s32.totalorder %v972_v56, 0  ;;  %v7736_v42 = vld [vmem:[#allocation30_spill] sm:$0xff]  ;;  %v7739_v56 = vld [vmem:[#allocation33_spill] sm:$0xff] }
  0xa0   : > { %5406 = vmatprep.mubr.msk.f32.mxu1 %vm1707_vm0, %v7729_v48  ;;  %5627 = vmatprep.mubr.msk.f32.mxu0 %vm1707_vm0, %v6928_v8  ;;  %v7733_v8 = vld [vmem:[#allocation26_spill] sm:$0xff] }
  0xa3   : > { %5407 = vmatmul.mubr.msk.f32.gmra.mrb[6].mxu1 %vm1707_vm0, %v7730_v6  ;;  %5628 = vmatmul.mubr.msk.f32.gmra.mrb[20].mxu0 %vm1707_vm0, %v6942_v31  ;;  %v1263_v31 = vsel %vm1198_vm6, %v1260_v54, %v1262_v60 }
  0xa4   : > { %5409 = vmatprep.mubr.msk.f32.mxu1 %vm1707_vm0, %v7731_v17  ;;  %5630 = vmatprep.mubr.msk.f32.mxu0 %vm1707_vm0, %v6945_v20  ;;  %v7734_v20 = vld [vmem:[#allocation27_spill] sm:$0xff] }
  0xa7   : > { %5410 = vmatmul.mubr.msk.f32.gmra.mrb[8].mxu1 %vm1707_vm0, %v7732_v24  ;;  %5631 = vmatmul.mubr.msk.f32.gmra.mrb[22].mxu0 %vm1707_vm0, %v6958_v4  ;;  %v1264_v4 = vrot.slane %v6797_v50, 7 }
  0xa8   : > { %5412 = vmatprep.mubr.msk.f32.mxu1 %vm1707_vm0, %v7733_v8  ;;  %5633 = vmatprep.mubr.msk.f32.mxu0 %vm1707_vm0, %v6961_v45  ;;  %v7061_v8 = vsel %vm1339_vm10, 0.0, %v1263_v31 }
  0xa9   : > { %v1267_v54 = vsel %vm1198_vm6, %v1264_v4, %v6410_v43 }
  0xaa   : > { %v1449_v31 = vsel %vm1341_vm11, 0.0, %v1267_v54  ;;  %v7742_v54 = vld [vmem:[#allocation38_spill] sm:$0xff] }
  0xab   : > { %5413 = vmatmul.mubr.msk.f32.gmra.mrb[10].mxu1 %vm1707_vm0, %v7734_v20  ;;  %5634 = vmatmul.mubr.msk.f32.gmra.mrb[24].mxu0 %vm1707_vm0, %v6974_v7  ;;  %v7738_v7 = vld [vmem:[#allocation32_spill] sm:$0xff] }
  0xac   : > { %5415 = vmatprep.mubr.msk.f32.mxu1 %vm1707_vm0, %v7735_v58  ;;  %5636 = vmatprep.mubr.msk.f32.mxu0 %vm1707_vm0, %v6977_v53  ;;  %v7074_v53 = vsel %vm1198_vm6, %v1262_v60, %v1264_v4  ;;  %v7740_v4 = vld [vmem:[#allocation2_spill] sm:$0xff]  ;;  %v7741_v60 = vld [vmem:[#allocation3_spill] sm:$0xff] }
  0xaf   : > { %5416 = vmatmul.mubr.msk.f32.gmra.mrb[12].mxu1 %vm1707_vm0, %v7736_v42  ;;  %5637 = vmatmul.mubr.msk.f32.gmra.mrb[26].mxu0 %vm1707_vm0, %v6988_v33 }
  0xb0   : > { %5418 = vmatprep.mubr.msk.f32.mxu1 %vm1707_vm0, %v7737_v10  ;;  %5639 = vmatprep.mubr.msk.f32.mxu0 %vm1707_vm0, %v7061_v8 }
  0xb3   : > { %5419 = vmatmul.mubr.msk.f32.gmra.mrb[14].mxu1 %vm1707_vm0, %v7738_v7  ;;  %5640 = vmatmul.mubr.msk.f32.gmra.mrb[28].mxu0 %vm1707_vm0, %v7074_v53 }
  0xb4   : > { %5421 = vmatprep.mubr.msk.f32.mxu1 %vm1707_vm0, %v7739_v56  ;;  %5642 = vmatprep.mubr.msk.f32.mxu0 %vm1707_vm0, %v1449_v31  ;;  %v7743_v31 = vld [vmem:[#allocation4_spill] sm:$0xff] }
  0xb7   : > { %5422 = vmatmul.mubr.msk.f32.gmra.mrb[16].mxu1 %vm1707_vm0, %v6571_v0  ;;  %5643 = vmatmul.mubr.msk.f32.gmra.mrb[30].mxu0 %vm1707_vm0, %v6410_v43  ;;  %v7744_v43 = vld [vmem:[#allocation39_spill] sm:$0xff] }
  0xb8   : > { %5424 = vmatprep.mubr.msk.f32.mxu1 %vm1707_vm0, %v6578_v49  ;;  %5647 = vmatprep.mubr.msk.f32.mxu0 %vm1707_vm0, %v7740_v4  ;;  %v7745_v49 = vld [vmem:[#allocation5_spill] sm:$0xff]  ;;  %v7746_v4 = vld [vmem:[#allocation40_spill] sm:$0xff] }
  0xbb   : > { %5425 = vmatmul.mubr.msk.f32.gmra.mrb[18].mxu1 %vm1707_vm0, %v6610_v28  ;;  %5648 = vmatmul.mubr.msk.f32.vlgmr.msra.gmra.mrb[0].mxu0 %vm1707_vm0, %v7741_v60  ;;  %v7747_v28 = vld [vmem:[#allocation6_spill] sm:$0xff]  ;;  %v7748_v60 = vld [vmem:[#allocation41_spill] sm:$0xff] }
  0xbc   : > { %5696 = vmatpush3.msra.mxu0 %v6895_v11  ;;  %5427 = vmatprep.mubr.msk.f32.mxu1 %vm1707_vm0, %v7742_v54  ;;  %v7749_v11 = vld [vmem:[#allocation7_spill] sm:$0xff]  ;;  %v7750_v54 = vld [vmem:[#allocation42_spill] sm:$0xff] }
  0xbd   : > { %5650 = vmatprep.mubr.msk.f32.mxu0 %vm1707_vm0, %v7743_v31  ;;  %v7751_v31 = vld [vmem:[#allocation8_spill] sm:$0xff] }
  0xbf   : > { %5428 = vmatmul.mubr.msk.f32.gmra.mrb[20].mxu1 %vm1707_vm0, %v7744_v43  ;;  %5651 = vmatmul.mubr.msk.f32.gmra.mrb[2].mxu0 %vm1707_vm0, %v7745_v49  ;;  %v7752_v49 = vld [vmem:[#allocation10_spill] sm:$0xff] }
  0xc0   : > { %5430 = vmatprep.mubr.msk.f32.mxu1 %vm1707_vm0, %v7746_v4  ;;  %5653 = vmatprep.mubr.msk.f32.mxu0 %vm1707_vm0, %v7747_v28  ;;  %v7753_v28 = vld [vmem:[#allocation11_spill] sm:$0xff] }
  0xc3   : > { %5431 = vmatmul.mubr.msk.f32.gmra.mrb[22].mxu1 %vm1707_vm0, %v7748_v60  ;;  %5654 = vmatmul.mubr.msk.f32.gmra.mrb[4].mxu0 %vm1707_vm0, %v7749_v11  ;;  %v7754_v11 = vld [vmem:[#allocation12_spill] sm:$0xff] }
  0xc4   : > { %5433 = vmatprep.mubr.msk.f32.mxu1 %vm1707_vm0, %v7750_v54  ;;  %5656 = vmatprep.mubr.msk.f32.mxu0 %vm1707_vm0, %v7751_v31  ;;  %v7755_v31 = vld [vmem:[#allocation13_spill] sm:$0xff] }
  0xc7   : > { %5434 = vmatmul.mubr.msk.f32.gmra.mrb[24].mxu1 %vm1707_vm0, %v6725_v63  ;;  %5657 = vmatmul.mubr.msk.f32.gmra.mrb[6].mxu0 %vm1707_vm0, %v7752_v49  ;;  %v7756_v49 = vld [vmem:[#allocation14_spill] sm:$0xff] }
  0xc8   : > { %5436 = vmatprep.mubr.msk.f32.mxu1 %vm1707_vm0, %v6735_v59  ;;  %5659 = vmatprep.mubr.msk.f32.mxu0 %vm1707_vm0, %v7753_v28  ;;  %v7757_v28 = vld [vmem:[#allocation15_spill] sm:$0xff] }
  0xcb   : > { %5437 = vmatmul.mubr.msk.f32.gmra.mrb[26].mxu1 %vm1707_vm0, %v6766_v9  ;;  %5660 = vmatmul.mubr.msk.f32.gmra.mrb[8].mxu0 %vm1707_vm0, %v7754_v11  ;;  %v7758_v11 = vld [vmem:[#allocation16_spill] sm:$0xff] }
  0xcc   : > { %5439 = vmatprep.mubr.msk.f32.mxu1 %vm1707_vm0, %v6769_v27  ;;  %5662 = vmatprep.mubr.msk.f32.mxu0 %vm1707_vm0, %v7755_v31  ;;  %v7759_v27 = vld [vmem:[#allocation35_spill] sm:$0xff]  ;;  %v7760_v31 = vld [vmem:[#allocation17_spill] sm:$0xff] }
  0xcf   : > { %5440 = vmatmul.mubr.msk.f32.gmra.mrb[28].mxu1 %vm1707_vm0, %v6811_v35  ;;  %5663 = vmatmul.mubr.msk.f32.gmra.mrb[10].mxu0 %vm1707_vm0, %v7756_v49  ;;  %v7761_v35 = vld [vmem:[#allocation36_spill] sm:$0xff] }
  0xd0   : > { %5442 = vmatprep.mubr.msk.f32.mxu1 %vm1707_vm0, %v6814_v40  ;;  %5665 = vmatprep.mubr.msk.f32.mxu0 %vm1707_vm0, %v7757_v28 }
  0xd3   : > { %5443 = vmatmul.mubr.msk.f32.gmra.mrb[30].mxu1 %vm1707_vm0, %v6844_v13  ;;  %5666 = vmatmul.mubr.msk.f32.gmra.mrb[12].mxu0 %vm1707_vm0, %v7758_v11 }
  0xd4   : > { %5447 = vmatprep.mubr.msk.f32.mxu1 %vm1707_vm0, %v7759_v27  ;;  %5668 = vmatprep.mubr.msk.f32.mxu0 %vm1707_vm0, %v7760_v31  ;;  %v7763_v27 = vld [vmem:[#allocation23_spill] sm:$0xff] }
  0xd7   : > { %5448 = vmatmul.mubr.msk.f32.vlgmr.msra.gmra.mrb[0].mxu1 %vm1707_vm0, %v7761_v35  ;;  %5669 = vmatmul.mubr.msk.f32.gmra.mrb[14].mxu0 %vm1707_vm0, %v6341_v55  ;;  %v7776_v35 = vld [vmem:[#allocation38_spill] sm:$0xff] }
  0xd8   : > { %5450 = vmatprep.mubr.msk.f32.mxu1 %vm1707_vm0, %v6612_v23  ;;  %5671 = vmatprep.mubr.msk.f32.mxu0 %vm1707_vm0, %v6347_v57  ;;  %v7762_v23 = vld [vmem:[#allocation20_spill] sm:$0xff] }
  0xd9   : > { %5746 = vmatpush3.msra.mxu1 %v7013_v26 }
  0xdb   : > { %5451 = vmatmul.mubr.msk.f32.gmra.mrb[2].mxu1 %vm1707_vm0, %v6653_v41  ;;  %5672 = vmatmul.mubr.msk.f32.gmra.mrb[16].mxu0 %vm1707_vm0, %v6384_v18  ;;  %v7764_v41 = vld [vmem:[#allocation25_spill] sm:$0xff] }
  0xdc   : > { %5453 = vmatprep.mubr.msk.f32.mxu1 %vm1707_vm0, %v6680_v14  ;;  %5674 = vmatprep.mubr.msk.f32.mxu0 %vm1707_vm0, %v6393_v25  ;;  %v7766_v14 = vmov 0.0  }
  0xdf   : > { %5454 = vmatmul.mubr.msk.f32.gmra.mrb[4].mxu1 %vm1707_vm0, %v6669_v36  ;;  %5675 = vmatmul.mubr.msk.f32.gmra.mrb[18].mxu0 %vm1707_vm0, %v7762_v23  ;;  %v7765_v36 = vld [vmem:[#allocation28_spill] sm:$0xff] }
  0xe0   : > { %5456 = vmatprep.mubr.msk.f32.mxu1 %vm1707_vm0, %v6718_v16  ;;  %5677 = vmatprep.mubr.msk.f32.mxu0 %vm1707_vm0, %v7763_v27  ;;  %v7769_v16 = vld [vmem:[#allocation50_spill] sm:$0xff] }
  0xe3   : > { %5457 = vmatmul.mubr.msk.f32.gmra.mrb[6].mxu1 %vm1707_vm0, %v6709_v46  ;;  %5678 = vmatmul.mubr.msk.f32.gmra.mrb[20].mxu0 %vm1707_vm0, %v6451_v21  ;;  %v7767_v46 = vld [vmem:[#allocation48_spill] sm:$0xff] }
  0xe4   : > { %5459 = vmatprep.mubr.msk.f32.mxu1 %vm1707_vm0, %v6757_v61  ;;  %5680 = vmatprep.mubr.msk.f32.mxu0 %vm1707_vm0, %v7764_v41  ;;  %v7770_v61 = vld [vmem:[#allocation26_spill] sm:$0xff] }
  0xe7   : > { %5460 = vmatmul.mubr.msk.f32.gmra.mrb[8].mxu1 %vm1707_vm0, %v6764_v5  ;;  %5681 = vmatmul.mubr.msk.f32.gmra.mrb[22].mxu0 %vm1707_vm0, %v6473_v52  ;;  %v7771_v5 = vld [vmem:[#allocation51_spill] sm:$0xff] }
  0xe8   : > { %5462 = vmatprep.mubr.msk.f32.mxu1 %vm1707_vm0, %v6778_v44  ;;  %5683 = vmatprep.mubr.msk.f32.mxu0 %vm1707_vm0, %v7765_v36  ;;  %v7772_v44 = vld [vmem:[#allocation52_spill] sm:$0xff] }
  0xeb   : > { %5463 = vmatmul.mubr.msk.f32.gmra.mrb[10].mxu1 %vm1707_vm0, %v6807_v38  ;;  %5684 = vmatmul.mubr.msk.f32.gmra.mrb[24].mxu0 %vm1707_vm0, %v6504_v2  ;;  %v7775_v38 = vld [vmem:[#allocation37_spill] sm:$0xff] }
  0xec   : > { %5465 = vmatprep.mubr.msk.f32.mxu1 %vm1707_vm0, %v6825_v34  ;;  %5686 = vmatprep.mubr.msk.f32.mxu0 %vm1707_vm0, %v6515_v22 }
  0xef   : > { %5466 = vmatmul.mubr.msk.f32.gmra.mrb[12].mxu1 %vm1707_vm0, %v6842_v62  ;;  %5687 = vmatmul.mubr.msk.f32.gmra.mrb[26].mxu0 %vm1707_vm0, %v6537_v3 }
  0xf0   : > { %5468 = vmatprep.mubr.msk.f32.mxu1 %vm1707_vm0, %v6846_v29  ;;  %5689 = vmatprep.mubr.msk.f32.mxu0 %vm1707_vm0, %v6760_v39 }
  0xf3   : > { %5469 = vmatmul.mubr.msk.f32.gmra.mrb[14].mxu1 %vm1707_vm0, %v6865_v1  ;;  %5690 = vmatmul.mubr.msk.f32.gmra.mrb[28].mxu0 %vm1707_vm0, %v6797_v50 }
  0xf4   : > { %5471 = vmatprep.mubr.msk.f32.mxu1 %vm1707_vm0, %v6870_v37  ;;  %5692 = vmatprep.mubr.f32.mxu0 %v7766_v14 }
  0xf7   : > { %5472 = vmatmul.mubr.msk.f32.gmra.mrb[16].mxu1 %vm1707_vm0, %v6885_v15  ;;  %5693 = vmatmul.mubr.f32.gmra.mrb[30].mxu0 %v7766_v14 }
  0xf8   : > { %5474 = vmatprep.mubr.msk.f32.mxu1 %vm1707_vm0, %v6887_v47  ;;  %5697 = vmatprep.mubr.msk.f32.mxu0 %vm1707_vm0, %v6367_v12  ;;  %v7768_v12 = vld [vmem:[#allocation49_spill] sm:$0xff] }
  0xfb   : > { %5475 = vmatmul.mubr.msk.f32.gmra.mrb[18].mxu1 %vm1707_vm0, %v6905_v19  ;;  %5698 = vmatmul.mubr.msk.f32.vlgmr.msra.gmra.mrb[0].mxu0 %vm1707_vm0, %v7728_v51 }
  0xfc   : > { %5477 = vmatprep.mubr.msk.f32.mxu1 %vm1707_vm0, %v6910_v30  ;;  %5700 = vmatprep.mubr.msk.f32.mxu0 %vm1707_vm0, %v7729_v48 }
  0xff   : > { %5478 = vmatmul.mubr.msk.f32.gmra.mrb[20].mxu1 %vm1707_vm0, %v6926_v32  ;;  %5701 = vmatmul.mubr.msk.f32.gmra.mrb[2].mxu0 %vm1707_vm0, %v7730_v6 }
 0x100   : > { %5480 = vmatprep.mubr.msk.f32.mxu1 %vm1707_vm0, %v7767_v46  ;;  %5703 = vmatprep.mubr.msk.f32.mxu0 %vm1707_vm0, %v7731_v17 }
 0x103   : > { %5481 = vmatmul.mubr.msk.f32.gmra.mrb[22].mxu1 %vm1707_vm0, %v7768_v12  ;;  %5704 = vmatmul.mubr.msk.f32.gmra.mrb[4].mxu0 %vm1707_vm0, %v7732_v24  ;;  %v7773_v24 = vld [vmem:[#allocation53_spill] sm:$0xff] }
 0x104   : > { %5483 = vmatprep.mubr.msk.f32.mxu1 %vm1707_vm0, %v7769_v16  ;;  %5706 = vmatprep.mubr.msk.f32.mxu0 %vm1707_vm0, %v7770_v61 }
 0x107   : > { %5484 = vmatmul.mubr.msk.f32.gmra.mrb[24].mxu1 %vm1707_vm0, %v7771_v5  ;;  %5707 = vmatmul.mubr.msk.f32.gmra.mrb[6].mxu0 %vm1707_vm0, %v7734_v20 }
 0x108   : > { %5486 = vmatprep.mubr.msk.f32.mxu1 %vm1707_vm0, %v6961_v45  ;;  %5709 = vmatprep.mubr.msk.f32.mxu0 %vm1707_vm0, %v7735_v58  ;;  %v7774_v58 = vld [vmem:[#allocation34_spill] sm:$0xff] }
 0x10b   : > { %5487 = vmatmul.mubr.msk.f32.gmra.mrb[26].mxu1 %vm1707_vm0, %v7772_v44  ;;  %5710 = vmatmul.mubr.msk.f32.gmra.mrb[8].mxu0 %vm1707_vm0, %v7736_v42 }
 0x10c   : > { %5489 = vmatprep.mubr.msk.f32.mxu1 %vm1707_vm0, %v7773_v24  ;;  %5712 = vmatprep.mubr.msk.f32.mxu0 %vm1707_vm0, %v7737_v10 }
 0x10f   : > { %5490 = vmatmul.mubr.msk.f32.gmra.mrb[28].mxu1 %vm1707_vm0, %v6988_v33  ;;  %5713 = vmatmul.mubr.msk.f32.gmra.mrb[10].mxu0 %vm1707_vm0, %v7738_v7 }
 0x110   : > { %5492 = vmatprep.mubr.msk.f32.mxu1 %vm1707_vm0, %v7061_v8  ;;  %5715 = vmatprep.mubr.msk.f32.mxu0 %vm1707_vm0, %v7739_v56  ;;  %v7360_v8 = vld [vmem:[%s7555_s4] ss:$0 sm:$0xff] }
 0x113   : > { %5493 = vmatmul.mubr.msk.f32.gmra.mrb[30].mxu1 %vm1707_vm0, %v7074_v53  ;;  %5716 = vmatmul.mubr.msk.f32.gmra.mrb[12].mxu0 %vm1707_vm0, %v6571_v0 }
 0x114   : > { %5521 = vmatprep.mubr.msk.f32.mxu1 %vm1707_vm0, %v7760_v31  ;;  %5718 = vmatprep.mubr.msk.f32.mxu0 %vm1707_vm0, %v7774_v58 }
 0x117   : > { %5522 = vmatmul.mubr.msk.f32.vlgmr.msra.gmra.mrb[16].mxu1 %vm1707_vm0, %v6341_v55  ;;  %5719 = vmatmul.mubr.msk.f32.gmra.mrb[14].mxu0 %vm1707_vm0, %v7775_v38  ;;  %v7777_v55 = vld [vmem:[#allocation43_spill] sm:$0xff] }
 0x118   : > { %5524 = vmatprep.mubr.msk.f32.mxu1 %vm1707_vm0, %v6347_v57  ;;  %5721 = vmatprep.mubr.msk.f32.mxu0 %vm1707_vm0, %v7776_v35  ;;  %v7778_v57 = vld [vmem:[#allocation9_spill] sm:$0xff] }
 0x11b   : > { %5525 = vmatmul.mubr.msk.f32.gmra.mrb[18].mxu1 %vm1707_vm0, %v6384_v18  ;;  %5722 = vmatmul.mubr.msk.f32.gmra.mrb[16].mxu0 %vm1707_vm0, %v7744_v43  ;;  %v729_v18 = vadd.s32 280, %v7778_v57 }
 0x11c   : > { %5527 = vmatprep.mubr.msk.f32.mxu1 %vm1707_vm0, %v6393_v25  ;;  %5724 = vmatprep.mubr.msk.f32.mxu0 %vm1707_vm0, %v7746_v4  ;;  %v7779_v25 = vld [vmem:[#allocation44_spill] sm:$0xff] }
 0x11f   : > { %5528 = vmatmul.mubr.msk.f32.gmra.mrb[20].mxu1 %vm1707_vm0, %v7762_v23  ;;  %5725 = vmatmul.mubr.msk.f32.gmra.mrb[18].mxu0 %vm1707_vm0, %v7748_v60 }
 0x120   : > { %5530 = vmatprep.mubr.msk.f32.mxu1 %vm1707_vm0, %v7763_v27  ;;  %5727 = vmatprep.mubr.msk.f32.mxu0 %vm1707_vm0, %v7750_v54 }
 0x123   : > { %5531 = vmatmul.mubr.msk.f32.gmra.mrb[22].mxu1 %vm1707_vm0, %v6451_v21  ;;  %5728 = vmatmul.mubr.msk.f32.gmra.mrb[20].mxu0 %vm1707_vm0, %v6725_v63  ;;  %v7781_v21 = vld [vmem:[#allocation45_spill] sm:$0xff] }
 0x124   : > { %5533 = vmatprep.mubr.msk.f32.mxu1 %vm1707_vm0, %v7764_v41  ;;  %5730 = vmatprep.mubr.msk.f32.mxu0 %vm1707_vm0, %v6735_v59  ;;  %v979_v59 = vand.u32 15, %v729_v18 }
 0x126   : > { %vm1595_vm12 = vcmp.eq.s32.totalorder %v979_v59, 15 }
 0x127   : > { %5534 = vmatmul.mubr.msk.f32.gmra.mrb[24].mxu1 %vm1707_vm0, %v6473_v52  ;;  %5731 = vmatmul.mubr.msk.f32.gmra.mrb[22].mxu0 %vm1707_vm0, %v6766_v9  ;;  %v1559_v52 = vsel %vm1451_vm1, %v7781_v21, 0.0  ;;  %vm4501_vm1 = vcmask 58368  }
 0x128   : > { %5536 = vmatprep.mubr.msk.f32.mxu1 %vm1707_vm0, %v7765_v36  ;;  %5733 = vmatprep.mubr.msk.f32.mxu0 %vm1707_vm0, %v7777_v55 }
 0x12b   : > { %5537 = vmatmul.mubr.msk.f32.gmra.mrb[26].mxu1 %vm1707_vm0, %v6504_v2  ;;  %5734 = vmatmul.mubr.msk.f32.gmra.mrb[24].mxu0 %vm1707_vm0, %v7779_v25  ;;  %v7780_v2 = vld [vmem:[#allocation46_spill] sm:$0xff] }
 0x12c   : > { %5539 = vmatprep.mubr.msk.f32.mxu1 %vm1707_vm0, %v6515_v22  ;;  %5736 = vmatprep.mubr.msk.f32.mxu0 %vm1707_vm0, %v6814_v40  ;;  %v7782_v22 = vld [vmem:[#allocation47_spill] sm:$0xff] }
 0x12f   : > { %5540 = vmatmul.mubr.msk.f32.gmra.mrb[28].mxu1 %vm1707_vm0, %v6537_v3  ;;  %5737 = vmatmul.mubr.msk.f32.gmra.mrb[26].mxu0 %vm1707_vm0, %v6844_v13  ;;  %v1703_v3 = vsel %vm1595_vm12, 0.0, %v1559_v52 }
 0x130   : > { %5542 = vmatprep.mubr.msk.f32.mxu1 %vm1707_vm0, %v6760_v39  ;;  %5739 = vmatprep.mubr.msk.f32.mxu0 %vm1707_vm0, %v7780_v2 }
 0x133   : > { %5543 = vmatmul.mubr.msk.f32.gmra.mrb[30].mxu1 %vm1707_vm0, %v6797_v50  ;;  %5740 = vmatmul.mubr.msk.f32.gmra.mrb[28].mxu0 %vm1707_vm0, %v7782_v22 }
 0x134   : > { %5742 = vmatprep.mubr.msk.f32.mxu0 %vm1707_vm0, %v7781_v21 }
 0x137   : > { %5743 = vmatmul.mubr.msk.f32.gmra.mrb[30].mxu0 %vm1707_vm0, %v1703_v3 }
 0x1aa   : > { %v5449_v0 = vpop.f32.mrb[0].mxu1 }
 0x1ab   : > { %v2747_v9 = vpop.f32.mrb[1].mxu1 }
 0x1ae   : > { %v5452_v63 = vpop.f32.mrb[2].mxu1 }
 0x1af   : > { %v2757_v39 = vpop.f32.mrb[3].mxu1 }
 0x1b2   : > { %v5455_v40 = vpop.f32.mrb[4].mxu1 }
 0x1b3   : > { %v2767_v34 = vpop.f32.mrb[5].mxu1 }
 0x1b6   : > { %v5458_v62 = vpop.f32.mrb[6].mxu1 }
 0x1b7   : > { %v2777_v13 = vpop.f32.mrb[7].mxu1 }
 0x1ba   : > { %v7341_v29 = vpop.f32.mrb[8].mxu1 }
 0x1bb   : > { %v7343_v50 = vpop.f32.mrb[9].mxu1 }
 0x1be   : > { %v7345_v1 = vpop.f32.mrb[10].mxu1 }
 0x1bf   : > { %v7347_v37 = vpop.f32.mrb[11].mxu1 }
 0x1c2   : > { %v7349_v15 = vpop.f32.mrb[12].mxu1 }
 0x1c3   : > { %v7351_v47 = vpop.f32.mrb[13].mxu1 }
 0x1c6   : > { %v7353_v19 = vpop.f32.mrb[14].mxu1 }
 0x1c7   : > { %v7355_v30 = vpop.f32.mrb[15].mxu1 }
 0x1ce   : > { %v5699_v32 = vpop.f32.mrb[0].mxu0 }
 0x1cf   : > { %v5747_v20 = vadd.f32 %v5699_v32, %v5449_v0  ;;  %v4068_v45 = vpop.f32.mrb[1].mxu0 }
 0x1d0   : > { %v5748_v7 = vadd.f32 %v4068_v45, %v2747_v9 }
 0x1d1   : > { %v4267_v53 = vadd.f32 %v5747_v20, %v7360_v8 }
 0x1d2   : > { %v4266_v33 = vadd.f32 %v5748_v7, %v7360_v8  ;;  %v5702_v26 = vpop.f32.mrb[2].mxu0 }
 0x1d3   : > { %4299 = vst.msk [vmem:[%s7367_s20 + $0x8] sm:$0xff] %vm1707_vm0, %v4267_v53  ;;  %v4331_v51 = vsel %vm1707_vm0, %v4267_v53, 0.0  ;;  %v4400_v48 = vmul.f32 %v4267_v53, %v4267_v53  ;;  %v5749_v6 = vadd.f32 %v5702_v26, %v5452_v63  ;;  %v4078_v17 = vpop.f32.mrb[3].mxu0 }
 0x1d4   : > { %4298 = vst.msk [vmem:[%s7367_s20] sm:$0xff] %vm1707_vm0, %v4266_v33  ;;  %v4330_v42 = vsel %vm1707_vm0, %v4266_v33, 0.0  ;;  %v4399_v10 = vmul.f32 %v4266_v33, %v4266_v33  ;;  %v5750_v56 = vadd.f32 %v4078_v17, %v2757_v39 }
 0x1d5   : > { %v4432_v54 = vsel %vm1707_vm0, %v4400_v48, 0.0  ;;  %v4332_v43 = vadd.f32 %v4331_v51, %v4330_v42  ;;  %v4269_v4 = vadd.f32 %v5749_v6, %v7360_v8 }
 0x1d6   : > { %v4431_v60 = vsel %vm1707_vm0, %v4399_v10, 0.0  ;;  %v4268_v49 = vadd.f32 %v5750_v56, %v7360_v8  ;;  %v5705_v28 = vpop.f32.mrb[4].mxu0 }
 0x1d7   : > { %v4433_v11 = vadd.f32 %v4432_v54, %v4431_v60  ;;  %4301 = vst.msk [vmem:[%s7367_s20 + $0x18] sm:$0xff] %vm1707_vm0, %v4269_v4  ;;  %v4402_v31 = vmul.f32 %v4269_v4, %v4269_v4  ;;  %v5751_v23 = vadd.f32 %v5705_v28, %v5455_v40  ;;  %v4088_v27 = vpop.f32.mrb[5].mxu0  ;;  %v4335_v16 = vsel %vm1707_vm0, %v4269_v4, 0.0 }
 0x1d8   : > { %4300 = vst.msk [vmem:[%s7367_s20 + $0x10] sm:$0xff] %vm1707_vm0, %v4268_v49  ;;  %v4333_v41 = vsel %vm1707_vm0, %v4268_v49, 0.0  ;;  %v4401_v36 = vmul.f32 %v4268_v49, %v4268_v49  ;;  %v5752_v14 = vadd.f32 %v4088_v27, %v2767_v34 }
 0x1d9   : > { %v4334_v46 = vadd.f32 %v4333_v41, %v4332_v43  ;;  %v4271_v12 = vadd.f32 %v5751_v23, %v7360_v8  ;;  %v4436_v24 = vsel %vm1707_vm0, %v4402_v31, 0.0 }
 0x1da   : > { %v4434_v61 = vsel %vm1707_vm0, %v4401_v36, 0.0  ;;  %v4270_v5 = vadd.f32 %v5752_v14, %v7360_v8  ;;  %v5708_v44 = vpop.f32.mrb[6].mxu0 }
 0x1db   : > { %v4435_v58 = vadd.f32 %v4434_v61, %v4433_v11  ;;  %4303 = vst.msk [vmem:[%s7367_s20 + $0x28] sm:$0xff] %vm1707_vm0, %v4271_v12  ;;  %v4404_v38 = vmul.f32 %v4271_v12, %v4271_v12  ;;  %v4336_v35 = vadd.f32 %v4335_v16, %v4334_v46  ;;  %v4098_v55 = vpop.f32.mrb[7].mxu0  ;;  %v5753_v25 = vadd.f32 %v5708_v44, %v5458_v62 }
 0x1dc   : > { %4302 = vst.msk [vmem:[%s7367_s20 + $0x20] sm:$0xff] %vm1707_vm0, %v4270_v5  ;;  %v4337_v57 = vsel %vm1707_vm0, %v4270_v5, 0.0  ;;  %v4403_v18 = vmul.f32 %v4270_v5, %v4270_v5  ;;  %v5754_v59 = vadd.f32 %v4098_v55, %v2777_v13  ;;  %v4339_v52 = vsel %vm1707_vm0, %v4271_v12, 0.0 }
 0x1dd   : > { %v4338_v2 = vadd.f32 %v4337_v57, %v4336_v35  ;;  %v4437_v21 = vadd.f32 %v4436_v24, %v4435_v58  ;;  %v4273_v3 = vadd.f32 %v5753_v25, %v7360_v8  ;;  %v4440_v62 = vsel %vm1707_vm0, %v4404_v38, 0.0 }
 0x1de   : > { %v4438_v22 = vsel %vm1707_vm0, %v4403_v18, 0.0  ;;  %v4272_v0 = vadd.f32 %v5754_v59, %v7360_v8  ;;  %v5711_v9 = vpop.f32.mrb[8].mxu0 }
 0x1df   : > { %v4439_v63 = vadd.f32 %v4438_v22, %v4437_v21  ;;  %v4340_v39 = vadd.f32 %v4339_v52, %v4338_v2  ;;  %v5755_v40 = vadd.f32 %v5711_v9, %v7341_v29  ;;  %v4108_v34 = vpop.f32.mrb[9].mxu0  ;;  %4305 = vst.msk [vmem:[%s7367_s20 + $0x38] sm:$0xff] %vm1707_vm0, %v4273_v3  ;;  %v4406_v13 = vmul.f32 %v4273_v3, %v4273_v3 }
 0x1e0   : > { %4304 = vst.msk [vmem:[%s7367_s20 + $0x30] sm:$0xff] %vm1707_vm0, %v4272_v0  ;;  %v4341_v32 = vsel %vm1707_vm0, %v4272_v0, 0.0  ;;  %v4405_v20 = vmul.f32 %v4272_v0, %v4272_v0  ;;  %v5756_v33 = vadd.f32 %v4108_v34, %v7343_v50  ;;  %v4343_v51 = vsel %vm1707_vm0, %v4273_v3, 0.0 }
 0x1e1   : > { %v4342_v45 = vadd.f32 %v4341_v32, %v4340_v39  ;;  %v4441_v7 = vadd.f32 %v4440_v62, %v4439_v63  ;;  %v4275_v53 = vadd.f32 %v5755_v40, %v7360_v8  ;;  %v4444_v48 = vsel %vm1707_vm0, %v4406_v13, 0.0 }
 0x1e2   : > { %v4442_v29 = vsel %vm1707_vm0, %v4405_v20, 0.0  ;;  %v5714_v26 = vpop.f32.mrb[10].mxu0  ;;  %v4274_v17 = vadd.f32 %v5756_v33, %v7360_v8 }
 0x1e3   : > { %v4443_v6 = vadd.f32 %v4442_v29, %v4441_v7  ;;  %4307 = vst.msk [vmem:[%s7367_s20 + $0x48] sm:$0xff] %vm1707_vm0, %v4275_v53  ;;  %v4118_v42 = vpop.f32.mrb[11].mxu0  ;;  %v4408_v10 = vmul.f32 %v4275_v53, %v4275_v53  ;;  %v4344_v56 = vadd.f32 %v4343_v51, %v4342_v45  ;;  %v5757_v54 = vadd.f32 %v5714_v26, %v7345_v1 }
 0x1e4   : > { %v5758_v50 = vadd.f32 %v4118_v42, %v7347_v37  ;;  %4306 = vst.msk [vmem:[%s7367_s20 + $0x40] sm:$0xff] %vm1707_vm0, %v4274_v17  ;;  %v4345_v43 = vsel %vm1707_vm0, %v4274_v17, 0.0  ;;  %v4407_v4 = vmul.f32 %v4274_v17, %v4274_v17  ;;  %v4347_v23 = vsel %vm1707_vm0, %v4275_v53, 0.0 }
 0x1e5   : > { %v4445_v60 = vadd.f32 %v4444_v48, %v4443_v6  ;;  %v4346_v49 = vadd.f32 %v4345_v43, %v4344_v56  ;;  %v4277_v28 = vadd.f32 %v5757_v54, %v7360_v8  ;;  %v4448_v41 = vsel %vm1707_vm0, %v4408_v10, 0.0 }
 0x1e6   : > { %v4276_v11 = vadd.f32 %v5758_v50, %v7360_v8  ;;  %v5717_v31 = vpop.f32.mrb[12].mxu0  ;;  %v4446_v1 = vsel %vm1707_vm0, %v4407_v4, 0.0 }
 0x1e7   : > { %v5759_v27 = vadd.f32 %v5717_v31, %v7349_v15  ;;  %v4128_v37 = vpop.f32.mrb[13].mxu0  ;;  %v4447_v36 = vadd.f32 %v4446_v1, %v4445_v60  ;;  %4309 = vst.msk [vmem:[%s7367_s20 + $0x58] sm:$0xff] %vm1707_vm0, %v4277_v28  ;;  %v4410_v14 = vmul.f32 %v4277_v28, %v4277_v28  ;;  %v4348_v46 = vadd.f32 %v4347_v23, %v4346_v49 }
 0x1e8   : > { %4308 = vst.msk [vmem:[%s7367_s20 + $0x50] sm:$0xff] %vm1707_vm0, %v4276_v11  ;;  %v4349_v12 = vsel %vm1707_vm0, %v4276_v11, 0.0  ;;  %v4409_v16 = vmul.f32 %v4276_v11, %v4276_v11  ;;  %v5760_v5 = vadd.f32 %v4128_v37, %v7351_v47  ;;  %v4351_v38 = vsel %vm1707_vm0, %v4277_v28, 0.0 }
 0x1e9   : > { %v4279_v61 = vadd.f32 %v5759_v27, %v7360_v8  ;;  %v4350_v44 = vadd.f32 %v4349_v12, %v4348_v46  ;;  %v4449_v15 = vadd.f32 %v4448_v41, %v4447_v36  ;;  %v4452_v52 = vsel %vm1707_vm0, %v4410_v14, 0.0 }
 0x1ea   : > { %v5523_v24 = vpop.f32.mrb[16].mxu1  ;;  %v5720_v58 = vpop.f32.mrb[14].mxu0  ;;  %v4450_v35 = vsel %vm1707_vm0, %v4409_v16, 0.0  ;;  %v4278_v57 = vadd.f32 %v5760_v5, %v7360_v8 }
 0x1eb   : > { %4311 = vst.msk [vmem:[%s7367_s20 + $0x68] sm:$0xff] %vm1707_vm0, %v4279_v61  ;;  %v4412_v55 = vmul.f32 %v4279_v61, %v4279_v61  ;;  %v3090_v18 = vpop.f32.mrb[17].mxu1  ;;  %v4138_v25 = vpop.f32.mrb[15].mxu0  ;;  %v4451_v59 = vadd.f32 %v4450_v35, %v4449_v15  ;;  %v4352_v2 = vadd.f32 %v4351_v38, %v4350_v44  ;;  %v5761_v47 = vadd.f32 %v5720_v58, %v7353_v19 }
 0x1ec   : > { %v5762_v21 = vadd.f32 %v4138_v25, %v7355_v30  ;;  %4310 = vst.msk [vmem:[%s7367_s20 + $0x60] sm:$0xff] %vm1707_vm0, %v4278_v57  ;;  %v4353_v22 = vsel %vm1707_vm0, %v4278_v57, 0.0  ;;  %v4411_v3 = vmul.f32 %v4278_v57, %v4278_v57  ;;  %v4355_v19 = vsel %vm1707_vm0, %v4279_v61, 0.0 }
 0x1ed   : > { %v4354_v0 = vadd.f32 %v4353_v22, %v4352_v2  ;;  %v4453_v9 = vadd.f32 %v4452_v52, %v4451_v59  ;;  %v4281_v63 = vadd.f32 %v5761_v47, %v7360_v8  ;;  %v4456_v20 = vsel %vm1707_vm0, %v4412_v55, 0.0 }
 0x1ee   : > { %v4280_v39 = vadd.f32 %v5762_v21, %v7360_v8  ;;  %v5526_v40 = vpop.f32.mrb[18].mxu1  ;;  %v5723_v34 = vpop.f32.mrb[16].mxu0  ;;  %v4454_v30 = vsel %vm1707_vm0, %v4411_v3, 0.0 }
 0x1ef   : > { %v5763_v62 = vadd.f32 %v5723_v34, %v5523_v24  ;;  %v3100_v13 = vpop.f32.mrb[19].mxu1  ;;  %v4148_v32 = vpop.f32.mrb[17].mxu0  ;;  %v4455_v45 = vadd.f32 %v4454_v30, %v4453_v9  ;;  %4313 = vst.msk [vmem:[%s7367_s20 + $0x78] sm:$0xff] %vm1707_vm0, %v4281_v63  ;;  %v4414_v7 = vmul.f32 %v4281_v63, %v4281_v63  ;;  %v4356_v53 = vadd.f32 %v4355_v19, %v4354_v0 }
 0x1f0   : > { %4312 = vst.msk [vmem:[%s7367_s20 + $0x70] sm:$0xff] %vm1707_vm0, %v4280_v39  ;;  %v4357_v33 = vsel %vm1707_vm0, %v4280_v39, 0.0  ;;  %v4413_v29 = vmul.f32 %v4280_v39, %v4280_v39  ;;  %v5764_v51 = vadd.f32 %v4148_v32, %v3090_v18  ;;  %v4359_v10 = vsel %vm1707_vm0, %v4281_v63, 0.0 }
 0x1f1   : > { %v4283_v26 = vadd.f32 %v5763_v62, %v7360_v8  ;;  %v4358_v48 = vadd.f32 %v4357_v33, %v4356_v53  ;;  %v4457_v6 = vadd.f32 %v4456_v20, %v4455_v45  ;;  %v4460_v31 = vsel %vm1707_vm0, %v4414_v7, 0.0 }
 0x1f2   : > { %v5529_v17 = vpop.f32.mrb[20].mxu1  ;;  %v5726_v42 = vpop.f32.mrb[18].mxu0  ;;  %v4458_v56 = vsel %vm1707_vm0, %v4413_v29, 0.0  ;;  %v4282_v50 = vadd.f32 %v5764_v51, %v7360_v8 }
 0x1f3   : > { %4315 = vst.msk [vmem:[%s7367_s20 + $0x88] sm:$0xff] %vm1707_vm0, %v4283_v26  ;;  %v4416_v54 = vmul.f32 %v4283_v26, %v4283_v26  ;;  %v3110_v43 = vpop.f32.mrb[21].mxu1  ;;  %v4158_v4 = vpop.f32.mrb[19].mxu0  ;;  %v4459_v60 = vadd.f32 %v4458_v56, %v4457_v6  ;;  %v4360_v49 = vadd.f32 %v4359_v10, %v4358_v48  ;;  %v5765_v28 = vadd.f32 %v5726_v42, %v5526_v40 }
 0x1f4   : > { %v5766_v11 = vadd.f32 %v4158_v4, %v3100_v13  ;;  %4314 = vst.msk [vmem:[%s7367_s20 + $0x80] sm:$0xff] %vm1707_vm0, %v4282_v50  ;;  %v4361_v23 = vsel %vm1707_vm0, %v4282_v50, 0.0  ;;  %v4415_v1 = vmul.f32 %v4282_v50, %v4282_v50  ;;  %v4363_v12 = vsel %vm1707_vm0, %v4283_v26, 0.0 }
 0x1f5   : > { %v4362_v27 = vadd.f32 %v4361_v23, %v4360_v49  ;;  %v4461_v37 = vadd.f32 %v4460_v31, %v4459_v60  ;;  %v4285_v41 = vadd.f32 %v5765_v28, %v7360_v8  ;;  %v4464_v15 = vsel %vm1707_vm0, %v4416_v54, 0.0 }
 0x1f6   : > { %v4284_v36 = vadd.f32 %v5766_v11, %v7360_v8  ;;  %v5532_v14 = vpop.f32.mrb[22].mxu1  ;;  %v5729_v46 = vpop.f32.mrb[20].mxu0  ;;  %v4462_v16 = vsel %vm1707_vm0, %v4415_v1, 0.0 }
 0x1f7   : > { %v5767_v61 = vadd.f32 %v5729_v46, %v5529_v17  ;;  %v3120_v5 = vpop.f32.mrb[23].mxu1  ;;  %v4168_v44 = vpop.f32.mrb[21].mxu0  ;;  %v4463_v24 = vadd.f32 %v4462_v16, %v4461_v37  ;;  %4317 = vst.msk [vmem:[%s7367_s20 + $0x98] sm:$0xff] %vm1707_vm0, %v4285_v41  ;;  %v4418_v58 = vmul.f32 %v4285_v41, %v4285_v41  ;;  %v4364_v38 = vadd.f32 %v4363_v12, %v4362_v27 }
 0x1f8   : > { %4316 = vst.msk [vmem:[%s7367_s20 + $0x90] sm:$0xff] %vm1707_vm0, %v4284_v36  ;;  %v4365_v35 = vsel %vm1707_vm0, %v4284_v36, 0.0  ;;  %v4417_v55 = vmul.f32 %v4284_v36, %v4284_v36  ;;  %v5768_v18 = vadd.f32 %v4168_v44, %v3110_v43  ;;  %v4367_v21 = vsel %vm1707_vm0, %v4285_v41, 0.0 }
 0x1f9   : > { %v4287_v57 = vadd.f32 %v5767_v61, %v7360_v8  ;;  %v4366_v25 = vadd.f32 %v4365_v35, %v4364_v38  ;;  %v4465_v59 = vadd.f32 %v4464_v15, %v4463_v24  ;;  %v4468_v19 = vsel %vm1707_vm0, %v4418_v58, 0.0 }
 0x1fa   : > { %v5535_v2 = vpop.f32.mrb[24].mxu1  ;;  %v5732_v47 = vpop.f32.mrb[22].mxu0  ;;  %v4466_v52 = vsel %vm1707_vm0, %v4417_v55, 0.0  ;;  %v4286_v3 = vadd.f32 %v5768_v18, %v7360_v8 }
 0x1fb   : > { %4319 = vst.msk [vmem:[%s7367_s20 + $0xa8] sm:$0xff] %vm1707_vm0, %v4287_v57  ;;  %v4420_v22 = vmul.f32 %v4287_v57, %v4287_v57  ;;  %v3130_v0 = vpop.f32.mrb[25].mxu1  ;;  %v4178_v9 = vpop.f32.mrb[23].mxu0  ;;  %v4467_v63 = vadd.f32 %v4466_v52, %v4465_v59  ;;  %v4368_v39 = vadd.f32 %v4367_v21, %v4366_v25  ;;  %v5769_v40 = vadd.f32 %v5732_v47, %v5532_v14 }
 0x1fc   : > { %v5770_v34 = vadd.f32 %v4178_v9, %v3120_v5  ;;  %4318 = vst.msk [vmem:[%s7367_s20 + $0xa0] sm:$0xff] %vm1707_vm0, %v4286_v3  ;;  %v4369_v30 = vsel %vm1707_vm0, %v4286_v3, 0.0  ;;  %v4419_v62 = vmul.f32 %v4286_v3, %v4286_v3  ;;  %v4371_v33 = vsel %vm1707_vm0, %v4287_v57, 0.0 }
 0x1fd   : > { %v4370_v13 = vadd.f32 %v4369_v30, %v4368_v39  ;;  %v4469_v32 = vadd.f32 %v4468_v19, %v4467_v63  ;;  %v4289_v20 = vadd.f32 %v5769_v40, %v7360_v8  ;;  %v4472_v6 = vsel %vm1707_vm0, %v4420_v22, 0.0 }
 0x1fe   : > { %v4288_v45 = vadd.f32 %v5770_v34, %v7360_v8  ;;  %v5538_v7 = vpop.f32.mrb[26].mxu1  ;;  %v5735_v53 = vpop.f32.mrb[24].mxu0  ;;  %v4470_v29 = vsel %vm1707_vm0, %v4419_v62, 0.0 }
 0x1ff   : > { %v5771_v26 = vadd.f32 %v5735_v53, %v5535_v2  ;;  %v3140_v51 = vpop.f32.mrb[27].mxu1  ;;  %v4188_v48 = vpop.f32.mrb[25].mxu0  ;;  %v4471_v17 = vadd.f32 %v4470_v29, %v4469_v32  ;;  %4321 = vst.msk [vmem:[%s7367_s20 + $0xb8] sm:$0xff] %vm1707_vm0, %v4289_v20  ;;  %v4422_v42 = vmul.f32 %v4289_v20, %v4289_v20  ;;  %v4372_v10 = vadd.f32 %v4371_v33, %v4370_v13 }
 0x200   : > { %4320 = vst.msk [vmem:[%s7367_s20 + $0xb0] sm:$0xff] %vm1707_vm0, %v4288_v45  ;;  %v4373_v56 = vsel %vm1707_vm0, %v4288_v45, 0.0  ;;  %v4421_v54 = vmul.f32 %v4288_v45, %v4288_v45  ;;  %v5772_v43 = vadd.f32 %v4188_v48, %v3130_v0  ;;  %v4375_v11 = vsel %vm1707_vm0, %v4289_v20, 0.0 }
 0x201   : > { %v4291_v50 = vadd.f32 %v5771_v26, %v7360_v8  ;;  %v4374_v4 = vadd.f32 %v4373_v56, %v4372_v10  ;;  %v4473_v60 = vadd.f32 %v4472_v6, %v4471_v17  ;;  %v4476_v12 = vsel %vm1707_vm0, %v4422_v42, 0.0 }
 0x202   : > { %v5541_v49 = vpop.f32.mrb[28].mxu1  ;;  %v5738_v28 = vpop.f32.mrb[26].mxu0  ;;  %v4474_v31 = vsel %vm1707_vm0, %v4421_v54, 0.0  ;;  %v4290_v1 = vadd.f32 %v5772_v43, %v7360_v8 }
 0x203   : > { %4323 = vst.msk [vmem:[%s7367_s20 + $0xc8] sm:$0xff] %vm1707_vm0, %v4291_v50  ;;  %v4424_v23 = vmul.f32 %v4291_v50, %v4291_v50  ;;  %v3150_v27 = vpop.f32.mrb[29].mxu1  ;;  %v4198_v37 = vpop.f32.mrb[27].mxu0  ;;  %v4475_v41 = vadd.f32 %v4474_v31, %v4473_v60  ;;  %v4376_v36 = vadd.f32 %v4375_v11, %v4374_v4  ;;  %v5773_v14 = vadd.f32 %v5738_v28, %v5538_v7 }
 0x204   : > { %v5774_v46 = vadd.f32 %v4198_v37, %v3140_v51  ;;  %4322 = vst.msk [vmem:[%s7367_s20 + $0xc0] sm:$0xff] %vm1707_vm0, %v4290_v1  ;;  %v4377_v16 = vsel %vm1707_vm0, %v4290_v1, 0.0  ;;  %v4423_v61 = vmul.f32 %v4290_v1, %v4290_v1  ;;  %v4379_v35 = vsel %vm1707_vm0, %v4291_v50, 0.0 }
 0x205   : > { %v4378_v5 = vadd.f32 %v4377_v16, %v4376_v36  ;;  %v4477_v44 = vadd.f32 %v4476_v12, %v4475_v41  ;;  %v4293_v15 = vadd.f32 %v5773_v14, %v7360_v8  ;;  %v4480_v59 = vsel %vm1707_vm0, %v4424_v23, 0.0 }
 0x206   : > { %v4292_v24 = vadd.f32 %v5774_v46, %v7360_v8  ;;  %v5544_v58 = vpop.f32.mrb[30].mxu1  ;;  %v5741_v38 = vpop.f32.mrb[28].mxu0  ;;  %v4478_v55 = vsel %vm1707_vm0, %v4423_v61, 0.0 }
 0x207   : > { %v5775_v57 = vadd.f32 %v5741_v38, %v5541_v49  ;;  %v3160_v18 = vpop.f32.mrb[31].mxu1  ;;  %v4208_v25 = vpop.f32.mrb[29].mxu0  ;;  %v4479_v2 = vadd.f32 %v4478_v55, %v4477_v44  ;;  %4325 = vst.msk [vmem:[%s7367_s20 + $0xd8] sm:$0xff] %vm1707_vm0, %v4293_v15  ;;  %v4426_v47 = vmul.f32 %v4293_v15, %v4293_v15  ;;  %v4380_v21 = vadd.f32 %v4379_v35, %v4378_v5 }
 0x208   : > { %4324 = vst.msk [vmem:[%s7367_s20 + $0xd0] sm:$0xff] %vm1707_vm0, %v4292_v24  ;;  %v4381_v52 = vsel %vm1707_vm0, %v4292_v24, 0.0  ;;  %v4425_v22 = vmul.f32 %v4292_v24, %v4292_v24  ;;  %v5776_v0 = vadd.f32 %v4208_v25, %v3150_v27  ;;  %v4383_v40 = vsel %vm1707_vm0, %v4293_v15, 0.0 }
 0x209   : > { %v4295_v3 = vadd.f32 %v5775_v57, %v7360_v8  ;;  %v4382_v9 = vadd.f32 %v4381_v52, %v4380_v21  ;;  %v4481_v63 = vadd.f32 %v4480_v59, %v4479_v2  ;;  %v4484_v45 = vsel %vm1707_vm0, %v4426_v47, 0.0 }
 0x20a   : > { %v5744_v39 = vpop.f32.mrb[30].mxu0  ;;  %v4482_v34 = vsel %vm1707_vm0, %v4425_v22, 0.0  ;;  %v4294_v19 = vadd.f32 %v5776_v0, %v7360_v8 }
 0x20b   : > { %4327 = vst.msk [vmem:[%s7367_s20 + $0xe8] sm:$0xff] %vm1707_vm0, %v4295_v3  ;;  %v4218_v30 = vpop.f32.mrb[31].mxu0  ;;  %v4483_v62 = vadd.f32 %v4482_v34, %v4481_v63  ;;  %v4384_v13 = vadd.f32 %v4383_v40, %v4382_v9  ;;  %v5777_v32 = vadd.f32 %v5744_v39, %v5544_v58  ;;  %v4428_v7 = vmul.f32 %v4295_v3, %v4295_v3 }
 0x20c   : > { %v5778_v20 = vadd.f32 %v4218_v30, %v3160_v18  ;;  %4326 = vst.msk [vmem:[%s7367_s20 + $0xe0] sm:$0xff] %vm1707_vm0, %v4294_v19  ;;  %v4385_v53 = vsel %vm1707_vm0, %v4294_v19, 0.0  ;;  %v4427_v33 = vmul.f32 %v4294_v19, %v4294_v19  ;;  %v4387_v6 = vsel %vm1707_vm0, %v4295_v3, 0.0 }
 0x20d   : > { %v4386_v29 = vadd.f32 %v4385_v53, %v4384_v13  ;;  %v4485_v26 = vadd.f32 %v4484_v45, %v4483_v62  ;;  %v4297_v51 = vadd.f32 %v5777_v32, %v7360_v8  ;;  %v4488_v56 = vsel %vm1707_vm0, %v4428_v7, 0.0 }
 0x20e   : > { %v4296_v48 = vadd.f32 %v5778_v20, %v7360_v8  ;;  %v4486_v17 = vsel %vm1707_vm0, %v4427_v33, 0.0 }
 0x20f   : > { %v4487_v42 = vadd.f32 %v4486_v17, %v4485_v26  ;;  %4329 = vst.msk [vmem:[%s7367_s20 + $0xf8] sm:$0xff] %vm1707_vm0, %v4297_v51  ;;  %v4388_v10 = vadd.f32 %v4387_v6, %v4386_v29  ;;  %v4430_v54 = vmul.f32 %v4297_v51, %v4297_v51  ;;  %v4391_v8 = vsel %vm1707_vm0, %v4297_v51, 0.0 }
 0x210   : > { %4328 = vst.msk [vmem:[%s7367_s20 + $0xf0] sm:$0xff] %vm1707_vm0, %v4296_v48  ;;  %v4389_v50 = vsel %vm1707_vm0, %v4296_v48, 0.0  ;;  %v4429_v43 = vmul.f32 %v4296_v48, %v4296_v48 }
 0x211   : > { %v4390_v4 = vadd.f32 %v4389_v50, %v4388_v10  ;;  %v4489_v60 = vadd.f32 %v4488_v56, %v4487_v42  ;;  %v4492_v31 = vsel %vm1707_vm0, %v4430_v54, 0.0 }
 0x212   : > { %v4490_v49 = vsel %vm1707_vm0, %v4429_v43, 0.0 }
 0x213   : > { %v4392_v28 = vadd.f32 %v4391_v8, %v4390_v4  ;;  %v4491_v11 = vadd.f32 %v4490_v49, %v4489_v60 }
 0x215   : > { %v4393_v23 = vrot.slane %v4392_v28, 4  ;;  %v4493_v1 = vadd.f32 %v4492_v31, %v4491_v11 }
 0x217   : > { %v4394_v27 = vadd.f32 %v4393_v23, %v4392_v28  ;;  %v4494_v37 = vrot.slane %v4493_v1, 4 }
 0x219   : > { %v4395_v41 = vrot.slane %v4394_v27, 2  ;;  %v4495_v36 = vadd.f32 %v4494_v37, %v4493_v1 }
 0x21b   : > { %v4396_v14 = vadd.f32 %v4395_v41, %v4394_v27  ;;  %v4496_v46 = vrot.slane %v4495_v36, 2 }
 0x21d   : > { %v4397_v12 = vrot.slane %v4396_v14, 1  ;;  %v4497_v16 = vadd.f32 %v4496_v46, %v4495_v36 }
 0x21f   : > { %v4498_v61 = vrot.slane %v4497_v16, 1  ;;  %v4398_v5 = vadd.f32 %v4397_v12, %v4396_v14 }
 0x221   : > { %v4499_v44 = vadd.f32 %v4498_v61, %v4497_v16 }
 0x223   : > { %v4500_v15 = vsel %vm1198_vm6, %v4398_v5, %v4499_v44 }
 0x224   : > { %4502 = vst.msk [vmem:[%s492_s23] sm:$0x3] %vm4501_vm1, %v4500_v15 }
 0x225 PF: > { %s19_s27 = sadd.s32 1, %s6051_s27   ;;  %s7783_s26 = smov %s6047_s2 }
 0x226   : > { %p16_p5 = scmp.ge.s32.totalorder %s19_s27, 4   ;;  %s7784_s2 = smov %s7786_s28 }
 0x228   :  { %18 = sbr.rel (!%p16_p5) target bundleno = 2 (0x2), region = 104 }

// kernel: double_conv_forward.3
= control target key start
LH: loop header
LB: loop body
LE: loop exit
PB: predicated region body
PF: predicated region fallthrough
CT: control target
= control target key end

     0   :  { %s6014_s26 = smov 0   ;;  %s6016_s2 = smov 0   ;;  %s7341_s0 = inlined_call_operand.vmem [shape: f32[2,16,16,4], index: 0, kind: input, shape index: {}, may-alias: {0,1,2}]   ;;  %s7342_s1 = inlined_call_operand.vmem [shape: f32[2,16,16,4], index: 1, kind: input, shape index: {}, may-alias: {0,1,2}]   ;;  %s7343_s2 = inlined_call_operand.vmem [shape: f32[2,16,16,4], index: 2, kind: input, shape index: {}, may-alias: {0,1,2}]   ;;  %s7344_s3 = inlined_call_operand.vmem [shape: f32[9,4,8], index: 3, kind: input, shape index: {}]   ;;  %s7345_s4 = inlined_call_operand.vmem [shape: f32[1,8], index: 4, kind: input, shape index: {}]   ;;  %s7346_s5 = inlined_call_operand.vmem [shape: f32[1,4], index: 5, kind: input, shape index: {}]   ;;  %s7347_s6 = inlined_call_operand.vmem [shape: f32[1,4], index: 6, kind: input, shape index: {}]   ;;  %s7348_s7 = inlined_call_operand.vmem [shape: f32[2,16,16,8], index: 7, kind: output, shape index: {0}]   ;;  %s7349_s8 = inlined_call_operand.vmem [shape: f32[2,1,2,8], index: 8, kind: output, shape index: {1}]  }
   0x1   :  { %s6018_s27 = smov 0  }
   0x2 LB: > { %s31_s5 = sadd.s32 1, %s5962_s2  ;;  %p4593_p0 = scmp.ge.s32.totalorder %s5966_s27, 1  ;;  %s5966_s27 = sphi %s6018_s27, %s19_s27   ;;  %s5962_s2 = sphi %s6016_s2, %s7543_s2   ;;  %s5958_s26 = sphi %s6014_s26, %s7542_s26  }
   0x3   : > { %p33_p1 = scmp.ge.s32.totalorder %s31_s5, 2  ;;  %p353_p2 = scmp.lt.s32.totalorder %s5966_s27, 3 }
   0x5   : > { %s7545_s5 = smov (%p33_p1, %s31_s5), 0  ;;  %p354_p3 = pnand %p4593_p0, %p353_p2 }
   0x7   : > { %357 = sbr.rel (%p354_p3) target bundleno = 544 (0x220), region = 48 }
   0xe   : > { %v4603_v0 = vld [vmem:[%s7344_s3 + $0x4] sm:$0xf]  ;;  %vm1650_vm0 = vcmask 1043456   ;;  %v6038_v1 = vld [vmem:[%s7344_s3 + $0x10] sm:$0xf]  ;;  %v7351_v2 = vmov 0.0   ;;  %v571_v15 = vlaneseq }
   0xf   : > { %5209 = vmatprep.subr.msk.mxu1 %vm1650_vm0, %v4603_v0  ;;  %5211 = vmatprep.mubr.f32.mxu1 %v7351_v2  ;;  %p448_p4 = scmp.lt.s32.totalorder %s5958_s26, 1  ;;  %v1582_v3 = vld [vmem:[%s7344_s3] sm:$0xf]  ;;  %v4770_v4 = vld [vmem:[%s7344_s3 + $0x14] sm:$0xf]  ;;  %vm1585_vm1 = vcmask 31744  }
  0x10   : > { %5210 = vmatpush3.msk.msra.mxu1 %vm1650_vm0, %v4603_v0  ;;  %5409 = vmatprep.subr.msk.mxu0 %vm1650_vm0, %v6038_v1  ;;  %v6059_v5 = vld [vmem:[%s7344_s3 + $0x8] sm:$0xf]  ;;  %v6090_v9 = vld [vmem:[%s7344_s3 + $0x18] sm:$0xf]  ;;  %v6148_v18 = vshrl.u32 %v571_v15, 7  ;;  %vm1329_vm2 = vcmask 1046528  }
  0x11   : > { %5212 = vmatmul.mubr.f32.vlgmr.msra.gmra.mrb[0].mxu1 %v7351_v2  ;;  %5410 = vmatpush3.msk.msra.mxu0 %vm1650_vm0, %v6038_v1  ;;  %s7547_s26 = smov (!%p448_p4, %s5958_s26), 1  ;;  %v6235_v47 = vld [vmem:[%s7344_s3 + $0x1c] sm:$0xf]  ;;  %vm1076_vm9 = vcmask 1040384  }
  0x12   : > { %5259 = vmatprep.subr.msk.mxu1 %vm1650_vm0, %v1582_v3  ;;  %5459 = vmatprep.subr.msk.mxu0 %vm1650_vm0, %v4770_v4  ;;  %s4908_s15 = sshll.u32 %s7547_s26, 8  ;;  %7433 = vst [vmem:[#allocation10_spill] sm:$0xff] %v6148_v18  ;;  %v575_v21 = vadd.s32 24, %v6148_v18  ;;  %v577_v25 = vadd.s32 40, %v6148_v18  ;;  %v579_v32 = vadd.s32 56, %v6148_v18  ;;  %v581_v41 = vadd.s32 72, %v6148_v18 }
  0x13   : > { %5260 = vmatpush3.msk.msra.mxu1 %vm1650_vm0, %v1582_v3  ;;  %s6070_s18 = scalar_lea.vmem %s7342_s1, %s4908_s15  ;;  %v583_v51 = vadd.s32 88, %v6148_v18  ;;  %v585_v60 = vadd.s32 104, %v6148_v18  ;;  %s7157_s11 = scalar_lea.vmem %s7348_s7, %s4908_s15 }
  0x14   : > { %5309 = vmatprep.subr.msk.mxu1 %vm1650_vm0, %v6059_v5  ;;  %v6075_v6 = vld [vmem:[%s6070_s18] sm:$0xff]  ;;  %v6078_v7 = vld [vmem:[%s6070_s18 + $0x8] sm:$0xff]  ;;  %v6081_v8 = vld [vmem:[%s6070_s18 + $0x10] sm:$0xff]  ;;  %v633_v24 = vand.u32 15, %v575_v21  ;;  %v647_v31 = vand.u32 15, %v577_v25  ;;  %v661_v40 = vand.u32 15, %v579_v32 }
  0x15   : > { %7425 = vst [vmem:[#allocation2_spill] sm:$0xff] %v6081_v8  ;;  %5214 = vmatprep.mubr.msk.f32.mxu1 %vm1585_vm1, %v6075_v6  ;;  %5411 = vmatprep.mubr.msk.f32.mxu0 %vm1585_vm1, %v6075_v6  ;;  %v6100_v10 = vld [vmem:[%s6070_s18 + $0x18] sm:$0xff]  ;;  %v6105_v11 = vld [vmem:[%s6070_s18 + $0x20] sm:$0xff]  ;;  %v6118_v12 = vld [vmem:[%s6070_s18 + $0x28] sm:$0xff]  ;;  %v7350_v26 = vrot.slane %v6075_v6, 1  ;;  %v1335_v27 = vrot.slane %v6078_v7, 1 }
  0x16   : > { %5215 = vmatmul.mubr.msk.f32.gmra.mrb[2].mxu1 %vm1585_vm1, %v6078_v7  ;;  %5412 = vmatmul.mubr.msk.f32.vlgmr.msra.gmra.mrb[0].mxu0 %vm1585_vm1, %v6078_v7  ;;  %7426 = vst [vmem:[#allocation3_spill] sm:$0xff] %v6100_v10  ;;  %7427 = vst [vmem:[#allocation4_spill] sm:$0xff] %v6105_v11  ;;  %v6121_v13 = vld [vmem:[%s6070_s18 + $0x30] sm:$0xff]  ;;  %v6132_v14 = vld [vmem:[%s6070_s18 + $0x38] sm:$0xff]  ;;  %v1337_v28 = vrot.slane %v6081_v8, 1  ;;  %vm1441_vm3 = vcmp.eq.s32.totalorder %v633_v24, 15 }
  0x17   : > { %5460 = vmatpush3.msk.msra.mxu0 %vm1650_vm0, %v4770_v4  ;;  %5217 = vmatprep.mubr.msk.f32.mxu1 %vm1585_vm1, %v6081_v8  ;;  %7428 = vst [vmem:[#allocation5_spill] sm:$0xff] %v6118_v12  ;;  %7429 = vst [vmem:[#allocation6_spill] sm:$0xff] %v6121_v13  ;;  %v6135_v16 = vld [vmem:[%s6070_s18 + $0x40] sm:$0xff]  ;;  %v6146_v17 = vld [vmem:[%s6070_s18 + $0x48] sm:$0xff]  ;;  %v6204_v34 = vsel %vm1329_vm2, %v7350_v26, %v1335_v27  ;;  %v1339_v36 = vrot.slane %v6100_v10, 1  ;;  %v1341_v37 = vrot.slane %v6105_v11, 1 }
  0x18   : > { %5414 = vmatprep.mubr.msk.f32.mxu0 %vm1585_vm1, %v6081_v8  ;;  %5509 = vmatprep.subr.msk.mxu0 %vm1650_vm0, %v6090_v9  ;;  %7430 = vst [vmem:[#allocation7_spill] sm:$0xff] %v6132_v14  ;;  %7431 = vst [vmem:[#allocation8_spill] sm:$0xff] %v6135_v16  ;;  %v6151_v19 = vld [vmem:[%s6070_s18 + $0x50] sm:$0xff]  ;;  %v6162_v20 = vld [vmem:[%s6070_s18 + $0x58] sm:$0xff]  ;;  %v1338_v35 = vsel %vm1329_vm2, %v1335_v27, %v1337_v28  ;;  %vm1443_vm4 = vcmp.eq.s32.totalorder %v647_v31, 15  ;;  %v1343_v44 = vrot.slane %v6118_v12, 1 }
  0x19   : > { %7432 = vst [vmem:[#allocation9_spill] sm:$0xff] %v6146_v17  ;;  %7434 = vst [vmem:[#allocation11_spill] sm:$0xff] %v6151_v19  ;;  %v6166_v22 = vld [vmem:[%s6070_s18 + $0x60] sm:$0xff]  ;;  %v6177_v23 = vld [vmem:[%s6070_s18 + $0x68] sm:$0xff]  ;;  %v6220_v39 = vsel %vm1441_vm3, 0.0, %v1338_v35  ;;  %v1342_v43 = vsel %vm1329_vm2, %v1339_v36, %v1341_v37  ;;  %v1345_v45 = vrot.slane %v6121_v13, 1  ;;  %v6230_v46 = vsel %vm1329_vm2, %v1337_v28, %v1339_v36 }
  0x1a   : > { %5218 = vmatmul.mubr.msk.f32.gmra.mrb[4].mxu1 %vm1585_vm1, %v6100_v10  ;;  %5415 = vmatmul.mubr.msk.f32.gmra.mrb[2].mxu0 %vm1585_vm1, %v6100_v10  ;;  %7435 = vst [vmem:[#allocation12_spill] sm:$0xff] %v6162_v20  ;;  %7436 = vst [vmem:[#allocation13_spill] sm:$0xff] %v6166_v22  ;;  %v6184_v29 = vld [vmem:[%s6070_s18 + $0x70] sm:$0xff]  ;;  %v6195_v30 = vld [vmem:[%s6070_s18 + $0x78] sm:$0xff]  ;;  %v6248_v49 = vsel %vm1443_vm4, 0.0, %v1342_v43  ;;  %vm1445_vm5 = vcmp.eq.s32.totalorder %v661_v40, 15  ;;  %v6257_v53 = vsel %vm1329_vm2, %v1341_v37, %v1343_v44 }
  0x1b   : > { %5220 = vmatprep.mubr.msk.f32.mxu1 %vm1585_vm1, %v6105_v11  ;;  %5417 = vmatprep.mubr.msk.f32.mxu0 %vm1585_vm1, %v6105_v11  ;;  %7437 = vst [vmem:[#allocation14_spill] sm:$0xff] %v6184_v29  ;;  %7438 = vst [vmem:[#allocation15_spill] sm:$0xff] %v6195_v30  ;;  %v6199_v33 = vld [vmem:[%s6070_s18 + $0x80] sm:$0xff]  ;;  %v6218_v38 = vld [vmem:[%s6070_s18 + $0x88] sm:$0xff]  ;;  %v675_v50 = vand.u32 15, %v581_v41  ;;  %v1346_v54 = vsel %vm1329_vm2, %v1343_v44, %v1345_v45  ;;  %v1347_v55 = vrot.slane %v6132_v14, 1 }
  0x1c   : > { %7439 = vst [vmem:[#allocation16_spill] sm:$0xff] %v6199_v33  ;;  %v6224_v42 = vld [vmem:[%s6070_s18 + $0x90] sm:$0xff]  ;;  %v6246_v48 = vld [vmem:[%s6070_s18 + $0x98] sm:$0xff]  ;;  %v6254_v52 = vld [vmem:[%s6070_s18 + $0xa0] sm:$0xff]  ;;  %v1349_v56 = vrot.slane %v6135_v16, 1  ;;  %v6275_v58 = vsel %vm1445_vm5, 0.0, %v1346_v54 }
  0x1d   : > { %v6273_v57 = vld [vmem:[%s6070_s18 + $0xa8] sm:$0xff]  ;;  %vm1447_vm6 = vcmp.eq.s32.totalorder %v675_v50, 15  ;;  %v689_v59 = vand.u32 15, %v583_v51  ;;  %v6279_v61 = vld [vmem:[%s6070_s18 + $0xb0] sm:$0xff]  ;;  %v6282_v62 = vsel %vm1329_vm2, %v1345_v45, %v1347_v55  ;;  %v1351_v0 = vrot.slane %v6146_v17, 1  ;;  %v6304_v27 = vld [vmem:[%s6070_s18 + $0xc0] sm:$0xff] }
  0x1e   : > { %5221 = vmatmul.mubr.msk.f32.gmra.mrb[6].mxu1 %vm1585_vm1, %v6118_v12  ;;  %5418 = vmatmul.mubr.msk.f32.gmra.mrb[4].mxu0 %vm1585_vm1, %v6118_v12  ;;  %7440 = vst [vmem:[#allocation17_spill] sm:$0xff] %v6273_v57  ;;  %7441 = vst [vmem:[#allocation18_spill] sm:$0xff] %v6279_v61  ;;  %v1350_v63 = vsel %vm1329_vm2, %v1347_v55, %v1349_v56  ;;  %v1353_v3 = vrot.slane %v6151_v19, 1  ;;  %v587_v4 = vadd.s32 120, %v6148_v18  ;;  %v1355_v21 = vrot.slane %v6162_v20, 1  ;;  %v6323_v37 = vld [vmem:[%s6070_s18 + $0xc8] sm:$0xff] }
  0x1f   : > { %5223 = vmatprep.mubr.msk.f32.mxu1 %vm1585_vm1, %v6121_v13  ;;  %5420 = vmatprep.mubr.msk.f32.mxu0 %vm1585_vm1, %v6121_v13  ;;  %7442 = vst [vmem:[#allocation19_spill] sm:$0xff] %v6282_v62  ;;  %v6299_v15 = vsel %vm1447_vm6, 0.0, %v1350_v63  ;;  %v703_v24 = vand.u32 15, %v585_v60  ;;  %v1357_v25 = vrot.slane %v6166_v22, 1  ;;  %7444 = vst [vmem:[#allocation21_spill] sm:$0xff] %v6304_v27  ;;  %v6307_v28 = vsel %vm1329_vm2, %v1349_v56, %v1351_v0  ;;  %v6330_v44 = vld [vmem:[%s6070_s18 + $0xd0] sm:$0xff] }
  0x20   : > { %7443 = vst [vmem:[#allocation20_spill] sm:$0xff] %v6299_v15  ;;  %7445 = vst [vmem:[#allocation22_spill] sm:$0xff] %v6307_v28  ;;  %v1354_v31 = vsel %vm1329_vm2, %v1351_v0, %v1353_v3  ;;  %vm1449_vm7 = vcmp.eq.s32.totalorder %v689_v59, 15  ;;  %v717_v32 = vand.u32 15, %v587_v4  ;;  %v612_v35 = vand.u32 15, %v6148_v18  ;;  %v6352_v63 = vld [vmem:[%s6070_s18 + $0xd8] sm:$0xff] }
  0x21   : > { %v6316_v36 = vrot.slane %v7351_v2, 7  ;;  %v6325_v40 = vsel %vm1449_vm7, 0.0, %v1354_v31  ;;  %v1358_v41 = vsel %vm1329_vm2, %v1355_v21, %v1357_v25  ;;  %vm1451_vm8 = vcmp.eq.s32.totalorder %v703_v24, 15  ;;  %7447 = vst [vmem:[#allocation24_spill] sm:$0xff] %v6330_v44  ;;  %v6368_v24 = vld [vmem:[%s6070_s18 + $0xe0] sm:$0xff]  ;;  %s4602_s12 = sshll.u32 %s7547_s26, 1 }
  0x22   : > { %5224 = vmatmul.mubr.msk.f32.gmra.mrb[8].mxu1 %vm1585_vm1, %v6132_v14  ;;  %5421 = vmatmul.mubr.msk.f32.gmra.mrb[6].mxu0 %vm1585_vm1, %v6132_v14  ;;  %7446 = vst [vmem:[#allocation23_spill] sm:$0xff] %v6325_v40  ;;  %v1359_v43 = vrot.slane %v6177_v23, 1  ;;  %v6333_v45 = vsel %vm1329_vm2, %v1353_v3, %v1355_v21  ;;  %v1361_v50 = vrot.slane %v6184_v29, 1  ;;  %v589_v51 = vadd.s32 136, %v6148_v18  ;;  %s492_s15 = scalar_lea.vmem %s7349_s8, %s4602_s12 }
  0x23   : > { %5226 = vmatprep.mubr.msk.f32.mxu1 %vm1585_vm1, %v6135_v16  ;;  %5423 = vmatprep.mubr.msk.f32.mxu0 %vm1585_vm1, %v6135_v16  ;;  %7448 = vst [vmem:[#allocation25_spill] sm:$0xff] %v6333_v45  ;;  %v574_v54 = vadd.s32 16, %v6148_v18  ;;  %v1080_v55 = vrot.slane %v6075_v6, 7  ;;  %v6343_v56 = vsel %vm1451_vm8, 0.0, %v1358_v41  ;;  %v591_v59 = vadd.s32 152, %v6148_v18 }
  0x24   : > { %7449 = vst [vmem:[#allocation26_spill] sm:$0xff] %v6343_v56  ;;  %v576_v60 = vadd.s32 32, %v6148_v18  ;;  %v6355_v0 = vsel %vm1329_vm2, %v1357_v25, %v1359_v43  ;;  %vm6357_vm10 = vcmp.eq.s32.totalorder %v717_v32, 15  ;;  %v1184_v4 = vsel %vm1076_vm9, 0.0, %v6316_v36 }
  0x25   : > { %7450 = vst [vmem:[#allocation27_spill] sm:$0xff] %v6355_v0  ;;  %vm6363_vm11 = vcmp.eq.s32.totalorder %v612_v35, 0  ;;  %v1362_v31 = vsel %vm1329_vm2, %v1359_v43, %v1361_v50  ;;  %v1363_v41 = vrot.slane %v6195_v30, 1  ;;  %v731_v25 = vand.u32 15, %v589_v51 }
  0x26   : > { %5227 = vmatmul.mubr.msk.f32.gmra.mrb[10].mxu1 %vm1585_vm1, %v6146_v17  ;;  %5424 = vmatmul.mubr.msk.f32.gmra.mrb[8].mxu0 %vm1585_vm1, %v6146_v17  ;;  %v1365_v32 = vrot.slane %v6199_v33, 1  ;;  %v626_v26 = vand.u32 15, %v574_v54  ;;  %v1367_v2 = vrot.slane %v6218_v38, 1  ;;  %v1084_v35 = vrot.slane %v6081_v8, 7  ;;  %v6387_v54 = vld [vmem:[%s6070_s18 + $0xe8] sm:$0xff] }
  0x27   : > { %5229 = vmatprep.mubr.msk.f32.mxu1 %vm1585_vm1, %v6151_v19  ;;  %5426 = vmatprep.mubr.msk.f32.mxu0 %vm1585_vm1, %v6151_v19  ;;  %v745_v43 = vand.u32 15, %v591_v59  ;;  %v1082_v51 = vrot.slane %v6078_v7, 7  ;;  %v6391_v8 = vsel %vm6357_vm10, 0.0, %v1362_v31  ;;  %v1293_v59 = vsel %vm6363_vm11, 0.0, %v1184_v4 }
  0x28   : > { %v1366_v7 = vsel %vm1329_vm2, %v1363_v41, %v1365_v32  ;;  %vm1455_vm12 = vcmp.eq.s32.totalorder %v731_v25, 15  ;;  %vm6402_vm13 = vcmp.eq.s32.totalorder %v626_v26, 0  ;;  %v1371_v4 = vrot.slane %v6246_v48, 1 }
  0x29   : > { %v1085_v21 = vsel %vm1076_vm9, %v1082_v51, %v1084_v35  ;;  %vm1457_vm14 = vcmp.eq.s32.totalorder %v745_v43, 15  ;;  %v1373_v26 = vrot.slane %v6254_v52, 1  ;;  %v6417_v31 = vsel %vm1455_vm12, 0.0, %v1366_v7 }
  0x2a   : > { %5230 = vmatmul.mubr.msk.f32.gmra.mrb[12].mxu1 %vm1585_vm1, %v6162_v20  ;;  %5427 = vmatmul.mubr.msk.f32.gmra.mrb[10].mxu0 %vm1585_vm1, %v6162_v20  ;;  %7458 = vst [vmem:[#allocation29_spill] sm:$0xff] %v6417_v31 }
  0x2b   : > { %5232 = vmatprep.mubr.msk.f32.mxu1 %vm1585_vm1, %v6166_v22  ;;  %5429 = vmatprep.mubr.msk.f32.mxu0 %vm1585_vm1, %v6166_v22 }
  0x2e   : > { %5233 = vmatmul.mubr.msk.f32.gmra.mrb[14].mxu1 %vm1585_vm1, %v6177_v23  ;;  %5430 = vmatmul.mubr.msk.f32.gmra.mrb[12].mxu0 %vm1585_vm1, %v6177_v23 }
  0x2f   : > { %5235 = vmatprep.mubr.msk.f32.mxu1 %vm1585_vm1, %v6184_v29  ;;  %5432 = vmatprep.mubr.msk.f32.mxu0 %vm1585_vm1, %v6184_v29 }
  0x32   : > { %5236 = vmatmul.mubr.msk.f32.gmra.mrb[16].mxu1 %vm1585_vm1, %v6195_v30  ;;  %5433 = vmatmul.mubr.msk.f32.gmra.mrb[14].mxu0 %vm1585_vm1, %v6195_v30 }
  0x33   : > { %5238 = vmatprep.mubr.msk.f32.mxu1 %vm1585_vm1, %v6199_v33  ;;  %5461 = vmatprep.mubr.msk.f32.mxu0 %vm1585_vm1, %v6204_v34 }
  0x36   : > { %5239 = vmatmul.mubr.msk.f32.gmra.mrb[18].mxu1 %vm1585_vm1, %v6218_v38  ;;  %5462 = vmatmul.mubr.msk.f32.vlgmr.msra.gmra.mrb[0].mxu0 %vm1585_vm1, %v6220_v39 }
  0x37   : > { %5510 = vmatpush3.msk.msra.mxu0 %vm1650_vm0, %v6090_v9  ;;  %5241 = vmatprep.mubr.msk.f32.mxu1 %vm1585_vm1, %v6224_v42  ;;  %v6297_v9 = vld [vmem:[%s6070_s18 + $0xb8] sm:$0xff] }
  0x38   : > { %5464 = vmatprep.mubr.msk.f32.mxu0 %vm1585_vm1, %v6230_v46  ;;  %5559 = vmatprep.subr.msk.mxu0 %vm1650_vm0, %v6235_v47 }
  0x3a   : > { %5242 = vmatmul.mubr.msk.f32.gmra.mrb[20].mxu1 %vm1585_vm1, %v6246_v48  ;;  %5465 = vmatmul.mubr.msk.f32.gmra.mrb[2].mxu0 %vm1585_vm1, %v6248_v49 }
  0x3b   : > { %5244 = vmatprep.mubr.msk.f32.mxu1 %vm1585_vm1, %v6254_v52  ;;  %5467 = vmatprep.mubr.msk.f32.mxu0 %vm1585_vm1, %v6257_v53 }
  0x3e   : > { %5245 = vmatmul.mubr.msk.f32.gmra.mrb[22].mxu1 %vm1585_vm1, %v6273_v57  ;;  %5468 = vmatmul.mubr.msk.f32.gmra.mrb[4].mxu0 %vm1585_vm1, %v6275_v58 }
  0x3f   : > { %5247 = vmatprep.mubr.msk.f32.mxu1 %vm1585_vm1, %v6279_v61  ;;  %5470 = vmatprep.mubr.msk.f32.mxu0 %vm1585_vm1, %v6282_v62  ;;  %v1088_v62 = vrot.slane %v6105_v11, 7 }
  0x42   : > { %5248 = vmatmul.mubr.msk.f32.gmra.mrb[24].mxu1 %vm1585_vm1, %v6297_v9  ;;  %5471 = vmatmul.mubr.msk.f32.gmra.mrb[6].mxu0 %vm1585_vm1, %v6299_v15  ;;  %v1374_v15 = vsel %vm1329_vm2, %v1371_v4, %v1373_v26 }
  0x43   : > { %5250 = vmatprep.mubr.msk.f32.mxu1 %vm1585_vm1, %v6304_v27  ;;  %5473 = vmatprep.mubr.msk.f32.mxu0 %vm1585_vm1, %v6307_v28  ;;  %v593_v28 = vadd.s32 168, %v6148_v18 }
  0x46   : > { %5251 = vmatmul.mubr.msk.f32.gmra.mrb[26].mxu1 %vm1585_vm1, %v6323_v37  ;;  %5474 = vmatmul.mubr.msk.f32.gmra.mrb[8].mxu0 %vm1585_vm1, %v6325_v40  ;;  %v640_v40 = vand.u32 15, %v576_v60  ;;  %v578_v60 = vadd.s32 48, %v6148_v18 }
  0x47   : > { %5253 = vmatprep.mubr.msk.f32.mxu1 %vm1585_vm1, %v6330_v44  ;;  %5476 = vmatprep.mubr.msk.f32.mxu0 %vm1585_vm1, %v6333_v45  ;;  %v1369_v45 = vrot.slane %v6224_v42, 1 }
  0x48   : > { %vm1189_vm15 = vcmp.eq.s32.totalorder %v640_v40, 0  ;;  %v654_v25 = vand.u32 15, %v578_v60  ;;  %v595_v40 = vadd.s32 184, %v6148_v18  ;;  %v1090_v60 = vrot.slane %v6118_v12, 7 }
  0x49   : > { %v1370_v3 = vsel %vm1329_vm2, %v1367_v2, %v1369_v45  ;;  %v582_v12 = vadd.s32 80, %v6148_v18 }
  0x4a   : > { %5254 = vmatmul.mubr.msk.f32.gmra.mrb[28].mxu1 %vm1585_vm1, %v6352_v63  ;;  %5477 = vmatmul.mubr.msk.f32.gmra.mrb[10].mxu0 %vm1585_vm1, %v6343_v56  ;;  %v6397_v56 = vsel %vm1329_vm2, %v1361_v50, %v1363_v41  ;;  %v759_v50 = vand.u32 15, %v593_v28  ;;  %v6420_v41 = vsel %vm1329_vm2, %v1365_v32, %v1367_v2  ;;  %v1086_v28 = vrot.slane %v6100_v10, 7 }
  0x4b   : > { %5256 = vmatprep.mubr.msk.f32.mxu1 %vm1585_vm1, %v6368_v24  ;;  %5479 = vmatprep.mubr.msk.f32.mxu0 %vm1585_vm1, %v6355_v0  ;;  %7455 = vst [vmem:[#allocation28_spill] sm:$0xff] %v6397_v56  ;;  %v1081_v0 = vsel %vm1076_vm9, %v6316_v36, %v1080_v55  ;;  %7459 = vst [vmem:[#allocation30_spill] sm:$0xff] %v6420_v41  ;;  %v6433_v7 = vsel %vm1457_vm14, 0.0, %v1370_v3  ;;  %v6435_v2 = vsel %vm1189_vm15, 0.0, %v1085_v21  ;;  %vm1191_vm4 = vcmp.eq.s32.totalorder %v654_v25, 0 }
  0x4c   : > { %v6425_v43 = vsel %vm6402_vm13, 0.0, %v1081_v0  ;;  %7462 = vst [vmem:[#allocation33_spill] sm:$0xff] %v6433_v7  ;;  %v6438_v32 = vsel %vm1329_vm2, %v1369_v45, %v1371_v4  ;;  %vm1459_vm3 = vcmp.eq.s32.totalorder %v759_v50, 15  ;;  %v1375_v0 = vrot.slane %v6273_v57, 1 }
  0x4d   : > { %7460 = vst [vmem:[#allocation31_spill] sm:$0xff] %v6425_v43  ;;  %7463 = vst [vmem:[#allocation34_spill] sm:$0xff] %v6438_v32  ;;  %v1089_v45 = vsel %vm1076_vm9, %v1086_v28, %v1088_v62  ;;  %v1377_v3 = vrot.slane %v6279_v61, 1  ;;  %v6462_v21 = vsel %vm1076_vm9, %v1084_v35, %v1086_v28  ;;  %v773_v4 = vand.u32 15, %v595_v40 }
  0x4e   : > { %5257 = vmatmul.mubr.msk.f32.gmra.mrb[30].mxu1 %vm1585_vm1, %v6387_v54  ;;  %5480 = vmatmul.mubr.msk.f32.gmra.mrb[12].mxu0 %vm1585_vm1, %v6391_v8  ;;  %v6465_v11 = vsel %vm1459_vm3, 0.0, %v1374_v15  ;;  %v1379_v10 = vrot.slane %v6297_v9, 1  ;;  %v1381_v25 = vrot.slane %v6304_v27, 1  ;;  %v599_v28 = vadd.s32 216, %v6148_v18 }
  0x4f   : > { %5261 = vmatprep.mubr.msk.f32.mxu1 %vm1585_vm1, %v1293_v59  ;;  %5482 = vmatprep.mubr.msk.f32.mxu0 %vm1585_vm1, %v6397_v56  ;;  %v580_v59 = vadd.s32 64, %v6148_v18  ;;  %v6431_v56 = vsel %vm1076_vm9, %v1080_v55, %v1082_v51  ;;  %v597_v55 = vadd.s32 200, %v6148_v18  ;;  %v6450_v51 = vld [vmem:[%s7344_s3 + $0xc] sm:$0xf]  ;;  %7464 = vst [vmem:[#allocation35_spill] sm:$0xff] %v6465_v11  ;;  %v584_v40 = vadd.s32 96, %v6148_v18 }
  0x50   : > { %7461 = vst [vmem:[#allocation32_spill] sm:$0xff] %v6431_v56  ;;  %v6488_v15 = vsel %vm1076_vm9, %v1088_v62, %v1090_v60  ;;  %vm6492_vm5 = vcmp.eq.s32.totalorder %v773_v4, 15  ;;  %v1385_v62 = vrot.slane %v6330_v44, 1 }
  0x51   : > { %v668_v50 = vand.u32 15, %v580_v59  ;;  %v787_v35 = vand.u32 15, %v597_v55  ;;  %v6485_v59 = vsel %vm1329_vm2, %v1373_v26, %v1375_v0  ;;  %v1094_v55 = vrot.slane %v6132_v14, 7 }
  0x52   : > { %5262 = vmatmul.mubr.msk.f32.vlgmr.msra.gmra.mrb[0].mxu1 %vm1585_vm1, %v6316_v36  ;;  %5483 = vmatmul.mubr.msk.f32.gmra.mrb[14].mxu0 %vm1585_vm1, %v6417_v31  ;;  %7465 = vst [vmem:[#allocation36_spill] sm:$0xff] %v6485_v59  ;;  %v682_v26 = vand.u32 15, %v582_v12  ;;  %v696_v4 = vand.u32 15, %v584_v40  ;;  %v1098_v14 = vrot.slane %v6146_v17, 7  ;;  %v6550_v17 = vld [vmem:[%s6070_s18 + $0xf0] sm:$0xff] }
  0x53   : > { %5264 = vmatprep.mubr.msk.f32.mxu1 %vm1585_vm1, %v6425_v43  ;;  %5485 = vmatprep.mubr.msk.f32.mxu0 %vm1585_vm1, %v6420_v41  ;;  %v1092_v43 = vrot.slane %v6121_v13, 7  ;;  %vm1193_vm6 = vcmp.eq.s32.totalorder %v668_v50, 0  ;;  %v1383_v41 = vrot.slane %v6323_v37, 1  ;;  %vm1463_vm7 = vcmp.eq.s32.totalorder %v787_v35, 15 }
  0x54   : > { %5310 = vmatpush3.msk.msra.mxu1 %vm1650_vm0, %v6059_v5  ;;  %v6476_v5 = vsel %vm1191_vm4, 0.0, %v1089_v45  ;;  %v1378_v45 = vsel %vm1329_vm2, %v1375_v0, %v1377_v3  ;;  %v801_v0 = vand.u32 15, %v599_v28  ;;  %v586_v35 = vadd.s32 112, %v6148_v18 }
  0x55   : > { %5359 = vmatprep.subr.msk.mxu1 %vm1650_vm0, %v6450_v51  ;;  %v1093_v13 = vsel %vm1076_vm9, %v1090_v60, %v1092_v43  ;;  %v1100_v60 = vrot.slane %v6151_v19, 7  ;;  %v6512_v12 = vsel %vm6492_vm5, 0.0, %v1378_v45  ;;  %v6519_v28 = vsel %vm1329_vm2, %v1377_v3, %v1379_v10 }
  0x56   : > { %5265 = vmatmul.mubr.msk.f32.gmra.mrb[2].mxu1 %vm1585_vm1, %v6431_v56  ;;  %5486 = vmatmul.mubr.msk.f32.gmra.mrb[16].mxu0 %vm1585_vm1, %v6433_v7  ;;  %v1096_v7 = vrot.slane %v6135_v16, 7  ;;  %7468 = vst [vmem:[#allocation37_spill] sm:$0xff] %v6512_v12  ;;  %v6514_v50 = vsel %vm1193_vm6, 0.0, %v1093_v13  ;;  %v601_v16 = vadd.s32 232, %v6148_v18  ;;  %7469 = vst [vmem:[#allocation38_spill] sm:$0xff] %v6519_v28  ;;  %v6522_v40 = vsel %vm1076_vm9, %v1092_v43, %v1094_v55 }
  0x57   : > { %5267 = vmatprep.mubr.msk.f32.mxu1 %vm1585_vm1, %v6435_v2  ;;  %5488 = vmatprep.mubr.msk.f32.mxu0 %vm1585_vm1, %v6438_v32  ;;  %v1382_v32 = vsel %vm1329_vm2, %v1379_v10, %v1381_v25  ;;  %vm6528_vm8 = vcmp.eq.s32.totalorder %v682_v26, 0  ;;  %v1386_v45 = vsel %vm1329_vm2, %v1383_v41, %v1385_v62  ;;  %vm1465_vm10 = vcmp.eq.s32.totalorder %v801_v0, 15 }
  0x58   : > { %v1097_v19 = vsel %vm1076_vm9, %v1094_v55, %v1096_v7  ;;  %v6526_v56 = vsel %vm1463_vm7, 0.0, %v1382_v32  ;;  %v1101_v10 = vsel %vm1076_vm9, %v1098_v14, %v1100_v60  ;;  %vm6539_vm11 = vcmp.eq.s32.totalorder %v696_v4, 0 }
  0x59   : > { %7470 = vst [vmem:[#allocation39_spill] sm:$0xff] %v6526_v56  ;;  %v1389_v32 = vrot.slane %v6368_v24, 1  ;;  %v815_v3 = vand.u32 15, %v601_v16  ;;  %v710_v55 = vand.u32 15, %v586_v35  ;;  %v1104_v26 = vrot.slane %v6166_v22, 7  ;;  %v6588_v22 = vld [vmem:[%s6070_s18 + $0xf8] sm:$0xff] }
  0x5a   : > { %5268 = vmatmul.mubr.msk.f32.gmra.mrb[4].mxu1 %vm1585_vm1, %v6462_v21  ;;  %5489 = vmatmul.mubr.msk.f32.gmra.mrb[18].mxu0 %vm1585_vm1, %v6465_v11  ;;  %v603_v0 = vadd.s32 248, %v6148_v18  ;;  %v6555_v4 = vsel %vm6528_vm8, 0.0, %v1097_v19  ;;  %v588_v11 = vadd.s32 128, %v6148_v18  ;;  %v6562_v31 = vsel %vm1076_vm9, %v1096_v7, %v1098_v14 }
  0x5b   : > { %5270 = vmatprep.mubr.msk.f32.mxu1 %vm1585_vm1, %v6476_v5  ;;  %5491 = vmatprep.mubr.msk.f32.mxu0 %vm1585_vm1, %v6485_v59  ;;  %v1387_v59 = vrot.slane %v6352_v63, 1  ;;  %v6564_v16 = vsel %vm1465_vm10, 0.0, %v1386_v45  ;;  %v1102_v35 = vrot.slane %v6162_v20, 7  ;;  %v6573_v19 = vsel %vm6539_vm11, 0.0, %v1101_v10 }
  0x5c   : > { %v1391_v14 = vrot.slane %v6387_v54, 1  ;;  %v1393_v7 = vrot.slane %v6550_v17, 1  ;;  %vm1467_vm12 = vcmp.eq.s32.totalorder %v815_v3, 15  ;;  %vm1199_vm13 = vcmp.eq.s32.totalorder %v710_v55, 0 }
  0x5d   : > { %v829_v13 = vand.u32 15, %v603_v0  ;;  %v6584_v45 = vsel %vm1329_vm2, %v1385_v62, %v1387_v59  ;;  %v724_v10 = vand.u32 15, %v588_v11  ;;  %v1108_v43 = vrot.slane %v6184_v29, 7 }
  0x5e   : > { %5271 = vmatmul.mubr.msk.f32.gmra.mrb[6].mxu1 %vm1585_vm1, %v6488_v15  ;;  %5492 = vmatmul.mubr.msk.f32.gmra.mrb[20].mxu0 %vm1585_vm1, %v6512_v12  ;;  %v6558_v12 = vsel %vm1329_vm2, %v1381_v25, %v1383_v41  ;;  %v1390_v41 = vsel %vm1329_vm2, %v1387_v59, %v1389_v32  ;;  %v1105_v25 = vsel %vm1076_vm9, %v1102_v35, %v1104_v26  ;;  %v605_v20 = vadd.s32 264, %v6148_v18 }
  0x5f   : > { %5273 = vmatprep.mubr.msk.f32.mxu1 %vm1585_vm1, %v6514_v50  ;;  %5494 = vmatprep.mubr.msk.f32.mxu0 %vm1585_vm1, %v6519_v28  ;;  %7475 = vst [vmem:[#allocation40_spill] sm:$0xff] %v6558_v12  ;;  %7476 = vst [vmem:[#allocation41_spill] sm:$0xff] %v6584_v45  ;;  %v6600_v59 = vsel %vm1076_vm9, %v1100_v60, %v1102_v35  ;;  %v6602_v11 = vsel %vm1467_vm12, 0.0, %v1390_v41  ;;  %v6604_v62 = vsel %vm1199_vm13, 0.0, %v1105_v25  ;;  %v1106_v3 = vrot.slane %v6177_v23, 7 }
  0x60   : > { %7479 = vst [vmem:[#allocation43_spill] sm:$0xff] %v6602_v11  ;;  %v6612_v55 = vsel %vm1329_vm2, %v1389_v32, %v1391_v14  ;;  %v1394_v0 = vsel %vm1329_vm2, %v1391_v14, %v1393_v7  ;;  %vm1469_vm14 = vcmp.eq.s32.totalorder %v829_v13, 15  ;;  %v1395_v60 = vrot.slane %v6588_v22, 1 }
  0x61   : > { %7480 = vst [vmem:[#allocation44_spill] sm:$0xff] %v6612_v55  ;;  %v1109_v35 = vsel %vm1076_vm9, %v1106_v3, %v1108_v43  ;;  %vm1201_vm15 = vcmp.eq.s32.totalorder %v724_v10, 0  ;;  %v843_v41 = vand.u32 15, %v605_v20  ;;  %v1112_v25 = vrot.slane %v6199_v33, 7 }
  0x62   : > { %5274 = vmatmul.mubr.msk.f32.gmra.mrb[8].mxu1 %vm1585_vm1, %v6522_v40  ;;  %5495 = vmatmul.mubr.msk.f32.gmra.mrb[22].mxu0 %vm1585_vm1, %v6526_v56  ;;  %v7477_v56 = vmov 0.0   ;;  %v592_v29 = vadd.s32 160, %v6148_v18  ;;  %v1110_v32 = vrot.slane %v6195_v30, 7  ;;  %v6629_v20 = vsel %vm1076_vm9, %v1104_v26, %v1106_v3 }
  0x63   : > { %5276 = vmatprep.mubr.msk.f32.mxu1 %vm1585_vm1, %v6555_v4  ;;  %5497 = vmatprep.mubr.msk.f32.mxu0 %vm1585_vm1, %v6558_v12  ;;  %v6592_v28 = vrot.slane %v7477_v56, 1  ;;  %v590_v12 = vadd.s32 144, %v6148_v18  ;;  %v6633_v14 = vsel %vm1201_vm15, 0.0, %v1109_v35  ;;  %v6636_v13 = vsel %vm1329_vm2, %v1393_v7, %v1395_v60 }
  0x64   : > { %7481 = vst [vmem:[#allocation45_spill] sm:$0xff] %v6636_v13  ;;  %vm1471_vm3 = vcmp.eq.s32.totalorder %v843_v41, 15  ;;  %v1113_v33 = vsel %vm1076_vm9, %v1110_v32, %v1112_v25  ;;  %v752_v30 = vand.u32 15, %v592_v29  ;;  %v594_v26 = vadd.s32 176, %v6148_v18 }
  0x65   : > { %7478 = vst [vmem:[#allocation42_spill] sm:$0xff] %v6592_v28  ;;  %v738_v56 = vand.u32 15, %v590_v12  ;;  %v6631_v12 = vsel %vm1469_vm14, 0.0, %v1394_v0  ;;  %v1398_v10 = vsel %vm1329_vm2, %v1395_v60, %v6592_v28  ;;  %v6652_v7 = vsel %vm1076_vm9, %v1108_v43, %v1110_v32 }
  0x66   : > { %5277 = vmatmul.mubr.msk.f32.gmra.mrb[10].mxu1 %vm1585_vm1, %v6562_v31  ;;  %5498 = vmatmul.mubr.msk.f32.gmra.mrb[24].mxu0 %vm1585_vm1, %v6564_v16  ;;  %v6654_v29 = vsel %vm1471_vm3, 0.0, %v1398_v10  ;;  %v1120_v0 = vrot.slane %v6254_v52, 7  ;;  %vm1205_vm5 = vcmp.eq.s32.totalorder %v752_v30, 0  ;;  %v766_v35 = vand.u32 15, %v594_v26 }
  0x67   : > { %5279 = vmatprep.mubr.msk.f32.mxu1 %vm1585_vm1, %v6573_v19  ;;  %5500 = vmatprep.mubr.msk.f32.mxu0 %vm1585_vm1, %v6584_v45  ;;  %vm1203_vm4 = vcmp.eq.s32.totalorder %v738_v56, 0  ;;  %7482 = vst [vmem:[#allocation46_spill] sm:$0xff] %v6654_v29  ;;  %v1114_v56 = vrot.slane %v6218_v38, 7  ;;  %v596_v41 = vadd.s32 192, %v6148_v18  ;;  %v1118_v30 = vrot.slane %v6246_v48, 7 }
  0x68   : > { %v6657_v3 = vsel %vm1203_vm4, 0.0, %v1113_v33  ;;  %v1124_v32 = vrot.slane %v6279_v61, 7  ;;  %vm1207_vm6 = vcmp.eq.s32.totalorder %v766_v35, 0  ;;  %v600_v61 = vadd.s32 224, %v6148_v18 }
  0x69   : > { %v6671_v33 = vsel %vm1076_vm9, %v1112_v25, %v1114_v56  ;;  %v1121_v10 = vsel %vm1076_vm9, %v1118_v30, %v1120_v0  ;;  %v780_v26 = vand.u32 15, %v596_v41  ;;  %v1122_v25 = vrot.slane %v6273_v57, 7 }
  0x6a   : > { %5280 = vmatmul.mubr.msk.f32.gmra.mrb[12].mxu1 %vm1585_vm1, %v6600_v59  ;;  %5501 = vmatmul.mubr.msk.f32.gmra.mrb[26].mxu0 %vm1585_vm1, %v6602_v11  ;;  %v602_v57 = vadd.s32 240, %v6148_v18 }
  0x6b   : > { %5282 = vmatprep.mubr.msk.f32.mxu1 %vm1585_vm1, %v6604_v62  ;;  %5503 = vmatprep.mubr.msk.f32.mxu0 %vm1585_vm1, %v6612_v55  ;;  %v1116_v55 = vrot.slane %v6224_v42, 7  ;;  %v1125_v35 = vsel %vm1076_vm9, %v1122_v25, %v1124_v32  ;;  %vm1209_vm7 = vcmp.eq.s32.totalorder %v780_v26, 0 }
  0x6d   : > { %v1117_v60 = vsel %vm1076_vm9, %v1114_v56, %v1116_v55  ;;  %v6694_v56 = vsel %vm1076_vm9, %v1116_v55, %v1118_v30  ;;  %v6714_v55 = vsel %vm1076_vm9, %v1120_v0, %v1122_v25  ;;  %v6717_v30 = vsel %vm1209_vm7, 0.0, %v1125_v35 }
  0x6e   : > { %5283 = vmatmul.mubr.msk.f32.gmra.mrb[14].mxu1 %vm1585_vm1, %v6629_v20  ;;  %5504 = vmatmul.mubr.msk.f32.gmra.mrb[28].mxu0 %vm1585_vm1, %v6631_v12  ;;  %v6674_v43 = vsel %vm1205_vm5, 0.0, %v1117_v60  ;;  %v6698_v60 = vsel %vm1207_vm6, 0.0, %v1121_v10  ;;  %v1132_v10 = vrot.slane %v6330_v44, 7  ;;  %v1130_v25 = vrot.slane %v6323_v37, 7 }
  0x6f   : > { %5285 = vmatprep.mubr.msk.f32.mxu1 %vm1585_vm1, %v6633_v14  ;;  %5506 = vmatprep.mubr.msk.f32.mxu0 %vm1585_vm1, %v6636_v13  ;;  %v6682_v13 = vld [vmem:[%s7344_s3 + $0x20] sm:$0xf]  ;;  %v1136_v44 = vrot.slane %v6368_v24, 7 }
  0x70   : > { %v1133_v35 = vsel %vm1076_vm9, %v1130_v25, %v1132_v10 }
  0x72   : > { %5286 = vmatmul.mubr.msk.f32.gmra.mrb[16].mxu1 %vm1585_vm1, %v6652_v7  ;;  %5507 = vmatmul.mubr.msk.f32.gmra.mrb[30].mxu0 %vm1585_vm1, %v6654_v29  ;;  %v598_v29 = vadd.s32 208, %v6148_v18 }
  0x73   : > { %5288 = vmatprep.mubr.msk.f32.mxu1 %vm1585_vm1, %v6657_v3  ;;  %5511 = vmatprep.mubr.msk.f32.mxu0 %vm1585_vm1, %v6435_v2 }
  0x74   : > { %v794_v41 = vand.u32 15, %v598_v29  ;;  %v1126_v29 = vrot.slane %v6297_v9, 7 }
  0x76   : > { %5289 = vmatmul.mubr.msk.f32.gmra.mrb[18].mxu1 %vm1585_vm1, %v6671_v33  ;;  %5512 = vmatmul.mubr.msk.f32.vlgmr.msra.gmra.mrb[0].mxu0 %vm1585_vm1, %v6462_v21  ;;  %vm1211_vm8 = vcmp.eq.s32.totalorder %v794_v41, 0  ;;  %v6731_v0 = vsel %vm1076_vm9, %v1124_v32, %v1126_v29  ;;  %v822_v41 = vand.u32 15, %v602_v57 }
  0x77   : > { %5560 = vmatpush3.msk.msra.mxu0 %vm1650_vm0, %v6235_v47  ;;  %5291 = vmatprep.mubr.msk.f32.mxu1 %vm1585_vm1, %v6674_v43  ;;  %v1128_v47 = vrot.slane %v6304_v27, 7  ;;  %v808_v27 = vand.u32 15, %v600_v61 }
  0x78   : > { %5514 = vmatprep.mubr.msk.f32.mxu0 %vm1585_vm1, %v6476_v5  ;;  %5609 = vmatprep.subr.msk.mxu0 %vm1650_vm0, %v6682_v13  ;;  %vm1215_vm11 = vcmp.eq.s32.totalorder %v822_v41, 0 }
  0x79   : > { %v1129_v26 = vsel %vm1076_vm9, %v1126_v29, %v1128_v47  ;;  %vm1213_vm10 = vcmp.eq.s32.totalorder %v808_v27, 0  ;;  %v6747_v32 = vsel %vm1076_vm9, %v1128_v47, %v1130_v25  ;;  %v1134_v27 = vrot.slane %v6352_v63, 7 }
  0x7a   : > { %5292 = vmatmul.mubr.msk.f32.gmra.mrb[20].mxu1 %vm1585_vm1, %v6694_v56  ;;  %5515 = vmatmul.mubr.msk.f32.gmra.mrb[2].mxu0 %vm1585_vm1, %v6488_v15  ;;  %v6734_v61 = vsel %vm1211_vm8, 0.0, %v1129_v26  ;;  %v6750_v57 = vsel %vm1213_vm10, 0.0, %v1133_v35  ;;  %v573_v29 = vadd.s32 8, %v6148_v18  ;;  %v1138_v25 = vrot.slane %v6387_v54, 7 }
  0x7b   : > { %5294 = vmatprep.mubr.msk.f32.mxu1 %vm1585_vm1, %v6698_v60  ;;  %5517 = vmatprep.mubr.msk.f32.mxu0 %vm1585_vm1, %v6514_v50  ;;  %v1137_v26 = vsel %vm1076_vm9, %v1134_v27, %v1136_v44  ;;  %v6763_v47 = vsel %vm1076_vm9, %v1132_v10, %v1134_v27  ;;  %v7485_v27 = vrot.slane %v6075_v6, 1  ;;  %v7486_v6 = vld [vmem:[#allocation19_spill] sm:$0xff] }
  0x7c   : > { %v6766_v35 = vsel %vm1215_vm11, 0.0, %v1137_v26  ;;  %v619_v41 = vand.u32 15, %v573_v29  ;;  %v6777_v10 = vsel %vm1076_vm9, %v1136_v44, %v1138_v25  ;;  %v7487_v26 = vld [vmem:[#allocation20_spill] sm:$0xff] }
  0x7d   : > { %7483 = vst [vmem:[#allocation47_spill] sm:$0xff] %v6766_v35  ;;  %7484 = vst [vmem:[#allocation48_spill] sm:$0xff] %v6777_v10  ;;  %v1334_v29 = vsel %vm1329_vm2, %v6592_v28, %v7485_v27 }
  0x7e   : > { %5295 = vmatmul.mubr.msk.f32.gmra.mrb[22].mxu1 %vm1585_vm1, %v6714_v55  ;;  %5518 = vmatmul.mubr.msk.f32.gmra.mrb[4].mxu0 %vm1585_vm1, %v6522_v40  ;;  %vm1439_vm12 = vcmp.eq.s32.totalorder %v619_v41, 15  ;;  %v7488_v41 = vld [vmem:[#allocation22_spill] sm:$0xff] }
  0x7f   : > { %5297 = vmatprep.mubr.msk.f32.mxu1 %vm1585_vm1, %v6717_v30  ;;  %5520 = vmatprep.mubr.msk.f32.mxu0 %vm1585_vm1, %v6555_v4  ;;  %v1547_v44 = vsel %vm1439_vm12, 0.0, %v1334_v29 }
  0x82   : > { %5298 = vmatmul.mubr.msk.f32.gmra.mrb[24].mxu1 %vm1585_vm1, %v6731_v0  ;;  %5521 = vmatmul.mubr.msk.f32.gmra.mrb[6].mxu0 %vm1585_vm1, %v6562_v31 }
  0x83   : > { %5300 = vmatprep.mubr.msk.f32.mxu1 %vm1585_vm1, %v6734_v61  ;;  %5523 = vmatprep.mubr.msk.f32.mxu0 %vm1585_vm1, %v6573_v19 }
  0x86   : > { %5301 = vmatmul.mubr.msk.f32.gmra.mrb[26].mxu1 %vm1585_vm1, %v6747_v32  ;;  %5524 = vmatmul.mubr.msk.f32.gmra.mrb[8].mxu0 %vm1585_vm1, %v6600_v59 }
  0x87   : > { %5303 = vmatprep.mubr.msk.f32.mxu1 %vm1585_vm1, %v6750_v57  ;;  %5526 = vmatprep.mubr.msk.f32.mxu0 %vm1585_vm1, %v6604_v62 }
  0x8a   : > { %5304 = vmatmul.mubr.msk.f32.gmra.mrb[28].mxu1 %vm1585_vm1, %v6763_v47  ;;  %5527 = vmatmul.mubr.msk.f32.gmra.mrb[10].mxu0 %vm1585_vm1, %v6629_v20 }
  0x8b   : > { %5306 = vmatprep.mubr.msk.f32.mxu1 %vm1585_vm1, %v6766_v35  ;;  %5529 = vmatprep.mubr.msk.f32.mxu0 %vm1585_vm1, %v6633_v14 }
  0x8e   : > { %5307 = vmatmul.mubr.msk.f32.gmra.mrb[30].mxu1 %vm1585_vm1, %v6777_v10  ;;  %5530 = vmatmul.mubr.msk.f32.gmra.mrb[12].mxu0 %vm1585_vm1, %v6652_v7 }
  0x8f   : > { %5311 = vmatprep.mubr.msk.f32.mxu1 %vm1585_vm1, %v6592_v28  ;;  %5532 = vmatprep.mubr.msk.f32.mxu0 %vm1585_vm1, %v6657_v3  ;;  %v1142_v28 = vrot.slane %v6588_v22, 7 }
  0x92   : > { %5312 = vmatmul.mubr.msk.f32.vlgmr.msra.gmra.mrb[0].mxu1 %vm1585_vm1, %v1547_v44  ;;  %5533 = vmatmul.mubr.msk.f32.gmra.mrb[14].mxu0 %vm1585_vm1, %v6671_v33  ;;  %v7489_v44 = vld [vmem:[#allocation23_spill] sm:$0xff] }
  0x93   : > { %5314 = vmatprep.mubr.msk.f32.mxu1 %vm1585_vm1, %v6204_v34  ;;  %5535 = vmatprep.mubr.msk.f32.mxu0 %vm1585_vm1, %v6674_v43 }
  0x94   : > { %5360 = vmatpush3.msk.msra.mxu1 %vm1650_vm0, %v6450_v51  ;;  %v606_v51 = vadd.s32 272, %v6148_v18 }
  0x95   : > { %5659 = vmatprep.subr.msk.mxu1 %vm1650_vm0, %v6038_v1  ;;  %v604_v1 = vadd.s32 256, %v6148_v18 }
  0x96   : > { %5315 = vmatmul.mubr.msk.f32.gmra.mrb[2].mxu1 %vm1585_vm1, %v6220_v39  ;;  %5536 = vmatmul.mubr.msk.f32.gmra.mrb[16].mxu0 %vm1585_vm1, %v6694_v56  ;;  %v1140_v39 = vrot.slane %v6550_v17, 7  ;;  %v850_v29 = vand.u32 15, %v606_v51  ;;  %v7492_v51 = vld [vmem:[#allocation27_spill] sm:$0xff] }
  0x97   : > { %5317 = vmatprep.mubr.msk.f32.mxu1 %vm1585_vm1, %v6230_v46  ;;  %5538 = vmatprep.mubr.msk.f32.mxu0 %vm1585_vm1, %v6698_v60  ;;  %v836_v34 = vand.u32 15, %v604_v1  ;;  %v7490_v1 = vld [vmem:[#allocation25_spill] sm:$0xff] }
  0x98   : > { %v1141_v27 = vsel %vm1076_vm9, %v1138_v25, %v1140_v39  ;;  %v1145_v25 = vsel %vm1076_vm9, %v1142_v28, %v6316_v36  ;;  %vm1219_vm14 = vcmp.eq.s32.totalorder %v850_v29, 0  ;;  %v7494_v29 = vld [vmem:[#allocation28_spill] sm:$0xff] }
  0x99   : > { %vm1217_vm13 = vcmp.eq.s32.totalorder %v836_v34, 0  ;;  %v7491_v34 = vld [vmem:[#allocation26_spill] sm:$0xff] }
  0x9a   : > { %5318 = vmatmul.mubr.msk.f32.gmra.mrb[4].mxu1 %vm1585_vm1, %v6248_v49  ;;  %5539 = vmatmul.mubr.msk.f32.gmra.mrb[18].mxu0 %vm1585_vm1, %v6714_v55  ;;  %v6847_v18 = vsel %vm1217_vm13, 0.0, %v1141_v27  ;;  %v1327_v27 = vsel %vm1219_vm14, 0.0, %v1145_v25  ;;  %v7498_v25 = vld [vmem:[#allocation33_spill] sm:$0xff] }
  0x9b   : > { %5320 = vmatprep.mubr.msk.f32.mxu1 %vm1585_vm1, %v6257_v53  ;;  %5541 = vmatprep.mubr.msk.f32.mxu0 %vm1585_vm1, %v6717_v30 }
  0x9e   : > { %5321 = vmatmul.mubr.msk.f32.gmra.mrb[6].mxu1 %vm1585_vm1, %v6275_v58  ;;  %5542 = vmatmul.mubr.msk.f32.gmra.mrb[20].mxu0 %vm1585_vm1, %v6731_v0 }
  0x9f   : > { %5323 = vmatprep.mubr.msk.f32.mxu1 %vm1585_vm1, %v7486_v6  ;;  %5544 = vmatprep.mubr.msk.f32.mxu0 %vm1585_vm1, %v6734_v61 }
  0xa2   : > { %5324 = vmatmul.mubr.msk.f32.gmra.mrb[8].mxu1 %vm1585_vm1, %v7487_v26  ;;  %5545 = vmatmul.mubr.msk.f32.gmra.mrb[22].mxu0 %vm1585_vm1, %v6747_v32 }
  0xa3   : > { %5326 = vmatprep.mubr.msk.f32.mxu1 %vm1585_vm1, %v7488_v41  ;;  %5547 = vmatprep.mubr.msk.f32.mxu0 %vm1585_vm1, %v6750_v57 }
  0xa6   : > { %5327 = vmatmul.mubr.msk.f32.gmra.mrb[10].mxu1 %vm1585_vm1, %v7489_v44  ;;  %5548 = vmatmul.mubr.msk.f32.gmra.mrb[24].mxu0 %vm1585_vm1, %v6763_v47 }
  0xa7   : > { %5329 = vmatprep.mubr.msk.f32.mxu1 %vm1585_vm1, %v7490_v1  ;;  %5550 = vmatprep.mubr.msk.f32.mxu0 %vm1585_vm1, %v6766_v35  ;;  %v6860_v35 = vsel %vm1076_vm9, %v1140_v39, %v1142_v28  ;;  %v7496_v28 = vld [vmem:[#allocation30_spill] sm:$0xff] }
  0xa8   : > { %7493 = vst [vmem:[#allocation19_spill] sm:$0xff] %v6860_v35  ;;  %v7497_v39 = vld [vmem:[#allocation2_spill] sm:$0xff] }
  0xaa   : > { %5330 = vmatmul.mubr.msk.f32.gmra.mrb[12].mxu1 %vm1585_vm1, %v7491_v34  ;;  %5551 = vmatmul.mubr.msk.f32.gmra.mrb[26].mxu0 %vm1585_vm1, %v6777_v10  ;;  %v7495_v10 = vld [vmem:[#allocation29_spill] sm:$0xff] }
  0xab   : > { %5332 = vmatprep.mubr.msk.f32.mxu1 %vm1585_vm1, %v7492_v51  ;;  %5553 = vmatprep.mubr.msk.f32.mxu0 %vm1585_vm1, %v6847_v18 }
  0xae   : > { %5333 = vmatmul.mubr.msk.f32.gmra.mrb[14].mxu1 %vm1585_vm1, %v6391_v8  ;;  %5554 = vmatmul.mubr.msk.f32.gmra.mrb[28].mxu0 %vm1585_vm1, %v6860_v35  ;;  %v7499_v35 = vld [vmem:[#allocation3_spill] sm:$0xff] }
  0xaf   : > { %5335 = vmatprep.mubr.msk.f32.mxu1 %vm1585_vm1, %v7494_v29  ;;  %5556 = vmatprep.mubr.msk.f32.mxu0 %vm1585_vm1, %v1327_v27  ;;  %v7500_v27 = vld [vmem:[#allocation34_spill] sm:$0xff] }
  0xb2   : > { %5336 = vmatmul.mubr.msk.f32.gmra.mrb[16].mxu1 %vm1585_vm1, %v7495_v10  ;;  %5557 = vmatmul.mubr.msk.f32.gmra.mrb[30].mxu0 %vm1585_vm1, %v6316_v36  ;;  %v7501_v10 = vld [vmem:[#allocation4_spill] sm:$0xff]  ;;  %v7502_v36 = vld [vmem:[#allocation35_spill] sm:$0xff] }
  0xb3   : > { %5338 = vmatprep.mubr.msk.f32.mxu1 %vm1585_vm1, %v7496_v28  ;;  %5561 = vmatprep.mubr.msk.f32.mxu0 %vm1585_vm1, %v7497_v39  ;;  %v7503_v28 = vld [vmem:[#allocation5_spill] sm:$0xff]  ;;  %v7504_v39 = vld [vmem:[#allocation36_spill] sm:$0xff] }
  0xb6   : > { %5339 = vmatmul.mubr.msk.f32.gmra.mrb[18].mxu1 %vm1585_vm1, %v7498_v25  ;;  %5562 = vmatmul.mubr.msk.f32.vlgmr.msra.gmra.mrb[0].mxu0 %vm1585_vm1, %v7499_v35  ;;  %v7505_v25 = vld [vmem:[#allocation6_spill] sm:$0xff]  ;;  %v7506_v35 = vld [vmem:[#allocation37_spill] sm:$0xff] }
  0xb7   : > { %5610 = vmatpush3.msk.msra.mxu0 %vm1650_vm0, %v6682_v13  ;;  %5341 = vmatprep.mubr.msk.f32.mxu1 %vm1585_vm1, %v7500_v27  ;;  %v7507_v13 = vld [vmem:[#allocation7_spill] sm:$0xff]  ;;  %v7508_v27 = vld [vmem:[#allocation38_spill] sm:$0xff] }
  0xb8   : > { %5564 = vmatprep.mubr.msk.f32.mxu0 %vm1585_vm1, %v7501_v10  ;;  %v7509_v10 = vld [vmem:[#allocation8_spill] sm:$0xff] }
  0xba   : > { %5342 = vmatmul.mubr.msk.f32.gmra.mrb[20].mxu1 %vm1585_vm1, %v7502_v36  ;;  %5565 = vmatmul.mubr.msk.f32.gmra.mrb[2].mxu0 %vm1585_vm1, %v7503_v28  ;;  %v7510_v36 = vld [vmem:[#allocation39_spill] sm:$0xff]  ;;  %v7511_v28 = vld [vmem:[#allocation9_spill] sm:$0xff] }
  0xbb   : > { %5344 = vmatprep.mubr.msk.f32.mxu1 %vm1585_vm1, %v7504_v39  ;;  %5567 = vmatprep.mubr.msk.f32.mxu0 %vm1585_vm1, %v7505_v25  ;;  %v7512_v39 = vld [vmem:[#allocation40_spill] sm:$0xff]  ;;  %v7513_v25 = vld [vmem:[#allocation11_spill] sm:$0xff] }
  0xbe   : > { %5345 = vmatmul.mubr.msk.f32.gmra.mrb[22].mxu1 %vm1585_vm1, %v7506_v35  ;;  %5568 = vmatmul.mubr.msk.f32.gmra.mrb[4].mxu0 %vm1585_vm1, %v7507_v13  ;;  %v7514_v13 = vld [vmem:[#allocation12_spill] sm:$0xff] }
  0xbf   : > { %5347 = vmatprep.mubr.msk.f32.mxu1 %vm1585_vm1, %v7508_v27  ;;  %5570 = vmatprep.mubr.msk.f32.mxu0 %vm1585_vm1, %v7509_v10  ;;  %v7515_v10 = vld [vmem:[#allocation13_spill] sm:$0xff] }
  0xc2   : > { %5348 = vmatmul.mubr.msk.f32.gmra.mrb[24].mxu1 %vm1585_vm1, %v7510_v36  ;;  %5571 = vmatmul.mubr.msk.f32.gmra.mrb[6].mxu0 %vm1585_vm1, %v7511_v28  ;;  %v7516_v28 = vld [vmem:[#allocation44_spill] sm:$0xff] }
  0xc3   : > { %5350 = vmatprep.mubr.msk.f32.mxu1 %vm1585_vm1, %v7512_v39  ;;  %5573 = vmatprep.mubr.msk.f32.mxu0 %vm1585_vm1, %v7513_v25  ;;  %v7517_v25 = vld [vmem:[#allocation14_spill] sm:$0xff] }
  0xc6   : > { %5351 = vmatmul.mubr.msk.f32.gmra.mrb[26].mxu1 %vm1585_vm1, %v6564_v16  ;;  %5574 = vmatmul.mubr.msk.f32.gmra.mrb[8].mxu0 %vm1585_vm1, %v7514_v13  ;;  %v7518_v13 = vld [vmem:[#allocation15_spill] sm:$0xff] }
  0xc7   : > { %5353 = vmatprep.mubr.msk.f32.mxu1 %vm1585_vm1, %v6584_v45  ;;  %5576 = vmatprep.mubr.msk.f32.mxu0 %vm1585_vm1, %v7515_v10  ;;  %v7519_v45 = vld [vmem:[#allocation31_spill] sm:$0xff]  ;;  %v7520_v10 = vld [vmem:[#allocation16_spill] sm:$0xff] }
  0xca   : > { %5354 = vmatmul.mubr.msk.f32.gmra.mrb[28].mxu1 %vm1585_vm1, %v6602_v11  ;;  %5577 = vmatmul.mubr.msk.f32.gmra.mrb[10].mxu0 %vm1585_vm1, %v6177_v23  ;;  %v7521_v11 = vld [vmem:[#allocation32_spill] sm:$0xff] }
  0xcb   : > { %5356 = vmatprep.mubr.msk.f32.mxu1 %vm1585_vm1, %v7516_v28  ;;  %5579 = vmatprep.mubr.msk.f32.mxu0 %vm1585_vm1, %v7517_v25  ;;  %v5942_v23 = vld [vmem:[%s7344_s3 + $0x10] sm:$0xf] }
  0xce   : > { %5357 = vmatmul.mubr.msk.f32.gmra.mrb[30].mxu1 %vm1585_vm1, %v6631_v12  ;;  %5580 = vmatmul.mubr.msk.f32.gmra.mrb[12].mxu0 %vm1585_vm1, %v7518_v13 }
  0xcf   : > { %5361 = vmatprep.mubr.msk.f32.mxu1 %vm1585_vm1, %v7519_v45  ;;  %5582 = vmatprep.mubr.msk.f32.mxu0 %vm1585_vm1, %v7520_v10  ;;  %v7523_v45 = vld [vmem:[#allocation18_spill] sm:$0xff] }
  0xd2   : > { %5362 = vmatmul.mubr.msk.f32.vlgmr.msra.gmra.mrb[0].mxu1 %vm1585_vm1, %v7521_v11  ;;  %5583 = vmatmul.mubr.msk.f32.gmra.mrb[14].mxu0 %vm1585_vm1, %v6218_v38 }
  0xd3   : > { %5364 = vmatprep.mubr.msk.f32.mxu1 %vm1585_vm1, %v6435_v2  ;;  %5585 = vmatprep.mubr.msk.f32.mxu0 %vm1585_vm1, %v6224_v42  ;;  %v7522_v2 = vld [vmem:[#allocation17_spill] sm:$0xff] }
  0xd4   : > { %5660 = vmatpush3.msk.msra.mxu1 %vm1650_vm0, %v5942_v23 }
  0xd6   : > { %5365 = vmatmul.mubr.msk.f32.gmra.mrb[2].mxu1 %vm1585_vm1, %v6462_v21  ;;  %5586 = vmatmul.mubr.msk.f32.gmra.mrb[16].mxu0 %vm1585_vm1, %v6246_v48  ;;  %v7524_v21 = vld [vmem:[#allocation21_spill] sm:$0xff] }
  0xd7   : > { %5367 = vmatprep.mubr.msk.f32.mxu1 %vm1585_vm1, %v6476_v5  ;;  %5588 = vmatprep.mubr.msk.f32.mxu0 %vm1585_vm1, %v6254_v52  ;;  %v7525_v5 = vld [vmem:[#allocation24_spill] sm:$0xff] }
  0xda   : > { %5368 = vmatmul.mubr.msk.f32.gmra.mrb[4].mxu1 %vm1585_vm1, %v6488_v15  ;;  %5589 = vmatmul.mubr.msk.f32.gmra.mrb[18].mxu0 %vm1585_vm1, %v7522_v2  ;;  %v5943_v15 = vld [vmem:[%s6070_s18 + $0x80] sm:$0xff] }
  0xdb   : > { %5370 = vmatprep.mubr.msk.f32.mxu1 %vm1585_vm1, %v6514_v50  ;;  %5591 = vmatprep.mubr.msk.f32.mxu0 %vm1585_vm1, %v7523_v45  ;;  %v7531_v50 = vld [vmem:[#allocation30_spill] sm:$0xff] }
  0xde   : > { %5371 = vmatmul.mubr.msk.f32.gmra.mrb[6].mxu1 %vm1585_vm1, %v6522_v40  ;;  %5592 = vmatmul.mubr.msk.f32.gmra.mrb[20].mxu0 %vm1585_vm1, %v6297_v9  ;;  %v7534_v40 = vld [vmem:[#allocation35_spill] sm:$0xff] }
  0xdf   : > { %5373 = vmatprep.mubr.msk.f32.mxu1 %vm1585_vm1, %v6555_v4  ;;  %5594 = vmatprep.mubr.msk.f32.mxu0 %vm1585_vm1, %v7524_v21  ;;  %v7535_v4 = vld [vmem:[#allocation36_spill] sm:$0xff] }
  0xe2   : > { %5374 = vmatmul.mubr.msk.f32.gmra.mrb[8].mxu1 %vm1585_vm1, %v6562_v31  ;;  %5595 = vmatmul.mubr.msk.f32.gmra.mrb[22].mxu0 %vm1585_vm1, %v6323_v37  ;;  %v7526_v31 = vmov 0.0  }
  0xe3   : > { %5376 = vmatprep.mubr.msk.f32.mxu1 %vm1585_vm1, %v6573_v19  ;;  %5597 = vmatprep.mubr.msk.f32.mxu0 %vm1585_vm1, %v7525_v5 }
  0xe6   : > { %5377 = vmatmul.mubr.msk.f32.gmra.mrb[10].mxu1 %vm1585_vm1, %v6600_v59  ;;  %5598 = vmatmul.mubr.msk.f32.gmra.mrb[24].mxu0 %vm1585_vm1, %v6352_v63 }
  0xe7   : > { %5379 = vmatprep.mubr.msk.f32.mxu1 %vm1585_vm1, %v6604_v62  ;;  %5600 = vmatprep.mubr.msk.f32.mxu0 %vm1585_vm1, %v6368_v24 }
  0xea   : > { %5380 = vmatmul.mubr.msk.f32.gmra.mrb[12].mxu1 %vm1585_vm1, %v6629_v20  ;;  %5601 = vmatmul.mubr.msk.f32.gmra.mrb[26].mxu0 %vm1585_vm1, %v6387_v54 }
  0xeb   : > { %5382 = vmatprep.mubr.msk.f32.mxu1 %vm1585_vm1, %v6633_v14  ;;  %5603 = vmatprep.mubr.msk.f32.mxu0 %vm1585_vm1, %v6550_v17 }
  0xee   : > { %5383 = vmatmul.mubr.msk.f32.gmra.mrb[14].mxu1 %vm1585_vm1, %v6652_v7  ;;  %5604 = vmatmul.mubr.msk.f32.gmra.mrb[28].mxu0 %vm1585_vm1, %v6588_v22 }
  0xef   : > { %5385 = vmatprep.mubr.msk.f32.mxu1 %vm1585_vm1, %v6657_v3  ;;  %5606 = vmatprep.mubr.f32.mxu0 %v7526_v31 }
  0xf2   : > { %5386 = vmatmul.mubr.msk.f32.gmra.mrb[16].mxu1 %vm1585_vm1, %v6671_v33  ;;  %5607 = vmatmul.mubr.f32.gmra.mrb[30].mxu0 %v7526_v31 }
  0xf3   : > { %5388 = vmatprep.mubr.msk.f32.mxu1 %vm1585_vm1, %v6674_v43  ;;  %5611 = vmatprep.mubr.msk.f32.mxu0 %vm1585_vm1, %v6230_v46  ;;  %v7527_v46 = vld [vmem:[#allocation47_spill] sm:$0xff] }
  0xf6   : > { %5389 = vmatmul.mubr.msk.f32.gmra.mrb[18].mxu1 %vm1585_vm1, %v6694_v56  ;;  %5612 = vmatmul.mubr.msk.f32.vlgmr.msra.gmra.mrb[0].mxu0 %vm1585_vm1, %v6248_v49  ;;  %v7528_v49 = vld [vmem:[#allocation48_spill] sm:$0xff] }
  0xf7   : > { %5391 = vmatprep.mubr.msk.f32.mxu1 %vm1585_vm1, %v6698_v60  ;;  %5614 = vmatprep.mubr.msk.f32.mxu0 %vm1585_vm1, %v6257_v53  ;;  %v7529_v53 = vld [vmem:[#allocation19_spill] sm:$0xff] }
  0xfa   : > { %5392 = vmatmul.mubr.msk.f32.gmra.mrb[20].mxu1 %vm1585_vm1, %v6714_v55  ;;  %5615 = vmatmul.mubr.msk.f32.gmra.mrb[2].mxu0 %vm1585_vm1, %v6275_v58  ;;  %v7530_v58 = vld [vmem:[#allocation29_spill] sm:$0xff] }
  0xfb   : > { %5394 = vmatprep.mubr.msk.f32.mxu1 %vm1585_vm1, %v6717_v30  ;;  %5617 = vmatprep.mubr.msk.f32.mxu0 %vm1585_vm1, %v7486_v6 }
  0xfe   : > { %5395 = vmatmul.mubr.msk.f32.gmra.mrb[22].mxu1 %vm1585_vm1, %v6731_v0  ;;  %5618 = vmatmul.mubr.msk.f32.gmra.mrb[4].mxu0 %vm1585_vm1, %v7487_v26  ;;  %v7150_v0 = vld [vmem:[%s7345_s4] ss:$0 sm:$0xff] }
  0xff   : > { %5397 = vmatprep.mubr.msk.f32.mxu1 %vm1585_vm1, %v6734_v61  ;;  %5620 = vmatprep.mubr.msk.f32.mxu0 %vm1585_vm1, %v7488_v41 }
 0x102   : > { %5398 = vmatmul.mubr.msk.f32.gmra.mrb[24].mxu1 %vm1585_vm1, %v6747_v32  ;;  %5621 = vmatmul.mubr.msk.f32.gmra.mrb[6].mxu0 %vm1585_vm1, %v7489_v44 }
 0x103   : > { %5400 = vmatprep.mubr.msk.f32.mxu1 %vm1585_vm1, %v6750_v57  ;;  %5623 = vmatprep.mubr.msk.f32.mxu0 %vm1585_vm1, %v7490_v1 }
 0x106   : > { %5401 = vmatmul.mubr.msk.f32.gmra.mrb[26].mxu1 %vm1585_vm1, %v6763_v47  ;;  %5624 = vmatmul.mubr.msk.f32.gmra.mrb[8].mxu0 %vm1585_vm1, %v7491_v34 }
 0x107   : > { %5403 = vmatprep.mubr.msk.f32.mxu1 %vm1585_vm1, %v7527_v46  ;;  %5626 = vmatprep.mubr.msk.f32.mxu0 %vm1585_vm1, %v7492_v51 }
 0x10a   : > { %5404 = vmatmul.mubr.msk.f32.gmra.mrb[28].mxu1 %vm1585_vm1, %v7528_v49  ;;  %5627 = vmatmul.mubr.msk.f32.gmra.mrb[10].mxu0 %vm1585_vm1, %v6391_v8  ;;  %v7532_v8 = vld [vmem:[#allocation33_spill] sm:$0xff] }
 0x10b   : > { %5406 = vmatprep.mubr.msk.f32.mxu1 %vm1585_vm1, %v6847_v18  ;;  %5629 = vmatprep.mubr.msk.f32.mxu0 %vm1585_vm1, %v7494_v29  ;;  %v7533_v18 = vld [vmem:[#allocation34_spill] sm:$0xff] }
 0x10e   : > { %5407 = vmatmul.mubr.msk.f32.gmra.mrb[30].mxu1 %vm1585_vm1, %v7529_v53  ;;  %5630 = vmatmul.mubr.msk.f32.gmra.mrb[12].mxu0 %vm1585_vm1, %v7530_v58 }
 0x10f   : > { %5435 = vmatprep.mubr.msk.f32.mxu1 %vm1585_vm1, %v5943_v15  ;;  %5632 = vmatprep.mubr.msk.f32.mxu0 %vm1585_vm1, %v7531_v50 }
 0x112   : > { %5436 = vmatmul.mubr.msk.f32.vlgmr.msra.gmra.mrb[16].mxu1 %vm1585_vm1, %v6218_v38  ;;  %5633 = vmatmul.mubr.msk.f32.gmra.mrb[14].mxu0 %vm1585_vm1, %v7532_v8  ;;  %v7536_v38 = vld [vmem:[#allocation41_spill] sm:$0xff] }
 0x113   : > { %5438 = vmatprep.mubr.msk.f32.mxu1 %vm1585_vm1, %v6224_v42  ;;  %5635 = vmatprep.mubr.msk.f32.mxu0 %vm1585_vm1, %v7533_v18  ;;  %v7537_v42 = vld [vmem:[#allocation10_spill] sm:$0xff] }
 0x116   : > { %5439 = vmatmul.mubr.msk.f32.gmra.mrb[18].mxu1 %vm1585_vm1, %v6246_v48  ;;  %5636 = vmatmul.mubr.msk.f32.gmra.mrb[16].mxu0 %vm1585_vm1, %v7534_v40  ;;  %v607_v48 = vadd.s32 280, %v7537_v42 }
 0x117   : > { %5441 = vmatprep.mubr.msk.f32.mxu1 %vm1585_vm1, %v6254_v52  ;;  %5638 = vmatprep.mubr.msk.f32.mxu0 %vm1585_vm1, %v7535_v4  ;;  %v7538_v52 = vld [vmem:[#allocation43_spill] sm:$0xff] }
 0x11a   : > { %5442 = vmatmul.mubr.msk.f32.gmra.mrb[20].mxu1 %vm1585_vm1, %v7522_v2  ;;  %5639 = vmatmul.mubr.msk.f32.gmra.mrb[18].mxu0 %vm1585_vm1, %v7506_v35 }
 0x11b   : > { %5444 = vmatprep.mubr.msk.f32.mxu1 %vm1585_vm1, %v7523_v45  ;;  %5641 = vmatprep.mubr.msk.f32.mxu0 %vm1585_vm1, %v7508_v27 }
 0x11e   : > { %5445 = vmatmul.mubr.msk.f32.gmra.mrb[22].mxu1 %vm1585_vm1, %v6297_v9  ;;  %5642 = vmatmul.mubr.msk.f32.gmra.mrb[20].mxu0 %vm1585_vm1, %v7510_v36  ;;  %v857_v9 = vand.u32 15, %v607_v48 }
 0x11f   : > { %5447 = vmatprep.mubr.msk.f32.mxu1 %vm1585_vm1, %v7524_v21  ;;  %5644 = vmatprep.mubr.msk.f32.mxu0 %vm1585_vm1, %v7512_v39 }
 0x120   : > { %vm1473_vm0 = vcmp.eq.s32.totalorder %v857_v9, 15 }
 0x122   : > { %5448 = vmatmul.mubr.msk.f32.gmra.mrb[24].mxu1 %vm1585_vm1, %v6323_v37  ;;  %5645 = vmatmul.mubr.msk.f32.gmra.mrb[22].mxu0 %vm1585_vm1, %v6564_v16  ;;  %v7539_v37 = vld [vmem:[#allocation45_spill] sm:$0xff] }
 0x123   : > { %5450 = vmatprep.mubr.msk.f32.mxu1 %vm1585_vm1, %v7525_v5  ;;  %5647 = vmatprep.mubr.msk.f32.mxu0 %vm1585_vm1, %v7536_v38 }
 0x126   : > { %5451 = vmatmul.mubr.msk.f32.gmra.mrb[26].mxu1 %vm1585_vm1, %v6352_v63  ;;  %5648 = vmatmul.mubr.msk.f32.gmra.mrb[24].mxu0 %vm1585_vm1, %v7538_v52  ;;  %v7540_v63 = vld [vmem:[#allocation42_spill] sm:$0xff] }
 0x127   : > { %5453 = vmatprep.mubr.msk.f32.mxu1 %vm1585_vm1, %v6368_v24  ;;  %5650 = vmatprep.mubr.msk.f32.mxu0 %vm1585_vm1, %v7516_v28  ;;  %v1437_v16 = vsel %vm1329_vm2, %v7540_v63, 0.0  ;;  %v7541_v24 = vld [vmem:[#allocation46_spill] sm:$0xff]  ;;  %vm4408_vm2 = vcmask 58368  }
 0x12a   : > { %5454 = vmatmul.mubr.msk.f32.gmra.mrb[28].mxu1 %vm1585_vm1, %v6387_v54  ;;  %5651 = vmatmul.mubr.msk.f32.gmra.mrb[26].mxu0 %vm1585_vm1, %v6631_v12  ;;  %v1581_v54 = vsel %vm1473_vm0, 0.0, %v1437_v16 }
 0x12b   : > { %5456 = vmatprep.mubr.msk.f32.mxu1 %vm1585_vm1, %v6550_v17  ;;  %5653 = vmatprep.mubr.msk.f32.mxu0 %vm1585_vm1, %v7539_v37 }
 0x12e   : > { %5457 = vmatmul.mubr.msk.f32.gmra.mrb[30].mxu1 %vm1585_vm1, %v6588_v22  ;;  %5654 = vmatmul.mubr.msk.f32.gmra.mrb[28].mxu0 %vm1585_vm1, %v7541_v24 }
 0x12f   : > { %5656 = vmatprep.mubr.msk.f32.mxu0 %vm1585_vm1, %v7540_v63 }
 0x132   : > { %5657 = vmatmul.mubr.msk.f32.gmra.mrb[30].mxu0 %vm1585_vm1, %v1581_v54  ;;  %vm4204_vm1 = vcmask 64512  }
 0x1a5   : > { %v5363_v17 = vpop.f32.mrb[0].mxu1 }
 0x1a6   : > { %v2638_v19 = vpop.f32.mrb[1].mxu1 }
 0x1a9   : > { %v5366_v59 = vpop.f32.mrb[2].mxu1 }
 0x1aa   : > { %v2648_v11 = vpop.f32.mrb[3].mxu1 }
 0x1ad   : > { %v5369_v62 = vpop.f32.mrb[4].mxu1 }
 0x1ae   : > { %v2658_v20 = vpop.f32.mrb[5].mxu1 }
 0x1b1   : > { %v5372_v12 = vpop.f32.mrb[6].mxu1 }
 0x1b2   : > { %v2668_v14 = vpop.f32.mrb[7].mxu1 }
 0x1b5   : > { %v7131_v7 = vpop.f32.mrb[8].mxu1 }
 0x1b6   : > { %v7133_v22 = vpop.f32.mrb[9].mxu1 }
 0x1b9   : > { %v7135_v3 = vpop.f32.mrb[10].mxu1 }
 0x1ba   : > { %v7137_v33 = vpop.f32.mrb[11].mxu1 }
 0x1bd   : > { %v7139_v43 = vpop.f32.mrb[12].mxu1 }
 0x1be   : > { %v7141_v56 = vpop.f32.mrb[13].mxu1 }
 0x1c1   : > { %v7143_v60 = vpop.f32.mrb[14].mxu1 }
 0x1c2   : > { %v7145_v55 = vpop.f32.mrb[15].mxu1 }
 0x1c9   : > { %v5613_v30 = vpop.f32.mrb[0].mxu0 }
 0x1ca   : > { %v5661_v61 = vadd.f32 %v5613_v30, %v5363_v17  ;;  %v3974_v32 = vpop.f32.mrb[1].mxu0 }
 0x1cb   : > { %v5662_v57 = vadd.f32 %v3974_v32, %v2638_v19 }
 0x1cc   : > { %v4173_v47 = vadd.f32 %v5661_v61, %v7150_v0 }
 0x1cd   : > { %v4172_v6 = vadd.f32 %v5662_v57, %v7150_v0  ;;  %v5616_v26 = vpop.f32.mrb[2].mxu0 }
 0x1ce   : > { %4206 = vst.msk [vmem:[%s7157_s11 + $0x8] sm:$0xff] %vm4204_vm1, %v4173_v47  ;;  %v4238_v41 = vsel %vm4204_vm1, %v4173_v47, 0.0  ;;  %v4307_v44 = vmul.f32 %v4173_v47, %v4173_v47  ;;  %v5663_v1 = vadd.f32 %v5616_v26, %v5366_v59  ;;  %v3984_v34 = vpop.f32.mrb[3].mxu0 }
 0x1cf   : > { %4205 = vst.msk [vmem:[%s7157_s11] sm:$0xff] %vm4204_vm1, %v4172_v6  ;;  %v4237_v51 = vsel %vm4204_vm1, %v4172_v6, 0.0  ;;  %v4306_v29 = vmul.f32 %v4172_v6, %v4172_v6  ;;  %v5664_v27 = vadd.f32 %v3984_v34, %v2648_v11 }
 0x1d0   : > { %v4339_v36 = vsel %vm4204_vm1, %v4307_v44, 0.0  ;;  %v4239_v39 = vadd.f32 %v4238_v41, %v4237_v51  ;;  %v4175_v35 = vadd.f32 %v5663_v1, %v7150_v0 }
 0x1d1   : > { %v4338_v28 = vsel %vm4204_vm1, %v4306_v29, 0.0  ;;  %v4174_v25 = vadd.f32 %v5664_v27, %v7150_v0  ;;  %v5619_v13 = vpop.f32.mrb[4].mxu0 }
 0x1d2   : > { %v4340_v10 = vadd.f32 %v4339_v36, %v4338_v28  ;;  %4208 = vst.msk [vmem:[%s7157_s11 + $0x18] sm:$0xff] %vm4204_vm1, %v4175_v35  ;;  %v4309_v23 = vmul.f32 %v4175_v35, %v4175_v35  ;;  %v5665_v2 = vadd.f32 %v5619_v13, %v5369_v62  ;;  %v3994_v45 = vpop.f32.mrb[5].mxu0  ;;  %v4242_v53 = vsel %vm4204_vm1, %v4175_v35, 0.0 }
 0x1d3   : > { %4207 = vst.msk [vmem:[%s7157_s11 + $0x10] sm:$0xff] %vm4204_vm1, %v4174_v25  ;;  %v4240_v21 = vsel %vm4204_vm1, %v4174_v25, 0.0  ;;  %v4308_v5 = vmul.f32 %v4174_v25, %v4174_v25  ;;  %v5666_v31 = vadd.f32 %v3994_v45, %v2658_v20 }
 0x1d4   : > { %v4241_v46 = vadd.f32 %v4240_v21, %v4239_v39  ;;  %v4177_v49 = vadd.f32 %v5665_v2, %v7150_v0  ;;  %v4343_v8 = vsel %vm4204_vm1, %v4309_v23, 0.0 }
 0x1d5   : > { %v4341_v58 = vsel %vm4204_vm1, %v4308_v5, 0.0  ;;  %v4176_v15 = vadd.f32 %v5666_v31, %v7150_v0  ;;  %v5622_v50 = vpop.f32.mrb[6].mxu0 }
 0x1d6   : > { %v4342_v18 = vadd.f32 %v4341_v58, %v4340_v10  ;;  %4210 = vst.msk [vmem:[%s7157_s11 + $0x28] sm:$0xff] %vm4204_vm1, %v4177_v49  ;;  %v4311_v40 = vmul.f32 %v4177_v49, %v4177_v49  ;;  %v4243_v4 = vadd.f32 %v4242_v53, %v4241_v46  ;;  %v4004_v38 = vpop.f32.mrb[7].mxu0  ;;  %v5667_v52 = vadd.f32 %v5622_v50, %v5372_v12 }
 0x1d7   : > { %4209 = vst.msk [vmem:[%s7157_s11 + $0x20] sm:$0xff] %vm4204_vm1, %v4176_v15  ;;  %v4244_v42 = vsel %vm4204_vm1, %v4176_v15, 0.0  ;;  %v4310_v48 = vmul.f32 %v4176_v15, %v4176_v15  ;;  %v5668_v9 = vadd.f32 %v4004_v38, %v2668_v14  ;;  %v4246_v16 = vsel %vm4204_vm1, %v4177_v49, 0.0 }
 0x1d8   : > { %v4245_v37 = vadd.f32 %v4244_v42, %v4243_v4  ;;  %v4344_v63 = vadd.f32 %v4343_v8, %v4342_v18  ;;  %v4179_v54 = vadd.f32 %v5667_v52, %v7150_v0  ;;  %v4347_v12 = vsel %vm4204_vm1, %v4311_v40, 0.0 }
 0x1d9   : > { %v4345_v24 = vsel %vm4204_vm1, %v4310_v48, 0.0  ;;  %v4178_v17 = vadd.f32 %v5668_v9, %v7150_v0  ;;  %v5625_v19 = vpop.f32.mrb[8].mxu0 }
 0x1da   : > { %v4346_v59 = vadd.f32 %v4345_v24, %v4344_v63  ;;  %v4247_v11 = vadd.f32 %v4246_v16, %v4245_v37  ;;  %v5669_v62 = vadd.f32 %v5625_v19, %v7131_v7  ;;  %v4014_v20 = vpop.f32.mrb[9].mxu0  ;;  %4212 = vst.msk [vmem:[%s7157_s11 + $0x38] sm:$0xff] %vm4204_vm1, %v4179_v54  ;;  %v4313_v14 = vmul.f32 %v4179_v54, %v4179_v54 }
 0x1db   : > { %4211 = vst.msk [vmem:[%s7157_s11 + $0x30] sm:$0xff] %vm4204_vm1, %v4178_v17  ;;  %v4248_v30 = vsel %vm4204_vm1, %v4178_v17, 0.0  ;;  %v4312_v61 = vmul.f32 %v4178_v17, %v4178_v17  ;;  %v5670_v6 = vadd.f32 %v4014_v20, %v7133_v22  ;;  %v4250_v41 = vsel %vm4204_vm1, %v4179_v54, 0.0 }
 0x1dc   : > { %v4249_v32 = vadd.f32 %v4248_v30, %v4247_v11  ;;  %v4348_v57 = vadd.f32 %v4347_v12, %v4346_v59  ;;  %v4181_v47 = vadd.f32 %v5669_v62, %v7150_v0  ;;  %v4351_v44 = vsel %vm4204_vm1, %v4313_v14, 0.0 }
 0x1dd   : > { %v4349_v7 = vsel %vm4204_vm1, %v4312_v61, 0.0  ;;  %v5628_v26 = vpop.f32.mrb[10].mxu0  ;;  %v4180_v34 = vadd.f32 %v5670_v6, %v7150_v0 }
 0x1de   : > { %v4350_v1 = vadd.f32 %v4349_v7, %v4348_v57  ;;  %4214 = vst.msk [vmem:[%s7157_s11 + $0x48] sm:$0xff] %vm4204_vm1, %v4181_v47  ;;  %v4024_v51 = vpop.f32.mrb[11].mxu0  ;;  %v4315_v29 = vmul.f32 %v4181_v47, %v4181_v47  ;;  %v4251_v27 = vadd.f32 %v4250_v41, %v4249_v32  ;;  %v5671_v36 = vadd.f32 %v5628_v26, %v7135_v3 }
 0x1df   : > { %v5672_v22 = vadd.f32 %v4024_v51, %v7137_v33  ;;  %4213 = vst.msk [vmem:[%s7157_s11 + $0x40] sm:$0xff] %vm4204_vm1, %v4180_v34  ;;  %v4252_v39 = vsel %vm4204_vm1, %v4180_v34, 0.0  ;;  %v4314_v35 = vmul.f32 %v4180_v34, %v4180_v34  ;;  %v4254_v2 = vsel %vm4204_vm1, %v4181_v47, 0.0 }
 0x1e0   : > { %v4352_v28 = vadd.f32 %v4351_v44, %v4350_v1  ;;  %v4253_v25 = vadd.f32 %v4252_v39, %v4251_v27  ;;  %v4183_v13 = vadd.f32 %v5671_v36, %v7150_v0  ;;  %v4355_v21 = vsel %vm4204_vm1, %v4315_v29, 0.0 }
 0x1e1   : > { %v4182_v10 = vadd.f32 %v5672_v22, %v7150_v0  ;;  %v5631_v23 = vpop.f32.mrb[12].mxu0  ;;  %v4353_v3 = vsel %vm4204_vm1, %v4314_v35, 0.0 }
 0x1e2   : > { %v5673_v45 = vadd.f32 %v5631_v23, %v7139_v43  ;;  %v4034_v33 = vpop.f32.mrb[13].mxu0  ;;  %v4354_v5 = vadd.f32 %v4353_v3, %v4352_v28  ;;  %4216 = vst.msk [vmem:[%s7157_s11 + $0x58] sm:$0xff] %vm4204_vm1, %v4183_v13  ;;  %v4317_v31 = vmul.f32 %v4183_v13, %v4183_v13  ;;  %v4255_v46 = vadd.f32 %v4254_v2, %v4253_v25 }
 0x1e3   : > { %4215 = vst.msk [vmem:[%s7157_s11 + $0x50] sm:$0xff] %vm4204_vm1, %v4182_v10  ;;  %v4256_v49 = vsel %vm4204_vm1, %v4182_v10, 0.0  ;;  %v4316_v53 = vmul.f32 %v4182_v10, %v4182_v10  ;;  %v5674_v15 = vadd.f32 %v4034_v33, %v7141_v56  ;;  %v4258_v40 = vsel %vm4204_vm1, %v4183_v13, 0.0 }
 0x1e4   : > { %v4185_v58 = vadd.f32 %v5673_v45, %v7150_v0  ;;  %v4257_v50 = vadd.f32 %v4256_v49, %v4255_v46  ;;  %v4356_v43 = vadd.f32 %v4355_v21, %v4354_v5  ;;  %v4359_v16 = vsel %vm4204_vm1, %v4317_v31, 0.0 }
 0x1e5   : > { %v5437_v8 = vpop.f32.mrb[16].mxu1  ;;  %v5634_v18 = vpop.f32.mrb[14].mxu0  ;;  %v4357_v4 = vsel %vm4204_vm1, %v4316_v53, 0.0  ;;  %v4184_v42 = vadd.f32 %v5674_v15, %v7150_v0 }
 0x1e6   : > { %4218 = vst.msk [vmem:[%s7157_s11 + $0x68] sm:$0xff] %vm4204_vm1, %v4185_v58  ;;  %v4319_v38 = vmul.f32 %v4185_v58, %v4185_v58  ;;  %v2984_v48 = vpop.f32.mrb[17].mxu1  ;;  %v4044_v52 = vpop.f32.mrb[15].mxu0  ;;  %v4358_v9 = vadd.f32 %v4357_v4, %v4356_v43  ;;  %v4259_v37 = vadd.f32 %v4258_v40, %v4257_v50  ;;  %v5675_v56 = vadd.f32 %v5634_v18, %v7143_v60 }
 0x1e7   : > { %v5676_v63 = vadd.f32 %v4044_v52, %v7145_v55  ;;  %4217 = vst.msk [vmem:[%s7157_s11 + $0x60] sm:$0xff] %vm4204_vm1, %v4184_v42  ;;  %v4260_v24 = vsel %vm4204_vm1, %v4184_v42, 0.0  ;;  %v4318_v54 = vmul.f32 %v4184_v42, %v4184_v42  ;;  %v4262_v60 = vsel %vm4204_vm1, %v4185_v58, 0.0 }
 0x1e8   : > { %v4261_v17 = vadd.f32 %v4260_v24, %v4259_v37  ;;  %v4360_v19 = vadd.f32 %v4359_v16, %v4358_v9  ;;  %v4187_v59 = vadd.f32 %v5675_v56, %v7150_v0  ;;  %v4363_v61 = vsel %vm4204_vm1, %v4319_v38, 0.0 }
 0x1e9   : > { %v4186_v11 = vadd.f32 %v5676_v63, %v7150_v0  ;;  %v5440_v62 = vpop.f32.mrb[18].mxu1  ;;  %v5637_v20 = vpop.f32.mrb[16].mxu0  ;;  %v4361_v55 = vsel %vm4204_vm1, %v4318_v54, 0.0 }
 0x1ea   : > { %v5677_v12 = vadd.f32 %v5637_v20, %v5437_v8  ;;  %v2994_v14 = vpop.f32.mrb[19].mxu1  ;;  %v4054_v30 = vpop.f32.mrb[17].mxu0  ;;  %v4362_v32 = vadd.f32 %v4361_v55, %v4360_v19  ;;  %4220 = vst.msk [vmem:[%s7157_s11 + $0x78] sm:$0xff] %vm4204_vm1, %v4187_v59  ;;  %v4321_v57 = vmul.f32 %v4187_v59, %v4187_v59  ;;  %v4263_v47 = vadd.f32 %v4262_v60, %v4261_v17 }
 0x1eb   : > { %4219 = vst.msk [vmem:[%s7157_s11 + $0x70] sm:$0xff] %vm4204_vm1, %v4186_v11  ;;  %v4264_v6 = vsel %vm4204_vm1, %v4186_v11, 0.0  ;;  %v4320_v7 = vmul.f32 %v4186_v11, %v4186_v11  ;;  %v5678_v41 = vadd.f32 %v4054_v30, %v2984_v48  ;;  %v4266_v29 = vsel %vm4204_vm1, %v4187_v59, 0.0 }
 0x1ec   : > { %v4189_v26 = vadd.f32 %v5677_v12, %v7150_v0  ;;  %v4265_v44 = vadd.f32 %v4264_v6, %v4263_v47  ;;  %v4364_v1 = vadd.f32 %v4363_v61, %v4362_v32  ;;  %v4367_v23 = vsel %vm4204_vm1, %v4321_v57, 0.0 }
 0x1ed   : > { %v5443_v34 = vpop.f32.mrb[20].mxu1  ;;  %v5640_v51 = vpop.f32.mrb[18].mxu0  ;;  %v4365_v27 = vsel %vm4204_vm1, %v4320_v7, 0.0  ;;  %v4188_v22 = vadd.f32 %v5678_v41, %v7150_v0 }
 0x1ee   : > { %4222 = vst.msk [vmem:[%s7157_s11 + $0x88] sm:$0xff] %vm4204_vm1, %v4189_v26  ;;  %v4323_v36 = vmul.f32 %v4189_v26, %v4189_v26  ;;  %v3004_v39 = vpop.f32.mrb[21].mxu1  ;;  %v4064_v35 = vpop.f32.mrb[19].mxu0  ;;  %v4366_v28 = vadd.f32 %v4365_v27, %v4364_v1  ;;  %v4267_v25 = vadd.f32 %v4266_v29, %v4265_v44  ;;  %v5679_v13 = vadd.f32 %v5640_v51, %v5440_v62 }
 0x1ef   : > { %v5680_v10 = vadd.f32 %v4064_v35, %v2994_v14  ;;  %4221 = vst.msk [vmem:[%s7157_s11 + $0x80] sm:$0xff] %vm4204_vm1, %v4188_v22  ;;  %v4268_v2 = vsel %vm4204_vm1, %v4188_v22, 0.0  ;;  %v4322_v3 = vmul.f32 %v4188_v22, %v4188_v22  ;;  %v4270_v49 = vsel %vm4204_vm1, %v4189_v26, 0.0 }
 0x1f0   : > { %v4269_v45 = vadd.f32 %v4268_v2, %v4267_v25  ;;  %v4368_v33 = vadd.f32 %v4367_v23, %v4366_v28  ;;  %v4191_v21 = vadd.f32 %v5679_v13, %v7150_v0  ;;  %v4371_v43 = vsel %vm4204_vm1, %v4323_v36, 0.0 }
 0x1f1   : > { %v4190_v5 = vadd.f32 %v5680_v10, %v7150_v0  ;;  %v5446_v31 = vpop.f32.mrb[22].mxu1  ;;  %v5643_v46 = vpop.f32.mrb[20].mxu0  ;;  %v4369_v53 = vsel %vm4204_vm1, %v4322_v3, 0.0 }
 0x1f2   : > { %v5681_v58 = vadd.f32 %v5643_v46, %v5443_v34  ;;  %v3014_v15 = vpop.f32.mrb[23].mxu1  ;;  %v4074_v50 = vpop.f32.mrb[21].mxu0  ;;  %v4370_v8 = vadd.f32 %v4369_v53, %v4368_v33  ;;  %4224 = vst.msk [vmem:[%s7157_s11 + $0x98] sm:$0xff] %vm4204_vm1, %v4191_v21  ;;  %v4325_v18 = vmul.f32 %v4191_v21, %v4191_v21  ;;  %v4271_v40 = vadd.f32 %v4270_v49, %v4269_v45 }
 0x1f3   : > { %4223 = vst.msk [vmem:[%s7157_s11 + $0x90] sm:$0xff] %vm4204_vm1, %v4190_v5  ;;  %v4272_v4 = vsel %vm4204_vm1, %v4190_v5, 0.0  ;;  %v4324_v38 = vmul.f32 %v4190_v5, %v4190_v5  ;;  %v5682_v48 = vadd.f32 %v4074_v50, %v3004_v39  ;;  %v4274_v63 = vsel %vm4204_vm1, %v4191_v21, 0.0 }
 0x1f4   : > { %v4193_v42 = vadd.f32 %v5681_v58, %v7150_v0  ;;  %v4273_v52 = vadd.f32 %v4272_v4, %v4271_v40  ;;  %v4372_v9 = vadd.f32 %v4371_v43, %v4370_v8  ;;  %v4375_v60 = vsel %vm4204_vm1, %v4325_v18, 0.0 }
 0x1f5   : > { %v5449_v37 = vpop.f32.mrb[24].mxu1  ;;  %v5646_v56 = vpop.f32.mrb[22].mxu0  ;;  %v4373_v16 = vsel %vm4204_vm1, %v4324_v38, 0.0  ;;  %v4192_v54 = vadd.f32 %v5682_v48, %v7150_v0 }
 0x1f6   : > { %4226 = vst.msk [vmem:[%s7157_s11 + $0xa8] sm:$0xff] %vm4204_vm1, %v4193_v42  ;;  %v4327_v24 = vmul.f32 %v4193_v42, %v4193_v42  ;;  %v3024_v17 = vpop.f32.mrb[25].mxu1  ;;  %v4084_v19 = vpop.f32.mrb[23].mxu0  ;;  %v4374_v59 = vadd.f32 %v4373_v16, %v4372_v9  ;;  %v4275_v11 = vadd.f32 %v4274_v63, %v4273_v52  ;;  %v5683_v62 = vadd.f32 %v5646_v56, %v5446_v31 }
 0x1f7   : > { %v5684_v20 = vadd.f32 %v4084_v19, %v3014_v15  ;;  %4225 = vst.msk [vmem:[%s7157_s11 + $0xa0] sm:$0xff] %vm4204_vm1, %v4192_v54  ;;  %v4276_v55 = vsel %vm4204_vm1, %v4192_v54, 0.0  ;;  %v4326_v12 = vmul.f32 %v4192_v54, %v4192_v54  ;;  %v4278_v6 = vsel %vm4204_vm1, %v4193_v42, 0.0 }
 0x1f8   : > { %v4277_v14 = vadd.f32 %v4276_v55, %v4275_v11  ;;  %v4376_v30 = vadd.f32 %v4375_v60, %v4374_v59  ;;  %v4195_v61 = vadd.f32 %v5683_v62, %v7150_v0  ;;  %v4379_v1 = vsel %vm4204_vm1, %v4327_v24, 0.0 }
 0x1f9   : > { %v4194_v32 = vadd.f32 %v5684_v20, %v7150_v0  ;;  %v5452_v57 = vpop.f32.mrb[26].mxu1  ;;  %v5649_v47 = vpop.f32.mrb[24].mxu0  ;;  %v4377_v7 = vsel %vm4204_vm1, %v4326_v12, 0.0 }
 0x1fa   : > { %v5685_v26 = vadd.f32 %v5649_v47, %v5449_v37  ;;  %v3034_v41 = vpop.f32.mrb[27].mxu1  ;;  %v4094_v44 = vpop.f32.mrb[25].mxu0  ;;  %v4378_v34 = vadd.f32 %v4377_v7, %v4376_v30  ;;  %4228 = vst.msk [vmem:[%s7157_s11 + $0xb8] sm:$0xff] %vm4204_vm1, %v4195_v61  ;;  %v4329_v51 = vmul.f32 %v4195_v61, %v4195_v61  ;;  %v4279_v29 = vadd.f32 %v4278_v6, %v4277_v14 }
 0x1fb   : > { %4227 = vst.msk [vmem:[%s7157_s11 + $0xb0] sm:$0xff] %vm4204_vm1, %v4194_v32  ;;  %v4280_v27 = vsel %vm4204_vm1, %v4194_v32, 0.0  ;;  %v4328_v36 = vmul.f32 %v4194_v32, %v4194_v32  ;;  %v5686_v39 = vadd.f32 %v4094_v44, %v3024_v17  ;;  %v4282_v10 = vsel %vm4204_vm1, %v4195_v61, 0.0 }
 0x1fc   : > { %v4197_v22 = vadd.f32 %v5685_v26, %v7150_v0  ;;  %v4281_v35 = vadd.f32 %v4280_v27, %v4279_v29  ;;  %v4380_v28 = vadd.f32 %v4379_v1, %v4378_v34  ;;  %v4383_v49 = vsel %vm4204_vm1, %v4329_v51, 0.0 }
 0x1fd   : > { %v5455_v25 = vpop.f32.mrb[28].mxu1  ;;  %v5652_v13 = vpop.f32.mrb[26].mxu0  ;;  %v4381_v23 = vsel %vm4204_vm1, %v4328_v36, 0.0  ;;  %v4196_v3 = vadd.f32 %v5686_v39, %v7150_v0 }
 0x1fe   : > { %4230 = vst.msk [vmem:[%s7157_s11 + $0xc8] sm:$0xff] %vm4204_vm1, %v4197_v22  ;;  %v4331_v2 = vmul.f32 %v4197_v22, %v4197_v22  ;;  %v3044_v45 = vpop.f32.mrb[29].mxu1  ;;  %v4104_v33 = vpop.f32.mrb[27].mxu0  ;;  %v4382_v21 = vadd.f32 %v4381_v23, %v4380_v28  ;;  %v4283_v5 = vadd.f32 %v4282_v10, %v4281_v35  ;;  %v5687_v31 = vadd.f32 %v5652_v13, %v5452_v57 }
 0x1ff   : > { %v5688_v46 = vadd.f32 %v4104_v33, %v3034_v41  ;;  %4229 = vst.msk [vmem:[%s7157_s11 + $0xc0] sm:$0xff] %vm4204_vm1, %v4196_v3  ;;  %v4284_v53 = vsel %vm4204_vm1, %v4196_v3, 0.0  ;;  %v4330_v58 = vmul.f32 %v4196_v3, %v4196_v3  ;;  %v4286_v4 = vsel %vm4204_vm1, %v4197_v22, 0.0 }
 0x200   : > { %v4285_v15 = vadd.f32 %v4284_v53, %v4283_v5  ;;  %v4384_v50 = vadd.f32 %v4383_v49, %v4382_v21  ;;  %v4199_v43 = vadd.f32 %v5687_v31, %v7150_v0  ;;  %v4387_v9 = vsel %vm4204_vm1, %v4331_v2, 0.0 }
 0x201   : > { %v4198_v8 = vadd.f32 %v5688_v46, %v7150_v0  ;;  %v5458_v18 = vpop.f32.mrb[30].mxu1  ;;  %v5655_v40 = vpop.f32.mrb[28].mxu0  ;;  %v4385_v38 = vsel %vm4204_vm1, %v4330_v58, 0.0 }
 0x202   : > { %v5689_v42 = vadd.f32 %v5655_v40, %v5455_v25  ;;  %v3054_v48 = vpop.f32.mrb[31].mxu1  ;;  %v4114_v52 = vpop.f32.mrb[29].mxu0  ;;  %v4386_v37 = vadd.f32 %v4385_v38, %v4384_v50  ;;  %4232 = vst.msk [vmem:[%s7157_s11 + $0xd8] sm:$0xff] %vm4204_vm1, %v4199_v43  ;;  %v4333_v56 = vmul.f32 %v4199_v43, %v4199_v43  ;;  %v4287_v63 = vadd.f32 %v4286_v4, %v4285_v15 }
 0x203   : > { %4231 = vst.msk [vmem:[%s7157_s11 + $0xd0] sm:$0xff] %vm4204_vm1, %v4198_v8  ;;  %v4288_v16 = vsel %vm4204_vm1, %v4198_v8, 0.0  ;;  %v4332_v24 = vmul.f32 %v4198_v8, %v4198_v8  ;;  %v5690_v17 = vadd.f32 %v4114_v52, %v3044_v45  ;;  %v4290_v62 = vsel %vm4204_vm1, %v4199_v43, 0.0 }
 0x204   : > { %v4201_v54 = vadd.f32 %v5689_v42, %v7150_v0  ;;  %v4289_v19 = vadd.f32 %v4288_v16, %v4287_v63  ;;  %v4388_v59 = vadd.f32 %v4387_v9, %v4386_v37  ;;  %v4391_v32 = vsel %vm4204_vm1, %v4333_v56, 0.0 }
 0x205   : > { %v5658_v11 = vpop.f32.mrb[30].mxu0  ;;  %v4389_v20 = vsel %vm4204_vm1, %v4332_v24, 0.0  ;;  %v4200_v60 = vadd.f32 %v5690_v17, %v7150_v0 }
 0x206   : > { %4234 = vst.msk [vmem:[%s7157_s11 + $0xe8] sm:$0xff] %vm4204_vm1, %v4201_v54  ;;  %v4124_v55 = vpop.f32.mrb[31].mxu0  ;;  %v4390_v12 = vadd.f32 %v4389_v20, %v4388_v59  ;;  %v4291_v14 = vadd.f32 %v4290_v62, %v4289_v19  ;;  %v5691_v30 = vadd.f32 %v5658_v11, %v5458_v18  ;;  %v4335_v57 = vmul.f32 %v4201_v54, %v4201_v54 }
 0x207   : > { %v5692_v61 = vadd.f32 %v4124_v55, %v3054_v48  ;;  %4233 = vst.msk [vmem:[%s7157_s11 + $0xe0] sm:$0xff] %vm4204_vm1, %v4200_v60  ;;  %v4292_v47 = vsel %vm4204_vm1, %v4200_v60, 0.0  ;;  %v4334_v6 = vmul.f32 %v4200_v60, %v4200_v60  ;;  %v4294_v1 = vsel %vm4204_vm1, %v4201_v54, 0.0 }
 0x208   : > { %v4293_v7 = vadd.f32 %v4292_v47, %v4291_v14  ;;  %v4392_v26 = vadd.f32 %v4391_v32, %v4390_v12  ;;  %v4203_v41 = vadd.f32 %v5691_v30, %v7150_v0  ;;  %v4395_v22 = vsel %vm4204_vm1, %v4335_v57, 0.0 }
 0x209   : > { %v4202_v44 = vadd.f32 %v5692_v61, %v7150_v0  ;;  %v4393_v34 = vsel %vm4204_vm1, %v4334_v6, 0.0 }
 0x20a   : > { %v4394_v51 = vadd.f32 %v4393_v34, %v4392_v26  ;;  %4236 = vst.msk [vmem:[%s7157_s11 + $0xf8] sm:$0xff] %vm4204_vm1, %v4203_v41  ;;  %v4298_v29 = vsel %vm4204_vm1, %v4203_v41, 0.0  ;;  %v4337_v27 = vmul.f32 %v4203_v41, %v4203_v41  ;;  %v4295_v36 = vadd.f32 %v4294_v1, %v4293_v7 }
 0x20b   : > { %4235 = vst.msk [vmem:[%s7157_s11 + $0xf0] sm:$0xff] %vm4204_vm1, %v4202_v44  ;;  %v4296_v39 = vsel %vm4204_vm1, %v4202_v44, 0.0  ;;  %v4336_v35 = vmul.f32 %v4202_v44, %v4202_v44 }
 0x20c   : > { %v4399_v0 = vsel %vm4204_vm1, %v4337_v27, 0.0  ;;  %v4297_v28 = vadd.f32 %v4296_v39, %v4295_v36  ;;  %v4396_v25 = vadd.f32 %v4395_v22, %v4394_v51 }
 0x20d   : > { %v4397_v13 = vsel %vm4204_vm1, %v4336_v35, 0.0 }
 0x20e   : > { %v4299_v10 = vadd.f32 %v4298_v29, %v4297_v28  ;;  %v4398_v23 = vadd.f32 %v4397_v13, %v4396_v25 }
 0x210   : > { %v4300_v2 = vrot.slane %v4299_v10, 4  ;;  %v4400_v3 = vadd.f32 %v4399_v0, %v4398_v23 }
 0x212   : > { %v4301_v45 = vadd.f32 %v4300_v2, %v4299_v10  ;;  %v4401_v33 = vrot.slane %v4400_v3, 4 }
 0x214   : > { %v4302_v21 = vrot.slane %v4301_v45, 2  ;;  %v4402_v5 = vadd.f32 %v4401_v33, %v4400_v3 }
 0x216   : > { %v4303_v31 = vadd.f32 %v4302_v21, %v4301_v45  ;;  %v4403_v46 = vrot.slane %v4402_v5, 2 }
 0x218   : > { %v4304_v49 = vrot.slane %v4303_v31, 1  ;;  %v4404_v53 = vadd.f32 %v4403_v46, %v4402_v5 }
 0x21a   : > { %v4405_v58 = vrot.slane %v4404_v53, 1  ;;  %v4305_v15 = vadd.f32 %v4304_v49, %v4303_v31 }
 0x21c   : > { %v4406_v50 = vadd.f32 %v4405_v58, %v4404_v53 }
 0x21e   : > { %v4407_v43 = vsel %vm1076_vm9, %v4305_v15, %v4406_v50 }
 0x21f   : > { %4409 = vst.msk [vmem:[%s492_s15] sm:$0x3] %vm4408_vm2, %v4407_v43 }
 0x220 PF: > { %s19_s27 = sadd.s32 1, %s5966_s27   ;;  %s7542_s26 = smov %s5962_s2 }
 0x221   : > { %p16_p5 = scmp.ge.s32.totalorder %s19_s27, 4   ;;  %s7543_s2 = smov %s7545_s5 }
 0x223   :  { %18 = sbr.rel (!%p16_p5) target bundleno = 2 (0x2), region = 104 }

</bundles_post_ra>
